<compile_context>
chip_gen: v5e
topology: v5e:2x2
jax: 0.10.0
libtpu: 0.0.40
codegen_flags: <defaults>
</compile_context>

<pallas_src>
import numpy as np

import jax
import jax.numpy as jnp
from jax import lax
from jax.experimental import pallas as pl
from jax.experimental.pallas import tpu as pltpu


# ------------------------------ small helpers ------------------------------ #

def conv2d_size(size, kernel_size, stride):
    return (size - kernel_size) // stride + 1


def _conv_selection(h_in, w_in, kernel_size, stride):
    """One-hot spatial shift-selection matrices for an in-kernel im2col.

    Returns t of shape (K*K, h_in*w_in, h_out*w_out) with
      t[kh*K+kw, q, p] = 1  iff  q == (s*ho+kh)*w_in + (s*wo+kw),  p = ho*w_out+wo
    so (act_channel_major @ t[j]) gathers, per channel, the input values seen
    by kernel tap (kh, kw) at every output position.
    """
    h_out = conv2d_size(h_in, kernel_size, stride)
    w_out = conv2d_size(w_in, kernel_size, stride)
    t = np.zeros((kernel_size * kernel_size, h_in * w_in, h_out * w_out),
                 np.float32)
    for kh in range(kernel_size):
        for kw in range(kernel_size):
            j = kh * kernel_size + kw
            for ho in range(h_out):
                for wo in range(w_out):
                    q = (stride * ho + kh) * w_in + (stride * wo + kw)
                    t[j, q, ho * w_out + wo] = 1.0
    return jnp.asarray(t), (h_out, w_out)


# ------------------------------ Pallas kernel ------------------------------ #

def _bn_relu_channel_major(y, gamma_col, beta_col, eps=1e-5):
    """BatchNorm2d (training batch stats, N=1) + ReLU on (C, P) data.

    One-pass variance, gamma folded into the rsqrt scale. Per-channel conv
    bias is omitted by the caller because BN's mean subtraction cancels it.
    """
    m = jnp.mean(y, axis=1, keepdims=True)                       # (C, 1)
    var = jnp.maximum(jnp.mean(y * y, axis=1, keepdims=True) - m * m, 0.0)
    scale = gamma_col * lax.rsqrt(var + eps)                     # (C, 1)
    return jnp.maximum((y - m) * scale + beta_col, 0.0)


def _hive_fused_kernel(x_ref, t1_ref, w1_ref, t2_ref, w2_ref,
                       bn_ref, l3_ref, b_ref, o_ref):
    """Fused HiveNetVision forward.

    x_ref : (F, H*W)            input frames, channel-major
    t1_ref: (K*K, H*W, P1)      conv1 one-hot shift selections
    w1_ref: (K*K, C1, F)        conv1 weight taps  w1[co, c, kh, kw]
    t2_ref: (K*K, P1, P2)       conv2 one-hot shift selections
    w2_ref: (K*K, C2, C1)       conv2 weight taps
    bn_ref: (max(C1,C2), 4)     columns: gamma1, beta1, gamma2, beta2
    l3_ref: (outputs, C2, P2)   linear weight, torch-flatten order
    b_ref : (1, outputs)        linear bias
    o_ref : (1, outputs)
    """
    kk = t1_ref.shape[0]
    x = x_ref[...]                                               # (F, H*W)
    bn = bn_ref[...]                                             # (Cmax, 4)

    # ---- conv1 (channel-major): a1[c1, p] = sum_j w1[j] @ (x @ t1[j]) ----
    c1 = w1_ref.shape[1]
    a1 = jnp.zeros((c1, t1_ref.shape[2]), jnp.float32)           # (C1, P1)
    for j in range(kk):
        g = jnp.dot(x, t1_ref[j], preferred_element_type=jnp.float32)   # (F, P1)
        a1 = a1 + jnp.dot(w1_ref[j], g,
                          preferred_element_type=jnp.float32)           # (C1, P1)
    a1 = _bn_relu_channel_major(a1, bn[0:c1, 0:1], bn[0:c1, 1:2])

    # ---- conv2: a2[c2, p2] = sum_j w2[j] @ (a1 @ t2[j]) ----
    c2 = w2_ref.shape[1]
    a2 = jnp.zeros((c2, t2_ref.shape[2]), jnp.float32)           # (C2, P2)
    for j in range(kk):
        g = jnp.dot(a1, t2_ref[j], preferred_element_type=jnp.float32)  # (C1, P2)
        a2 = a2 + jnp.dot(w2_ref[j], g,
                          preferred_element_type=jnp.float32)           # (C2, P2)
    a2 = _bn_relu_channel_major(a2, bn[0:c2, 2:3], bn[0:c2, 3:4])

    # ---- linear on the flattened (channel-major == torch.flatten) map ----
    # out[o] = sum_{c2, p2} a2[c2, p2] * l3[o, c2, p2] + b[o]
    # VPU multiply + lane/sublane reduce; no M=1 MXU matmul, no flatten.
    n_out = o_ref.shape[1]
    lane = lax.broadcasted_iota(jnp.int32, (1, n_out), 1)
    out = jnp.zeros((1, n_out), jnp.float32)
    for o in range(n_out):
        prod = l3_ref[o] * a2                                    # (C2, P2)
        v = jnp.sum(jnp.sum(prod, axis=1, keepdims=True),
                    axis=0, keepdims=True)                       # (1, 1)
        out = out + jnp.where(lane == o, v, 0.0)
    o_ref[...] = out + b_ref[...]


def hive_net_vision_forward(params, x):
    """x: (1, F, H, W) float32 — stacked-frame image (PyTorch NCHW, N=1)."""
    x_fs = x.reshape(params.frames_per_input, -1)                # free reshape
    n_out = params.lin_b.shape[0]
    vmem = pl.BlockSpec(memory_space=pltpu.MemorySpace.VMEM)
    out = pl.pallas_call(
        _hive_fused_kernel,
        out_shape=jax.ShapeDtypeStruct((1, n_out), jnp.float32),
        in_specs=[vmem] * 8,
        out_specs=vmem,
        # No grid on purpose: whole network < 0.5 MiB, a single grid-less
        # invocation avoids per-step and cross-core overhead (v7x included).
    )(x_fs, params.t1, params.w1_stack, params.t2, params.w2_stack,
      params.bn_pack, params.l3, params.lin_b_row)
    return out[0]                                                # (outputs,)


# ------------------------------- parameters -------------------------------- #

class HiveNetVisionParams:
    """Deterministic parameter set mirroring the PyTorch module __init__,
    plus kernel-ready derived arrays (precomputed once, no per-call glue)."""

    def __init__(self, key, kernel_size, stride, outputs,
                 hidden_layer_dims=(16, 32), frames_per_input=3,
                 image_compressed_size=(16, 16)):
        h1, h2 = hidden_layer_dims
        k, s = kernel_size, stride
        self.kernel_size = k
        self.stride = s
        self.frames_per_input = frames_per_input
        self.image_compressed_size = image_compressed_size

        H, W = image_compressed_size
        h1o, w1o = conv2d_size(H, k, s), conv2d_size(W, k, s)
        h2o, w2o = conv2d_size(h1o, k, s), conv2d_size(w1o, k, s)
        linear_in = h2o * w2o * h2

        ks = jax.random.split(key, 6)
        sc = 0.1
        self.conv1_w = (sc * jax.random.normal(
            ks[0], (h1, frames_per_input, k, k))).astype(jnp.float32)
        self.conv1_b = (sc * jax.random.normal(ks[1], (h1,))).astype(jnp.float32)
        self.conv2_w = (sc * jax.random.normal(
            ks[2], (h2, h1, k, k))).astype(jnp.float32)
        self.conv2_b = (sc * jax.random.normal(ks[3], (h2,))).astype(jnp.float32)
        # BatchNorm2d default init: weight=1, bias=0 (training mode -> batch stats).
        self.bn1_gamma = jnp.ones((h1,), jnp.float32)
        self.bn1_beta = jnp.zeros((h1,), jnp.float32)
        self.bn2_gamma = jnp.ones((h2,), jnp.float32)
        self.bn2_beta = jnp.zeros((h2,), jnp.float32)
        self.lin_w = (sc * jax.random.normal(ks[4], (outputs, linear_in))
                      ).astype(jnp.float32)
        self.lin_b = (sc * jax.random.normal(ks[5], (outputs,))).astype(jnp.float32)

        # ---- derived, kernel-ready layouts (no per-call XLA work) ----
        kk = k * k
        # conv weight taps: [kh*K+kw, c_out, c_in] = w[c_out, c_in, kh, kw]
        self.w1_stack = jnp.transpose(self.conv1_w, (2, 3, 0, 1)).reshape(
            kk, h1, frames_per_input)
        self.w2_stack = jnp.transpose(self.conv2_w, (2, 3, 0, 1)).reshape(
            kk, h2, h1)
        # one-hot shift-selection matrices for in-kernel im2col
        self.t1, _ = _conv_selection(H, W, k, s)        # (kk, H*W,  P1)
        self.t2, _ = _conv_selection(h1o, w1o, k, s)    # (kk, P1,   P2)
        # packed BN params: columns [gamma1, beta1, gamma2, beta2]
        cmax = max(h1, h2)
        bnp = np.zeros((cmax, 4), np.float32)
        bnp[:h1, 0] = np.asarray(self.bn1_gamma)
        bnp[:h1, 1] = np.asarray(self.bn1_beta)
        bnp[:h2, 2] = np.asarray(self.bn2_gamma)
        bnp[:h2, 3] = np.asarray(self.bn2_beta)
        self.bn_pack = jnp.asarray(bnp)
        # linear weight in torch.flatten order: [o, c2, p2]
        self.l3 = self.lin_w.reshape(outputs, h2, h2o * w2o)
        self.lin_b_row = self.lin_b[None, :]
        # NOTE: conv1_b / conv2_b are intentionally NOT fed to the kernel:
        # BatchNorm's mean subtraction cancels a per-channel conv bias exactly.


# ----------------------- pure-JAX reference (validation) ------------------- #

def _im2col_ref(x_chw, kernel_size, stride):
    """Reference-only im2col: (C, H, W) -> (Ho*Wo, C*K*K), order (c, kh, kw)."""
    c, h, w = x_chw.shape
    h_out = conv2d_size(h, kernel_size, stride)
    w_out = conv2d_size(w, kernel_size, stride)
    cols = []
    for kh in range(kernel_size):
        for kw in range(kernel_size):
            cols.append(x_chw[:,
                              kh:kh + stride * h_out:stride,
                              kw:kw + stride * w_out:stride])
    patches = jnp.stack(cols, axis=1)                  # (C, K*K, Ho, Wo)
    patches = patches.reshape(c * kernel_size * kernel_size, h_out * w_out)
    return patches.T, (h_out, w_out)


def hive_net_vision_reference(params, x):
    """High-precision pure-JAX reference matching the PyTorch forward."""
    k, s = params.kernel_size, params.stride
    eps = 1e-5
    hp = lax.Precision.HIGHEST

    def block(p, w, b, g, beta):
        y = jnp.dot(p, w, precision=hp) + b[None, :]
        mean = jnp.mean(y, axis=0, keepdims=True)
        var = jnp.mean((y - mean) ** 2, axis=0, keepdims=True)
        return jnp.maximum((y - mean) / jnp.sqrt(var + eps) * g[None, :]
                           + beta[None, :], 0.0)

    x_chw = x[0]
    p1, (h1o, w1o) = _im2col_ref(x_chw, k, s)
    a1 = block(p1, params.conv1_w.reshape(params.conv1_w.shape[0], -1).T,
               params.conv1_b, params.bn1_gamma, params.bn1_beta)
    p2, _ = _im2col_ref(a1.T.reshape(-1, h1o, w1o), k, s)
    a2 = block(p2, params.conv2_w.reshape(params.conv2_w.shape[0], -1).T,
               params.conv2_b, params.bn2_gamma, params.bn2_beta)
    flat = a2.T.reshape(1, -1)                         # torch.flatten order
    return (jnp.dot(flat, params.lin_w.T, precision=hp)
            + params.lin_b[None, :])[0]


# ----------------------------------- main ----------------------------------- #

if __name__ == "__main__":
    key = jax.random.PRNGKey(0)
    k_param, k_x = jax.random.split(key)

    # Small shapes consistent with the module:
    #   frames_per_input=3, image_compressed_size=(16, 16),
    #   kernel_size=3, stride=2, hidden_layer_dims=(16, 32), outputs=8.
    params = HiveNetVisionParams(k_param, kernel_size=3, stride=2, outputs=8,
                                 hidden_layer_dims=(16, 32), frames_per_input=3,
                                 image_compressed_size=(16, 16))

    x = jax.random.uniform(k_x, (1, 3, 16, 16), dtype=jnp.float32)

    out = jax.block_until_ready(hive_net_vision_forward(params, x))
    ref = jax.block_until_ready(hive_net_vision_reference(params, x))

    assert out.shape == (8,), out.shape
    # Tolerance accommodates default (non-HIGHEST) MXU precision in the kernel
    # (f32 matmuls run as bf16 passes, per the performance review) versus the
    # HIGHEST-precision reference; real layout/math bugs would be O(1) off.
    assert jnp.allclose(out, ref, rtol=3e-2, atol=3e-2), (out, ref)
    print("KERNEL_OK")
</pallas_src>

<mosaic_0001>
module attributes {stable_mosaic.version = 11 : i64} {
  func.func @_hive_fused_kernel(%arg0: memref<3x256xf32, #tpu.memory_space<vmem>>, %arg1: memref<9x256x49xf32, #tpu.memory_space<vmem>>, %arg2: memref<9x16x3xf32, #tpu.memory_space<vmem>>, %arg3: memref<9x49x9xf32, #tpu.memory_space<vmem>>, %arg4: memref<9x32x16xf32, #tpu.memory_space<vmem>>, %arg5: memref<32x4xf32, #tpu.memory_space<vmem>>, %arg6: memref<8x32x9xf32, #tpu.memory_space<vmem>>, %arg7: memref<1x8xf32, #tpu.memory_space<vmem>>, %arg8: memref<1x8xf32, #tpu.memory_space<vmem>>) attributes {dimension_semantics = [], scalar_prefetch = 0 : i64, scratch_operands = 0 : i64, tpu.core_type = #tpu.core_type<tc>} {
    %c0 = arith.constant 0 : index
    %c0_0 = arith.constant 0 : index
    %0 = vector.load %arg0[%c0, %c0_0] : memref<3x256xf32, #tpu.memory_space<vmem>>, vector<3x256xf32>
    %c0_1 = arith.constant 0 : index
    %c0_2 = arith.constant 0 : index
    %1 = vector.load %arg5[%c0_1, %c0_2] : memref<32x4xf32, #tpu.memory_space<vmem>>, vector<32x4xf32>
    %cst = arith.constant 0.000000e+00 : f32
    %2 = vector.broadcast %cst : f32 to vector<16x49xf32>
    %c0_3 = arith.constant 0 : index
    %c0_4 = arith.constant 0 : index
    %c0_5 = arith.constant 0 : index
    %3 = vector.load %arg1[%c0_3, %c0_4, %c0_5] : memref<9x256x49xf32, #tpu.memory_space<vmem>>, vector<1x256x49xf32>
    %4 = vector.shape_cast %3 : vector<1x256x49xf32> to vector<256x49xf32>
    %cst_6 = arith.constant dense<0.000000e+00> : vector<3x49xf32>
    %5 = tpu.matmul %0, %4, %cst_6 {dimension_numbers = #tpu.dot_dimension_numbers<[1], [0], [0], [1], [0, 0, 1, 1], [], []>} : vector<3x256xf32>, vector<256x49xf32>, vector<3x49xf32> -> vector<3x49xf32>
    %c0_7 = arith.constant 0 : index
    %c0_8 = arith.constant 0 : index
    %c0_9 = arith.constant 0 : index
    %6 = vector.load %arg2[%c0_7, %c0_8, %c0_9] : memref<9x16x3xf32, #tpu.memory_space<vmem>>, vector<1x16x3xf32>
    %7 = vector.shape_cast %6 : vector<1x16x3xf32> to vector<16x3xf32>
    %cst_10 = arith.constant dense<0.000000e+00> : vector<16x49xf32>
    %8 = tpu.matmul %7, %5, %cst_10 {dimension_numbers = #tpu.dot_dimension_numbers<[1], [0], [0], [1], [0, 0, 1, 1], [], []>} : vector<16x3xf32>, vector<3x49xf32>, vector<16x49xf32> -> vector<16x49xf32>
    %9 = arith.addf %2, %8 : vector<16x49xf32>
    %c1 = arith.constant 1 : index
    %c0_11 = arith.constant 0 : index
    %c0_12 = arith.constant 0 : index
    %10 = vector.load %arg1[%c1, %c0_11, %c0_12] : memref<9x256x49xf32, #tpu.memory_space<vmem>>, vector<1x256x49xf32>
    %11 = vector.shape_cast %10 : vector<1x256x49xf32> to vector<256x49xf32>
    %cst_13 = arith.constant dense<0.000000e+00> : vector<3x49xf32>
    %12 = tpu.matmul %0, %11, %cst_13 {dimension_numbers = #tpu.dot_dimension_numbers<[1], [0], [0], [1], [0, 0, 1, 1], [], []>} : vector<3x256xf32>, vector<256x49xf32>, vector<3x49xf32> -> vector<3x49xf32>
    %c1_14 = arith.constant 1 : index
    %c0_15 = arith.constant 0 : index
    %c0_16 = arith.constant 0 : index
    %13 = vector.load %arg2[%c1_14, %c0_15, %c0_16] : memref<9x16x3xf32, #tpu.memory_space<vmem>>, vector<1x16x3xf32>
    %14 = vector.shape_cast %13 : vector<1x16x3xf32> to vector<16x3xf32>
    %cst_17 = arith.constant dense<0.000000e+00> : vector<16x49xf32>
    %15 = tpu.matmul %14, %12, %cst_17 {dimension_numbers = #tpu.dot_dimension_numbers<[1], [0], [0], [1], [0, 0, 1, 1], [], []>} : vector<16x3xf32>, vector<3x49xf32>, vector<16x49xf32> -> vector<16x49xf32>
    %16 = arith.addf %9, %15 : vector<16x49xf32>
    %c2 = arith.constant 2 : index
    %c0_18 = arith.constant 0 : index
    %c0_19 = arith.constant 0 : index
    %17 = vector.load %arg1[%c2, %c0_18, %c0_19] : memref<9x256x49xf32, #tpu.memory_space<vmem>>, vector<1x256x49xf32>
    %18 = vector.shape_cast %17 : vector<1x256x49xf32> to vector<256x49xf32>
    %cst_20 = arith.constant dense<0.000000e+00> : vector<3x49xf32>
    %19 = tpu.matmul %0, %18, %cst_20 {dimension_numbers = #tpu.dot_dimension_numbers<[1], [0], [0], [1], [0, 0, 1, 1], [], []>} : vector<3x256xf32>, vector<256x49xf32>, vector<3x49xf32> -> vector<3x49xf32>
    %c2_21 = arith.constant 2 : index
    %c0_22 = arith.constant 0 : index
    %c0_23 = arith.constant 0 : index
    %20 = vector.load %arg2[%c2_21, %c0_22, %c0_23] : memref<9x16x3xf32, #tpu.memory_space<vmem>>, vector<1x16x3xf32>
    %21 = vector.shape_cast %20 : vector<1x16x3xf32> to vector<16x3xf32>
    %cst_24 = arith.constant dense<0.000000e+00> : vector<16x49xf32>
    %22 = tpu.matmul %21, %19, %cst_24 {dimension_numbers = #tpu.dot_dimension_numbers<[1], [0], [0], [1], [0, 0, 1, 1], [], []>} : vector<16x3xf32>, vector<3x49xf32>, vector<16x49xf32> -> vector<16x49xf32>
    %23 = arith.addf %16, %22 : vector<16x49xf32>
    %c3 = arith.constant 3 : index
    %c0_25 = arith.constant 0 : index
    %c0_26 = arith.constant 0 : index
    %24 = vector.load %arg1[%c3, %c0_25, %c0_26] : memref<9x256x49xf32, #tpu.memory_space<vmem>>, vector<1x256x49xf32>
    %25 = vector.shape_cast %24 : vector<1x256x49xf32> to vector<256x49xf32>
    %cst_27 = arith.constant dense<0.000000e+00> : vector<3x49xf32>
    %26 = tpu.matmul %0, %25, %cst_27 {dimension_numbers = #tpu.dot_dimension_numbers<[1], [0], [0], [1], [0, 0, 1, 1], [], []>} : vector<3x256xf32>, vector<256x49xf32>, vector<3x49xf32> -> vector<3x49xf32>
    %c3_28 = arith.constant 3 : index
    %c0_29 = arith.constant 0 : index
    %c0_30 = arith.constant 0 : index
    %27 = vector.load %arg2[%c3_28, %c0_29, %c0_30] : memref<9x16x3xf32, #tpu.memory_space<vmem>>, vector<1x16x3xf32>
    %28 = vector.shape_cast %27 : vector<1x16x3xf32> to vector<16x3xf32>
    %cst_31 = arith.constant dense<0.000000e+00> : vector<16x49xf32>
    %29 = tpu.matmul %28, %26, %cst_31 {dimension_numbers = #tpu.dot_dimension_numbers<[1], [0], [0], [1], [0, 0, 1, 1], [], []>} : vector<16x3xf32>, vector<3x49xf32>, vector<16x49xf32> -> vector<16x49xf32>
    %30 = arith.addf %23, %29 : vector<16x49xf32>
    %c4 = arith.constant 4 : index
    %c0_32 = arith.constant 0 : index
    %c0_33 = arith.constant 0 : index
    %31 = vector.load %arg1[%c4, %c0_32, %c0_33] : memref<9x256x49xf32, #tpu.memory_space<vmem>>, vector<1x256x49xf32>
    %32 = vector.shape_cast %31 : vector<1x256x49xf32> to vector<256x49xf32>
    %cst_34 = arith.constant dense<0.000000e+00> : vector<3x49xf32>
    %33 = tpu.matmul %0, %32, %cst_34 {dimension_numbers = #tpu.dot_dimension_numbers<[1], [0], [0], [1], [0, 0, 1, 1], [], []>} : vector<3x256xf32>, vector<256x49xf32>, vector<3x49xf32> -> vector<3x49xf32>
    %c4_35 = arith.constant 4 : index
    %c0_36 = arith.constant 0 : index
    %c0_37 = arith.constant 0 : index
    %34 = vector.load %arg2[%c4_35, %c0_36, %c0_37] : memref<9x16x3xf32, #tpu.memory_space<vmem>>, vector<1x16x3xf32>
    %35 = vector.shape_cast %34 : vector<1x16x3xf32> to vector<16x3xf32>
    %cst_38 = arith.constant dense<0.000000e+00> : vector<16x49xf32>
    %36 = tpu.matmul %35, %33, %cst_38 {dimension_numbers = #tpu.dot_dimension_numbers<[1], [0], [0], [1], [0, 0, 1, 1], [], []>} : vector<16x3xf32>, vector<3x49xf32>, vector<16x49xf32> -> vector<16x49xf32>
    %37 = arith.addf %30, %36 : vector<16x49xf32>
    %c5 = arith.constant 5 : index
    %c0_39 = arith.constant 0 : index
    %c0_40 = arith.constant 0 : index
    %38 = vector.load %arg1[%c5, %c0_39, %c0_40] : memref<9x256x49xf32, #tpu.memory_space<vmem>>, vector<1x256x49xf32>
    %39 = vector.shape_cast %38 : vector<1x256x49xf32> to vector<256x49xf32>
    %cst_41 = arith.constant dense<0.000000e+00> : vector<3x49xf32>
    %40 = tpu.matmul %0, %39, %cst_41 {dimension_numbers = #tpu.dot_dimension_numbers<[1], [0], [0], [1], [0, 0, 1, 1], [], []>} : vector<3x256xf32>, vector<256x49xf32>, vector<3x49xf32> -> vector<3x49xf32>
    %c5_42 = arith.constant 5 : index
    %c0_43 = arith.constant 0 : index
    %c0_44 = arith.constant 0 : index
    %41 = vector.load %arg2[%c5_42, %c0_43, %c0_44] : memref<9x16x3xf32, #tpu.memory_space<vmem>>, vector<1x16x3xf32>
    %42 = vector.shape_cast %41 : vector<1x16x3xf32> to vector<16x3xf32>
    %cst_45 = arith.constant dense<0.000000e+00> : vector<16x49xf32>
    %43 = tpu.matmul %42, %40, %cst_45 {dimension_numbers = #tpu.dot_dimension_numbers<[1], [0], [0], [1], [0, 0, 1, 1], [], []>} : vector<16x3xf32>, vector<3x49xf32>, vector<16x49xf32> -> vector<16x49xf32>
    %44 = arith.addf %37, %43 : vector<16x49xf32>
    %c6 = arith.constant 6 : index
    %c0_46 = arith.constant 0 : index
    %c0_47 = arith.constant 0 : index
    %45 = vector.load %arg1[%c6, %c0_46, %c0_47] : memref<9x256x49xf32, #tpu.memory_space<vmem>>, vector<1x256x49xf32>
    %46 = vector.shape_cast %45 : vector<1x256x49xf32> to vector<256x49xf32>
    %cst_48 = arith.constant dense<0.000000e+00> : vector<3x49xf32>
    %47 = tpu.matmul %0, %46, %cst_48 {dimension_numbers = #tpu.dot_dimension_numbers<[1], [0], [0], [1], [0, 0, 1, 1], [], []>} : vector<3x256xf32>, vector<256x49xf32>, vector<3x49xf32> -> vector<3x49xf32>
    %c6_49 = arith.constant 6 : index
    %c0_50 = arith.constant 0 : index
    %c0_51 = arith.constant 0 : index
    %48 = vector.load %arg2[%c6_49, %c0_50, %c0_51] : memref<9x16x3xf32, #tpu.memory_space<vmem>>, vector<1x16x3xf32>
    %49 = vector.shape_cast %48 : vector<1x16x3xf32> to vector<16x3xf32>
    %cst_52 = arith.constant dense<0.000000e+00> : vector<16x49xf32>
    %50 = tpu.matmul %49, %47, %cst_52 {dimension_numbers = #tpu.dot_dimension_numbers<[1], [0], [0], [1], [0, 0, 1, 1], [], []>} : vector<16x3xf32>, vector<3x49xf32>, vector<16x49xf32> -> vector<16x49xf32>
    %51 = arith.addf %44, %50 : vector<16x49xf32>
    %c7 = arith.constant 7 : index
    %c0_53 = arith.constant 0 : index
    %c0_54 = arith.constant 0 : index
    %52 = vector.load %arg1[%c7, %c0_53, %c0_54] : memref<9x256x49xf32, #tpu.memory_space<vmem>>, vector<1x256x49xf32>
    %53 = vector.shape_cast %52 : vector<1x256x49xf32> to vector<256x49xf32>
    %cst_55 = arith.constant dense<0.000000e+00> : vector<3x49xf32>
    %54 = tpu.matmul %0, %53, %cst_55 {dimension_numbers = #tpu.dot_dimension_numbers<[1], [0], [0], [1], [0, 0, 1, 1], [], []>} : vector<3x256xf32>, vector<256x49xf32>, vector<3x49xf32> -> vector<3x49xf32>
    %c7_56 = arith.constant 7 : index
    %c0_57 = arith.constant 0 : index
    %c0_58 = arith.constant 0 : index
    %55 = vector.load %arg2[%c7_56, %c0_57, %c0_58] : memref<9x16x3xf32, #tpu.memory_space<vmem>>, vector<1x16x3xf32>
    %56 = vector.shape_cast %55 : vector<1x16x3xf32> to vector<16x3xf32>
    %cst_59 = arith.constant dense<0.000000e+00> : vector<16x49xf32>
    %57 = tpu.matmul %56, %54, %cst_59 {dimension_numbers = #tpu.dot_dimension_numbers<[1], [0], [0], [1], [0, 0, 1, 1], [], []>} : vector<16x3xf32>, vector<3x49xf32>, vector<16x49xf32> -> vector<16x49xf32>
    %58 = arith.addf %51, %57 : vector<16x49xf32>
    %c8 = arith.constant 8 : index
    %c0_60 = arith.constant 0 : index
    %c0_61 = arith.constant 0 : index
    %59 = vector.load %arg1[%c8, %c0_60, %c0_61] : memref<9x256x49xf32, #tpu.memory_space<vmem>>, vector<1x256x49xf32>
    %60 = vector.shape_cast %59 : vector<1x256x49xf32> to vector<256x49xf32>
    %cst_62 = arith.constant dense<0.000000e+00> : vector<3x49xf32>
    %61 = tpu.matmul %0, %60, %cst_62 {dimension_numbers = #tpu.dot_dimension_numbers<[1], [0], [0], [1], [0, 0, 1, 1], [], []>} : vector<3x256xf32>, vector<256x49xf32>, vector<3x49xf32> -> vector<3x49xf32>
    %c8_63 = arith.constant 8 : index
    %c0_64 = arith.constant 0 : index
    %c0_65 = arith.constant 0 : index
    %62 = vector.load %arg2[%c8_63, %c0_64, %c0_65] : memref<9x16x3xf32, #tpu.memory_space<vmem>>, vector<1x16x3xf32>
    %63 = vector.shape_cast %62 : vector<1x16x3xf32> to vector<16x3xf32>
    %cst_66 = arith.constant dense<0.000000e+00> : vector<16x49xf32>
    %64 = tpu.matmul %63, %61, %cst_66 {dimension_numbers = #tpu.dot_dimension_numbers<[1], [0], [0], [1], [0, 0, 1, 1], [], []>} : vector<16x3xf32>, vector<3x49xf32>, vector<16x49xf32> -> vector<16x49xf32>
    %65 = arith.addf %58, %64 : vector<16x49xf32>
    %66 = vector.extract_strided_slice %1 {offsets = [0, 0], sizes = [16, 1], strides = [1, 1]} : vector<32x4xf32> to vector<16x1xf32>
    %67 = vector.extract_strided_slice %1 {offsets = [0, 1], sizes = [16, 1], strides = [1, 1]} : vector<32x4xf32> to vector<16x1xf32>
    %cst_67 = arith.constant dense<0.000000e+00> : vector<16xf32>
    %68 = vector.multi_reduction <add>, %65, %cst_67 [1] : vector<16x49xf32> to vector<16xf32>
    %69 = vector.shape_cast %68 : vector<16xf32> to vector<16x1xf32>
    %cst_68 = arith.constant 4.900000e+01 : f32
    %70 = vector.broadcast %cst_68 : f32 to vector<16x1xf32>
    %71 = arith.divf %69, %70 : vector<16x1xf32>
    %72 = arith.mulf %65, %65 : vector<16x49xf32>
    %cst_69 = arith.constant dense<0.000000e+00> : vector<16xf32>
    %73 = vector.multi_reduction <add>, %72, %cst_69 [1] : vector<16x49xf32> to vector<16xf32>
    %74 = vector.shape_cast %73 : vector<16xf32> to vector<16x1xf32>
    %cst_70 = arith.constant 4.900000e+01 : f32
    %75 = vector.broadcast %cst_70 : f32 to vector<16x1xf32>
    %76 = arith.divf %74, %75 : vector<16x1xf32>
    %77 = arith.mulf %71, %71 : vector<16x1xf32>
    %78 = arith.subf %76, %77 : vector<16x1xf32>
    %cst_71 = arith.constant 0.000000e+00 : f32
    %79 = vector.broadcast %cst_71 : f32 to vector<16x1xf32>
    %80 = arith.maximumf %78, %79 : vector<16x1xf32>
    %cst_72 = arith.constant 9.99999974E-6 : f32
    %81 = vector.broadcast %cst_72 : f32 to vector<16x1xf32>
    %82 = arith.addf %80, %81 : vector<16x1xf32>
    %83 = math.rsqrt %82 : vector<16x1xf32>
    %84 = arith.mulf %66, %83 : vector<16x1xf32>
    %85 = vector.broadcast %71 : vector<16x1xf32> to vector<16x49xf32>
    %86 = arith.subf %65, %85 : vector<16x49xf32>
    %87 = vector.broadcast %84 : vector<16x1xf32> to vector<16x49xf32>
    %88 = arith.mulf %86, %87 : vector<16x49xf32>
    %89 = vector.broadcast %67 : vector<16x1xf32> to vector<16x49xf32>
    %90 = arith.addf %88, %89 : vector<16x49xf32>
    %cst_73 = arith.constant 0.000000e+00 : f32
    %91 = vector.broadcast %cst_73 : f32 to vector<16x49xf32>
    %92 = arith.maximumf %90, %91 : vector<16x49xf32>
    %cst_74 = arith.constant 0.000000e+00 : f32
    %93 = vector.broadcast %cst_74 : f32 to vector<32x9xf32>
    %c0_75 = arith.constant 0 : index
    %c0_76 = arith.constant 0 : index
    %c0_77 = arith.constant 0 : index
    %94 = vector.load %arg3[%c0_75, %c0_76, %c0_77] : memref<9x49x9xf32, #tpu.memory_space<vmem>>, vector<1x49x9xf32>
    %95 = vector.shape_cast %94 : vector<1x49x9xf32> to vector<49x9xf32>
    %cst_78 = arith.constant dense<0.000000e+00> : vector<16x9xf32>
    %96 = tpu.matmul %92, %95, %cst_78 {dimension_numbers = #tpu.dot_dimension_numbers<[1], [0], [0], [1], [0, 0, 1, 1], [], []>} : vector<16x49xf32>, vector<49x9xf32>, vector<16x9xf32> -> vector<16x9xf32>
    %c0_79 = arith.constant 0 : index
    %c0_80 = arith.constant 0 : index
    %c0_81 = arith.constant 0 : index
    %97 = vector.load %arg4[%c0_79, %c0_80, %c0_81] : memref<9x32x16xf32, #tpu.memory_space<vmem>>, vector<1x32x16xf32>
    %98 = vector.shape_cast %97 : vector<1x32x16xf32> to vector<32x16xf32>
    %cst_82 = arith.constant dense<0.000000e+00> : vector<32x9xf32>
    %99 = tpu.matmul %98, %96, %cst_82 {dimension_numbers = #tpu.dot_dimension_numbers<[1], [0], [0], [1], [0, 0, 1, 1], [], []>} : vector<32x16xf32>, vector<16x9xf32>, vector<32x9xf32> -> vector<32x9xf32>
    %100 = arith.addf %93, %99 : vector<32x9xf32>
    %c1_83 = arith.constant 1 : index
    %c0_84 = arith.constant 0 : index
    %c0_85 = arith.constant 0 : index
    %101 = vector.load %arg3[%c1_83, %c0_84, %c0_85] : memref<9x49x9xf32, #tpu.memory_space<vmem>>, vector<1x49x9xf32>
    %102 = vector.shape_cast %101 : vector<1x49x9xf32> to vector<49x9xf32>
    %cst_86 = arith.constant dense<0.000000e+00> : vector<16x9xf32>
    %103 = tpu.matmul %92, %102, %cst_86 {dimension_numbers = #tpu.dot_dimension_numbers<[1], [0], [0], [1], [0, 0, 1, 1], [], []>} : vector<16x49xf32>, vector<49x9xf32>, vector<16x9xf32> -> vector<16x9xf32>
    %c1_87 = arith.constant 1 : index
    %c0_88 = arith.constant 0 : index
    %c0_89 = arith.constant 0 : index
    %104 = vector.load %arg4[%c1_87, %c0_88, %c0_89] : memref<9x32x16xf32, #tpu.memory_space<vmem>>, vector<1x32x16xf32>
    %105 = vector.shape_cast %104 : vector<1x32x16xf32> to vector<32x16xf32>
    %cst_90 = arith.constant dense<0.000000e+00> : vector<32x9xf32>
    %106 = tpu.matmul %105, %103, %cst_90 {dimension_numbers = #tpu.dot_dimension_numbers<[1], [0], [0], [1], [0, 0, 1, 1], [], []>} : vector<32x16xf32>, vector<16x9xf32>, vector<32x9xf32> -> vector<32x9xf32>
    %107 = arith.addf %100, %106 : vector<32x9xf32>
    %c2_91 = arith.constant 2 : index
    %c0_92 = arith.constant 0 : index
    %c0_93 = arith.constant 0 : index
    %108 = vector.load %arg3[%c2_91, %c0_92, %c0_93] : memref<9x49x9xf32, #tpu.memory_space<vmem>>, vector<1x49x9xf32>
    %109 = vector.shape_cast %108 : vector<1x49x9xf32> to vector<49x9xf32>
    %cst_94 = arith.constant dense<0.000000e+00> : vector<16x9xf32>
    %110 = tpu.matmul %92, %109, %cst_94 {dimension_numbers = #tpu.dot_dimension_numbers<[1], [0], [0], [1], [0, 0, 1, 1], [], []>} : vector<16x49xf32>, vector<49x9xf32>, vector<16x9xf32> -> vector<16x9xf32>
    %c2_95 = arith.constant 2 : index
    %c0_96 = arith.constant 0 : index
    %c0_97 = arith.constant 0 : index
    %111 = vector.load %arg4[%c2_95, %c0_96, %c0_97] : memref<9x32x16xf32, #tpu.memory_space<vmem>>, vector<1x32x16xf32>
    %112 = vector.shape_cast %111 : vector<1x32x16xf32> to vector<32x16xf32>
    %cst_98 = arith.constant dense<0.000000e+00> : vector<32x9xf32>
    %113 = tpu.matmul %112, %110, %cst_98 {dimension_numbers = #tpu.dot_dimension_numbers<[1], [0], [0], [1], [0, 0, 1, 1], [], []>} : vector<32x16xf32>, vector<16x9xf32>, vector<32x9xf32> -> vector<32x9xf32>
    %114 = arith.addf %107, %113 : vector<32x9xf32>
    %c3_99 = arith.constant 3 : index
    %c0_100 = arith.constant 0 : index
    %c0_101 = arith.constant 0 : index
    %115 = vector.load %arg3[%c3_99, %c0_100, %c0_101] : memref<9x49x9xf32, #tpu.memory_space<vmem>>, vector<1x49x9xf32>
    %116 = vector.shape_cast %115 : vector<1x49x9xf32> to vector<49x9xf32>
    %cst_102 = arith.constant dense<0.000000e+00> : vector<16x9xf32>
    %117 = tpu.matmul %92, %116, %cst_102 {dimension_numbers = #tpu.dot_dimension_numbers<[1], [0], [0], [1], [0, 0, 1, 1], [], []>} : vector<16x49xf32>, vector<49x9xf32>, vector<16x9xf32> -> vector<16x9xf32>
    %c3_103 = arith.constant 3 : index
    %c0_104 = arith.constant 0 : index
    %c0_105 = arith.constant 0 : index
    %118 = vector.load %arg4[%c3_103, %c0_104, %c0_105] : memref<9x32x16xf32, #tpu.memory_space<vmem>>, vector<1x32x16xf32>
    %119 = vector.shape_cast %118 : vector<1x32x16xf32> to vector<32x16xf32>
    %cst_106 = arith.constant dense<0.000000e+00> : vector<32x9xf32>
    %120 = tpu.matmul %119, %117, %cst_106 {dimension_numbers = #tpu.dot_dimension_numbers<[1], [0], [0], [1], [0, 0, 1, 1], [], []>} : vector<32x16xf32>, vector<16x9xf32>, vector<32x9xf32> -> vector<32x9xf32>
    %121 = arith.addf %114, %120 : vector<32x9xf32>
    %c4_107 = arith.constant 4 : index
    %c0_108 = arith.constant 0 : index
    %c0_109 = arith.constant 0 : index
    %122 = vector.load %arg3[%c4_107, %c0_108, %c0_109] : memref<9x49x9xf32, #tpu.memory_space<vmem>>, vector<1x49x9xf32>
    %123 = vector.shape_cast %122 : vector<1x49x9xf32> to vector<49x9xf32>
    %cst_110 = arith.constant dense<0.000000e+00> : vector<16x9xf32>
    %124 = tpu.matmul %92, %123, %cst_110 {dimension_numbers = #tpu.dot_dimension_numbers<[1], [0], [0], [1], [0, 0, 1, 1], [], []>} : vector<16x49xf32>, vector<49x9xf32>, vector<16x9xf32> -> vector<16x9xf32>
    %c4_111 = arith.constant 4 : index
    %c0_112 = arith.constant 0 : index
    %c0_113 = arith.constant 0 : index
    %125 = vector.load %arg4[%c4_111, %c0_112, %c0_113] : memref<9x32x16xf32, #tpu.memory_space<vmem>>, vector<1x32x16xf32>
    %126 = vector.shape_cast %125 : vector<1x32x16xf32> to vector<32x16xf32>
    %cst_114 = arith.constant dense<0.000000e+00> : vector<32x9xf32>
    %127 = tpu.matmul %126, %124, %cst_114 {dimension_numbers = #tpu.dot_dimension_numbers<[1], [0], [0], [1], [0, 0, 1, 1], [], []>} : vector<32x16xf32>, vector<16x9xf32>, vector<32x9xf32> -> vector<32x9xf32>
    %128 = arith.addf %121, %127 : vector<32x9xf32>
    %c5_115 = arith.constant 5 : index
    %c0_116 = arith.constant 0 : index
    %c0_117 = arith.constant 0 : index
    %129 = vector.load %arg3[%c5_115, %c0_116, %c0_117] : memref<9x49x9xf32, #tpu.memory_space<vmem>>, vector<1x49x9xf32>
    %130 = vector.shape_cast %129 : vector<1x49x9xf32> to vector<49x9xf32>
    %cst_118 = arith.constant dense<0.000000e+00> : vector<16x9xf32>
    %131 = tpu.matmul %92, %130, %cst_118 {dimension_numbers = #tpu.dot_dimension_numbers<[1], [0], [0], [1], [0, 0, 1, 1], [], []>} : vector<16x49xf32>, vector<49x9xf32>, vector<16x9xf32> -> vector<16x9xf32>
    %c5_119 = arith.constant 5 : index
    %c0_120 = arith.constant 0 : index
    %c0_121 = arith.constant 0 : index
    %132 = vector.load %arg4[%c5_119, %c0_120, %c0_121] : memref<9x32x16xf32, #tpu.memory_space<vmem>>, vector<1x32x16xf32>
    %133 = vector.shape_cast %132 : vector<1x32x16xf32> to vector<32x16xf32>
    %cst_122 = arith.constant dense<0.000000e+00> : vector<32x9xf32>
    %134 = tpu.matmul %133, %131, %cst_122 {dimension_numbers = #tpu.dot_dimension_numbers<[1], [0], [0], [1], [0, 0, 1, 1], [], []>} : vector<32x16xf32>, vector<16x9xf32>, vector<32x9xf32> -> vector<32x9xf32>
    %135 = arith.addf %128, %134 : vector<32x9xf32>
    %c6_123 = arith.constant 6 : index
    %c0_124 = arith.constant 0 : index
    %c0_125 = arith.constant 0 : index
    %136 = vector.load %arg3[%c6_123, %c0_124, %c0_125] : memref<9x49x9xf32, #tpu.memory_space<vmem>>, vector<1x49x9xf32>
    %137 = vector.shape_cast %136 : vector<1x49x9xf32> to vector<49x9xf32>
    %cst_126 = arith.constant dense<0.000000e+00> : vector<16x9xf32>
    %138 = tpu.matmul %92, %137, %cst_126 {dimension_numbers = #tpu.dot_dimension_numbers<[1], [0], [0], [1], [0, 0, 1, 1], [], []>} : vector<16x49xf32>, vector<49x9xf32>, vector<16x9xf32> -> vector<16x9xf32>
    %c6_127 = arith.constant 6 : index
    %c0_128 = arith.constant 0 : index
    %c0_129 = arith.constant 0 : index
    %139 = vector.load %arg4[%c6_127, %c0_128, %c0_129] : memref<9x32x16xf32, #tpu.memory_space<vmem>>, vector<1x32x16xf32>
    %140 = vector.shape_cast %139 : vector<1x32x16xf32> to vector<32x16xf32>
    %cst_130 = arith.constant dense<0.000000e+00> : vector<32x9xf32>
    %141 = tpu.matmul %140, %138, %cst_130 {dimension_numbers = #tpu.dot_dimension_numbers<[1], [0], [0], [1], [0, 0, 1, 1], [], []>} : vector<32x16xf32>, vector<16x9xf32>, vector<32x9xf32> -> vector<32x9xf32>
    %142 = arith.addf %135, %141 : vector<32x9xf32>
    %c7_131 = arith.constant 7 : index
    %c0_132 = arith.constant 0 : index
    %c0_133 = arith.constant 0 : index
    %143 = vector.load %arg3[%c7_131, %c0_132, %c0_133] : memref<9x49x9xf32, #tpu.memory_space<vmem>>, vector<1x49x9xf32>
    %144 = vector.shape_cast %143 : vector<1x49x9xf32> to vector<49x9xf32>
    %cst_134 = arith.constant dense<0.000000e+00> : vector<16x9xf32>
    %145 = tpu.matmul %92, %144, %cst_134 {dimension_numbers = #tpu.dot_dimension_numbers<[1], [0], [0], [1], [0, 0, 1, 1], [], []>} : vector<16x49xf32>, vector<49x9xf32>, vector<16x9xf32> -> vector<16x9xf32>
    %c7_135 = arith.constant 7 : index
    %c0_136 = arith.constant 0 : index
    %c0_137 = arith.constant 0 : index
    %146 = vector.load %arg4[%c7_135, %c0_136, %c0_137] : memref<9x32x16xf32, #tpu.memory_space<vmem>>, vector<1x32x16xf32>
    %147 = vector.shape_cast %146 : vector<1x32x16xf32> to vector<32x16xf32>
    %cst_138 = arith.constant dense<0.000000e+00> : vector<32x9xf32>
    %148 = tpu.matmul %147, %145, %cst_138 {dimension_numbers = #tpu.dot_dimension_numbers<[1], [0], [0], [1], [0, 0, 1, 1], [], []>} : vector<32x16xf32>, vector<16x9xf32>, vector<32x9xf32> -> vector<32x9xf32>
    %149 = arith.addf %142, %148 : vector<32x9xf32>
    %c8_139 = arith.constant 8 : index
    %c0_140 = arith.constant 0 : index
    %c0_141 = arith.constant 0 : index
    %150 = vector.load %arg3[%c8_139, %c0_140, %c0_141] : memref<9x49x9xf32, #tpu.memory_space<vmem>>, vector<1x49x9xf32>
    %151 = vector.shape_cast %150 : vector<1x49x9xf32> to vector<49x9xf32>
    %cst_142 = arith.constant dense<0.000000e+00> : vector<16x9xf32>
    %152 = tpu.matmul %92, %151, %cst_142 {dimension_numbers = #tpu.dot_dimension_numbers<[1], [0], [0], [1], [0, 0, 1, 1], [], []>} : vector<16x49xf32>, vector<49x9xf32>, vector<16x9xf32> -> vector<16x9xf32>
    %c8_143 = arith.constant 8 : index
    %c0_144 = arith.constant 0 : index
    %c0_145 = arith.constant 0 : index
    %153 = vector.load %arg4[%c8_143, %c0_144, %c0_145] : memref<9x32x16xf32, #tpu.memory_space<vmem>>, vector<1x32x16xf32>
    %154 = vector.shape_cast %153 : vector<1x32x16xf32> to vector<32x16xf32>
    %cst_146 = arith.constant dense<0.000000e+00> : vector<32x9xf32>
    %155 = tpu.matmul %154, %152, %cst_146 {dimension_numbers = #tpu.dot_dimension_numbers<[1], [0], [0], [1], [0, 0, 1, 1], [], []>} : vector<32x16xf32>, vector<16x9xf32>, vector<32x9xf32> -> vector<32x9xf32>
    %156 = arith.addf %149, %155 : vector<32x9xf32>
    %157 = vector.extract_strided_slice %1 {offsets = [0, 2], sizes = [32, 1], strides = [1, 1]} : vector<32x4xf32> to vector<32x1xf32>
    %158 = vector.extract_strided_slice %1 {offsets = [0, 3], sizes = [32, 1], strides = [1, 1]} : vector<32x4xf32> to vector<32x1xf32>
    %cst_147 = arith.constant dense<0.000000e+00> : vector<32xf32>
    %159 = vector.multi_reduction <add>, %156, %cst_147 [1] : vector<32x9xf32> to vector<32xf32>
    %160 = vector.shape_cast %159 : vector<32xf32> to vector<32x1xf32>
    %cst_148 = arith.constant 9.000000e+00 : f32
    %161 = vector.broadcast %cst_148 : f32 to vector<32x1xf32>
    %162 = arith.divf %160, %161 : vector<32x1xf32>
    %163 = arith.mulf %156, %156 : vector<32x9xf32>
    %cst_149 = arith.constant dense<0.000000e+00> : vector<32xf32>
    %164 = vector.multi_reduction <add>, %163, %cst_149 [1] : vector<32x9xf32> to vector<32xf32>
    %165 = vector.shape_cast %164 : vector<32xf32> to vector<32x1xf32>
    %cst_150 = arith.constant 9.000000e+00 : f32
    %166 = vector.broadcast %cst_150 : f32 to vector<32x1xf32>
    %167 = arith.divf %165, %166 : vector<32x1xf32>
    %168 = arith.mulf %162, %162 : vector<32x1xf32>
    %169 = arith.subf %167, %168 : vector<32x1xf32>
    %cst_151 = arith.constant 0.000000e+00 : f32
    %170 = vector.broadcast %cst_151 : f32 to vector<32x1xf32>
    %171 = arith.maximumf %169, %170 : vector<32x1xf32>
    %cst_152 = arith.constant 9.99999974E-6 : f32
    %172 = vector.broadcast %cst_152 : f32 to vector<32x1xf32>
    %173 = arith.addf %171, %172 : vector<32x1xf32>
    %174 = math.rsqrt %173 : vector<32x1xf32>
    %175 = arith.mulf %157, %174 : vector<32x1xf32>
    %176 = vector.broadcast %162 : vector<32x1xf32> to vector<32x9xf32>
    %177 = arith.subf %156, %176 : vector<32x9xf32>
    %178 = vector.broadcast %175 : vector<32x1xf32> to vector<32x9xf32>
    %179 = arith.mulf %177, %178 : vector<32x9xf32>
    %180 = vector.broadcast %158 : vector<32x1xf32> to vector<32x9xf32>
    %181 = arith.addf %179, %180 : vector<32x9xf32>
    %cst_153 = arith.constant 0.000000e+00 : f32
    %182 = vector.broadcast %cst_153 : f32 to vector<32x9xf32>
    %183 = arith.maximumf %181, %182 : vector<32x9xf32>
    %184 = tpu.iota {dimensions = array<i32: 1>} : vector<1x8xi32>
    %cst_154 = arith.constant 0.000000e+00 : f32
    %185 = vector.broadcast %cst_154 : f32 to vector<1x8xf32>
    %c0_155 = arith.constant 0 : index
    %c0_156 = arith.constant 0 : index
    %c0_157 = arith.constant 0 : index
    %186 = vector.load %arg6[%c0_155, %c0_156, %c0_157] : memref<8x32x9xf32, #tpu.memory_space<vmem>>, vector<1x32x9xf32>
    %187 = vector.shape_cast %186 : vector<1x32x9xf32> to vector<32x9xf32>
    %188 = arith.mulf %187, %183 : vector<32x9xf32>
    %cst_158 = arith.constant dense<0.000000e+00> : vector<32xf32>
    %189 = vector.multi_reduction <add>, %188, %cst_158 [1] : vector<32x9xf32> to vector<32xf32>
    %190 = vector.shape_cast %189 : vector<32xf32> to vector<32x1xf32>
    %cst_159 = arith.constant dense<0.000000e+00> : vector<1xf32>
    %191 = vector.multi_reduction <add>, %190, %cst_159 [0] : vector<32x1xf32> to vector<1xf32>
    %192 = vector.shape_cast %191 : vector<1xf32> to vector<1x1xf32>
    %c0_i32 = arith.constant 0 : i32
    %193 = vector.broadcast %c0_i32 : i32 to vector<1x8xi32>
    %194 = arith.cmpi eq, %184, %193 : vector<1x8xi32>
    %cst_160 = arith.constant 0.000000e+00 : f32
    %195 = vector.shape_cast %192 : vector<1x1xf32> to vector<1x1xf32>
    %196 = vector.broadcast %195 : vector<1x1xf32> to vector<1x8xf32>
    %197 = vector.broadcast %cst_160 : f32 to vector<1x8xf32>
    %198 = arith.select %194, %196, %197 : vector<1x8xi1>, vector<1x8xf32>
    %199 = arith.addf %185, %198 : vector<1x8xf32>
    %c1_161 = arith.constant 1 : index
    %c0_162 = arith.constant 0 : index
    %c0_163 = arith.constant 0 : index
    %200 = vector.load %arg6[%c1_161, %c0_162, %c0_163] : memref<8x32x9xf32, #tpu.memory_space<vmem>>, vector<1x32x9xf32>
    %201 = vector.shape_cast %200 : vector<1x32x9xf32> to vector<32x9xf32>
    %202 = arith.mulf %201, %183 : vector<32x9xf32>
    %cst_164 = arith.constant dense<0.000000e+00> : vector<32xf32>
    %203 = vector.multi_reduction <add>, %202, %cst_164 [1] : vector<32x9xf32> to vector<32xf32>
    %204 = vector.shape_cast %203 : vector<32xf32> to vector<32x1xf32>
    %cst_165 = arith.constant dense<0.000000e+00> : vector<1xf32>
    %205 = vector.multi_reduction <add>, %204, %cst_165 [0] : vector<32x1xf32> to vector<1xf32>
    %206 = vector.shape_cast %205 : vector<1xf32> to vector<1x1xf32>
    %c1_i32 = arith.constant 1 : i32
    %207 = vector.broadcast %c1_i32 : i32 to vector<1x8xi32>
    %208 = arith.cmpi eq, %184, %207 : vector<1x8xi32>
    %cst_166 = arith.constant 0.000000e+00 : f32
    %209 = vector.shape_cast %206 : vector<1x1xf32> to vector<1x1xf32>
    %210 = vector.broadcast %209 : vector<1x1xf32> to vector<1x8xf32>
    %211 = vector.broadcast %cst_166 : f32 to vector<1x8xf32>
    %212 = arith.select %208, %210, %211 : vector<1x8xi1>, vector<1x8xf32>
    %213 = arith.addf %199, %212 : vector<1x8xf32>
    %c2_167 = arith.constant 2 : index
    %c0_168 = arith.constant 0 : index
    %c0_169 = arith.constant 0 : index
    %214 = vector.load %arg6[%c2_167, %c0_168, %c0_169] : memref<8x32x9xf32, #tpu.memory_space<vmem>>, vector<1x32x9xf32>
    %215 = vector.shape_cast %214 : vector<1x32x9xf32> to vector<32x9xf32>
    %216 = arith.mulf %215, %183 : vector<32x9xf32>
    %cst_170 = arith.constant dense<0.000000e+00> : vector<32xf32>
    %217 = vector.multi_reduction <add>, %216, %cst_170 [1] : vector<32x9xf32> to vector<32xf32>
    %218 = vector.shape_cast %217 : vector<32xf32> to vector<32x1xf32>
    %cst_171 = arith.constant dense<0.000000e+00> : vector<1xf32>
    %219 = vector.multi_reduction <add>, %218, %cst_171 [0] : vector<32x1xf32> to vector<1xf32>
    %220 = vector.shape_cast %219 : vector<1xf32> to vector<1x1xf32>
    %c2_i32 = arith.constant 2 : i32
    %221 = vector.broadcast %c2_i32 : i32 to vector<1x8xi32>
    %222 = arith.cmpi eq, %184, %221 : vector<1x8xi32>
    %cst_172 = arith.constant 0.000000e+00 : f32
    %223 = vector.shape_cast %220 : vector<1x1xf32> to vector<1x1xf32>
    %224 = vector.broadcast %223 : vector<1x1xf32> to vector<1x8xf32>
    %225 = vector.broadcast %cst_172 : f32 to vector<1x8xf32>
    %226 = arith.select %222, %224, %225 : vector<1x8xi1>, vector<1x8xf32>
    %227 = arith.addf %213, %226 : vector<1x8xf32>
    %c3_173 = arith.constant 3 : index
    %c0_174 = arith.constant 0 : index
    %c0_175 = arith.constant 0 : index
    %228 = vector.load %arg6[%c3_173, %c0_174, %c0_175] : memref<8x32x9xf32, #tpu.memory_space<vmem>>, vector<1x32x9xf32>
    %229 = vector.shape_cast %228 : vector<1x32x9xf32> to vector<32x9xf32>
    %230 = arith.mulf %229, %183 : vector<32x9xf32>
    %cst_176 = arith.constant dense<0.000000e+00> : vector<32xf32>
    %231 = vector.multi_reduction <add>, %230, %cst_176 [1] : vector<32x9xf32> to vector<32xf32>
    %232 = vector.shape_cast %231 : vector<32xf32> to vector<32x1xf32>
    %cst_177 = arith.constant dense<0.000000e+00> : vector<1xf32>
    %233 = vector.multi_reduction <add>, %232, %cst_177 [0] : vector<32x1xf32> to vector<1xf32>
    %234 = vector.shape_cast %233 : vector<1xf32> to vector<1x1xf32>
    %c3_i32 = arith.constant 3 : i32
    %235 = vector.broadcast %c3_i32 : i32 to vector<1x8xi32>
    %236 = arith.cmpi eq, %184, %235 : vector<1x8xi32>
    %cst_178 = arith.constant 0.000000e+00 : f32
    %237 = vector.shape_cast %234 : vector<1x1xf32> to vector<1x1xf32>
    %238 = vector.broadcast %237 : vector<1x1xf32> to vector<1x8xf32>
    %239 = vector.broadcast %cst_178 : f32 to vector<1x8xf32>
    %240 = arith.select %236, %238, %239 : vector<1x8xi1>, vector<1x8xf32>
    %241 = arith.addf %227, %240 : vector<1x8xf32>
    %c4_179 = arith.constant 4 : index
    %c0_180 = arith.constant 0 : index
    %c0_181 = arith.constant 0 : index
    %242 = vector.load %arg6[%c4_179, %c0_180, %c0_181] : memref<8x32x9xf32, #tpu.memory_space<vmem>>, vector<1x32x9xf32>
    %243 = vector.shape_cast %242 : vector<1x32x9xf32> to vector<32x9xf32>
    %244 = arith.mulf %243, %183 : vector<32x9xf32>
    %cst_182 = arith.constant dense<0.000000e+00> : vector<32xf32>
    %245 = vector.multi_reduction <add>, %244, %cst_182 [1] : vector<32x9xf32> to vector<32xf32>
    %246 = vector.shape_cast %245 : vector<32xf32> to vector<32x1xf32>
    %cst_183 = arith.constant dense<0.000000e+00> : vector<1xf32>
    %247 = vector.multi_reduction <add>, %246, %cst_183 [0] : vector<32x1xf32> to vector<1xf32>
    %248 = vector.shape_cast %247 : vector<1xf32> to vector<1x1xf32>
    %c4_i32 = arith.constant 4 : i32
    %249 = vector.broadcast %c4_i32 : i32 to vector<1x8xi32>
    %250 = arith.cmpi eq, %184, %249 : vector<1x8xi32>
    %cst_184 = arith.constant 0.000000e+00 : f32
    %251 = vector.shape_cast %248 : vector<1x1xf32> to vector<1x1xf32>
    %252 = vector.broadcast %251 : vector<1x1xf32> to vector<1x8xf32>
    %253 = vector.broadcast %cst_184 : f32 to vector<1x8xf32>
    %254 = arith.select %250, %252, %253 : vector<1x8xi1>, vector<1x8xf32>
    %255 = arith.addf %241, %254 : vector<1x8xf32>
    %c5_185 = arith.constant 5 : index
    %c0_186 = arith.constant 0 : index
    %c0_187 = arith.constant 0 : index
    %256 = vector.load %arg6[%c5_185, %c0_186, %c0_187] : memref<8x32x9xf32, #tpu.memory_space<vmem>>, vector<1x32x9xf32>
    %257 = vector.shape_cast %256 : vector<1x32x9xf32> to vector<32x9xf32>
    %258 = arith.mulf %257, %183 : vector<32x9xf32>
    %cst_188 = arith.constant dense<0.000000e+00> : vector<32xf32>
    %259 = vector.multi_reduction <add>, %258, %cst_188 [1] : vector<32x9xf32> to vector<32xf32>
    %260 = vector.shape_cast %259 : vector<32xf32> to vector<32x1xf32>
    %cst_189 = arith.constant dense<0.000000e+00> : vector<1xf32>
    %261 = vector.multi_reduction <add>, %260, %cst_189 [0] : vector<32x1xf32> to vector<1xf32>
    %262 = vector.shape_cast %261 : vector<1xf32> to vector<1x1xf32>
    %c5_i32 = arith.constant 5 : i32
    %263 = vector.broadcast %c5_i32 : i32 to vector<1x8xi32>
    %264 = arith.cmpi eq, %184, %263 : vector<1x8xi32>
    %cst_190 = arith.constant 0.000000e+00 : f32
    %265 = vector.shape_cast %262 : vector<1x1xf32> to vector<1x1xf32>
    %266 = vector.broadcast %265 : vector<1x1xf32> to vector<1x8xf32>
    %267 = vector.broadcast %cst_190 : f32 to vector<1x8xf32>
    %268 = arith.select %264, %266, %267 : vector<1x8xi1>, vector<1x8xf32>
    %269 = arith.addf %255, %268 : vector<1x8xf32>
    %c6_191 = arith.constant 6 : index
    %c0_192 = arith.constant 0 : index
    %c0_193 = arith.constant 0 : index
    %270 = vector.load %arg6[%c6_191, %c0_192, %c0_193] : memref<8x32x9xf32, #tpu.memory_space<vmem>>, vector<1x32x9xf32>
    %271 = vector.shape_cast %270 : vector<1x32x9xf32> to vector<32x9xf32>
    %272 = arith.mulf %271, %183 : vector<32x9xf32>
    %cst_194 = arith.constant dense<0.000000e+00> : vector<32xf32>
    %273 = vector.multi_reduction <add>, %272, %cst_194 [1] : vector<32x9xf32> to vector<32xf32>
    %274 = vector.shape_cast %273 : vector<32xf32> to vector<32x1xf32>
    %cst_195 = arith.constant dense<0.000000e+00> : vector<1xf32>
    %275 = vector.multi_reduction <add>, %274, %cst_195 [0] : vector<32x1xf32> to vector<1xf32>
    %276 = vector.shape_cast %275 : vector<1xf32> to vector<1x1xf32>
    %c6_i32 = arith.constant 6 : i32
    %277 = vector.broadcast %c6_i32 : i32 to vector<1x8xi32>
    %278 = arith.cmpi eq, %184, %277 : vector<1x8xi32>
    %cst_196 = arith.constant 0.000000e+00 : f32
    %279 = vector.shape_cast %276 : vector<1x1xf32> to vector<1x1xf32>
    %280 = vector.broadcast %279 : vector<1x1xf32> to vector<1x8xf32>
    %281 = vector.broadcast %cst_196 : f32 to vector<1x8xf32>
    %282 = arith.select %278, %280, %281 : vector<1x8xi1>, vector<1x8xf32>
    %283 = arith.addf %269, %282 : vector<1x8xf32>
    %c7_197 = arith.constant 7 : index
    %c0_198 = arith.constant 0 : index
    %c0_199 = arith.constant 0 : index
    %284 = vector.load %arg6[%c7_197, %c0_198, %c0_199] : memref<8x32x9xf32, #tpu.memory_space<vmem>>, vector<1x32x9xf32>
    %285 = vector.shape_cast %284 : vector<1x32x9xf32> to vector<32x9xf32>
    %286 = arith.mulf %285, %183 : vector<32x9xf32>
    %cst_200 = arith.constant dense<0.000000e+00> : vector<32xf32>
    %287 = vector.multi_reduction <add>, %286, %cst_200 [1] : vector<32x9xf32> to vector<32xf32>
    %288 = vector.shape_cast %287 : vector<32xf32> to vector<32x1xf32>
    %cst_201 = arith.constant dense<0.000000e+00> : vector<1xf32>
    %289 = vector.multi_reduction <add>, %288, %cst_201 [0] : vector<32x1xf32> to vector<1xf32>
    %290 = vector.shape_cast %289 : vector<1xf32> to vector<1x1xf32>
    %c7_i32 = arith.constant 7 : i32
    %291 = vector.broadcast %c7_i32 : i32 to vector<1x8xi32>
    %292 = arith.cmpi eq, %184, %291 : vector<1x8xi32>
    %cst_202 = arith.constant 0.000000e+00 : f32
    %293 = vector.shape_cast %290 : vector<1x1xf32> to vector<1x1xf32>
    %294 = vector.broadcast %293 : vector<1x1xf32> to vector<1x8xf32>
    %295 = vector.broadcast %cst_202 : f32 to vector<1x8xf32>
    %296 = arith.select %292, %294, %295 : vector<1x8xi1>, vector<1x8xf32>
    %297 = arith.addf %283, %296 : vector<1x8xf32>
    %c0_203 = arith.constant 0 : index
    %c0_204 = arith.constant 0 : index
    %298 = vector.load %arg7[%c0_203, %c0_204] : memref<1x8xf32, #tpu.memory_space<vmem>>, vector<1x8xf32>
    %299 = arith.addf %297, %298 : vector<1x8xf32>
    %c0_205 = arith.constant 0 : index
    %c0_206 = arith.constant 0 : index
    %300 = vector.load %arg8[%c0_205, %c0_206] : memref<1x8xf32, #tpu.memory_space<vmem>>, vector<1x8xf32>
    tpu.vector_store %arg8[%c0_205, %c0_206], %299 {strides = array<i32>} : memref<1x8xf32, #tpu.memory_space<vmem>>, vector<1x8xf32>,
    return
  }
}

</mosaic_0001>

<bundles_post_ra>
// kernel: tpu_custom_call.1
= control target key start
LH: loop header
LB: loop body
LE: loop exit
PB: predicated region body
PF: predicated region fallthrough
CT: control target
= control target key end

     0   :  { %s4614_s0 = inlined_call_operand.vmem [shape: f32[3,256], index: 0, kind: input, shape index: {}]   ;;  %s4615_s1 = inlined_call_operand.vmem [shape: f32[9,256,49], index: 1, kind: input, shape index: {}]   ;;  %s4616_s2 = inlined_call_operand.vmem [shape: f32[9,16,3], index: 2, kind: input, shape index: {}]   ;;  %s4617_s3 = inlined_call_operand.vmem [shape: f32[9,49,9], index: 3, kind: input, shape index: {}]   ;;  %s4618_s4 = inlined_call_operand.vmem [shape: f32[9,32,16], index: 4, kind: input, shape index: {}]   ;;  %s4619_s5 = inlined_call_operand.vmem [shape: f32[32,4], index: 5, kind: input, shape index: {}]   ;;  %s4620_s6 = inlined_call_operand.vmem [shape: f32[8,32,9], index: 6, kind: input, shape index: {}]   ;;  %s4621_s7 = inlined_call_operand.vmem [shape: f32[1,8], index: 7, kind: input, shape index: {}]   ;;  %s4622_s8 = inlined_call_operand.hbm [shape: f32[1,8], index: 8, kind: output, shape index: {}]  }
   0x1   :  { %v2363_v0 = vld [vmem:[%s4615_s1 + $0x178] sm:$0xff]  ;;  %v2362_v2 = vld [vmem:[%s4615_s1 + $0x170] sm:$0xff]  ;;  %v2361_v4 = vld [vmem:[%s4615_s1 + $0x168] sm:$0xff] }
   0x2   :  { %v2379_v1 = vld [vmem:[%s4615_s1 + $0x1f8] sm:$0xff]  ;;  %153 = vmatpush.msra.mxu2 %v2363_v0  ;;  %v2378_v3 = vld [vmem:[%s4615_s1 + $0x1f0] sm:$0xff]  ;;  %v2377_v5 = vld [vmem:[%s4615_s1 + $0x1e8] sm:$0xff] }
   0x3   :  { %173 = vmatpush.msra.mxu3 %v2379_v1  ;;  %v2360_v6 = vld [vmem:[%s4615_s1 + $0x160] sm:$0xff]  ;;  %v2359_v8 = vld [vmem:[%s4615_s1 + $0x158] sm:$0xff]  ;;  %v2358_v10 = vld [vmem:[%s4615_s1 + $0x150] sm:$0xff] }
   0x4   :  { %154 = vmatpush.msra.mxu2 %v2362_v2  ;;  %v2376_v7 = vld [vmem:[%s4615_s1 + $0x1e0] sm:$0xff]  ;;  %v2375_v9 = vld [vmem:[%s4615_s1 + $0x1d8] sm:$0xff]  ;;  %v2374_v11 = vld [vmem:[%s4615_s1 + $0x1d0] sm:$0xff] }
   0x5   :  { %174 = vmatpush.msra.mxu3 %v2378_v3  ;;  %v50_v12 = vld [vmem:[%s4615_s1 + $0x78] sm:$0xff]  ;;  %v2357_v14 = vld [vmem:[%s4615_s1 + $0x148] sm:$0xff]  ;;  %v49_v16 = vld [vmem:[%s4615_s1 + $0x70] sm:$0xff] }
   0x6   :  { %155 = vmatpush.msra.mxu2 %v2361_v4  ;;  %v66_v13 = vld [vmem:[%s4615_s1 + $0xf8] sm:$0xff]  ;;  %v2373_v15 = vld [vmem:[%s4615_s1 + $0x1c8] sm:$0xff]  ;;  %73 = vmatpush.msra.mxu0 %v50_v12  ;;  %v2356_v17 = vld [vmem:[%s4615_s1 + $0x140] sm:$0xff] }
   0x7   :  { %175 = vmatpush.msra.mxu3 %v2377_v5  ;;  %93 = vmatpush.msra.mxu1 %v66_v13  ;;  %v2372_v18 = vld [vmem:[%s4615_s1 + $0x1c0] sm:$0xff]  ;;  %v65_v19 = vld [vmem:[%s4615_s1 + $0xf0] sm:$0xff]  ;;  %v48_v20 = vld [vmem:[%s4615_s1 + $0x68] sm:$0xff] }
   0x8   :  { %156 = vmatpush.msra.mxu2 %v2360_v6  ;;  %74 = vmatpush.msra.mxu0 %v49_v16  ;;  %v64_v21 = vld [vmem:[%s4615_s1 + $0xe8] sm:$0xff]  ;;  %v3006_v22 = vld [vmem:[%s4614_s0] sm:$0x77]  ;;  %v2355_v25 = vld [vmem:[%s4615_s1 + $0x138] sm:$0xff] }
   0x9   :  { %176 = vmatpush.msra.mxu3 %v2376_v7  ;;  %94 = vmatpush.msra.mxu1 %v65_v19  ;;  %68 = vst [vmem:[#allocation1] ss:$2 sm:$0xff] %v3006_v22  ;;  %v47_v23 = vld [vmem:[%s4615_s1 + $0x60] sm:$0xff]  ;;  %v2371_v26 = vld [vmem:[%s4615_s1 + $0x1b8] sm:$0xff]  ;;  %v2354_v29 = vld [vmem:[%s4615_s1 + $0x130] sm:$0xff] }
   0xa   :  { %157 = vmatpush.msra.mxu2 %v2359_v8  ;;  %v63_v24 = vld [vmem:[%s4615_s1 + $0xe0] sm:$0xff]  ;;  %75 = vmatpush.msra.mxu0 %v48_v20  ;;  %v46_v27 = vld [vmem:[%s4615_s1 + $0x58] sm:$0xff]  ;;  %v2370_v30 = vld [vmem:[%s4615_s1 + $0x1b0] sm:$0xff] }
   0xb   :  { %177 = vmatpush.msra.mxu3 %v2375_v9  ;;  %95 = vmatpush.msra.mxu1 %v64_v21  ;;  %v62_v28 = vld [vmem:[%s4615_s1 + $0xd8] sm:$0xff]  ;;  %v45_v31 = vld [vmem:[%s4615_s1 + $0x50] sm:$0xff]  ;;  %v2353_v33 = vld [vmem:[%s4615_s1 + $0x128] sm:$0xff] }
   0xc   :  { %158 = vmatpush.msra.mxu2 %v2358_v10  ;;  %76 = vmatpush.msra.mxu0 %v47_v23  ;;  %v61_v32 = vld [vmem:[%s4615_s1 + $0xd0] sm:$0xff]  ;;  %v2369_v34 = vld [vmem:[%s4615_s1 + $0x1a8] sm:$0xff]  ;;  %v2352_v35 = vld [vmem:[%s4615_s1 + $0x120] sm:$0xff] }
   0xd   :  { %178 = vmatpush.msra.mxu3 %v2374_v11  ;;  %96 = vmatpush.msra.mxu1 %v63_v24  ;;  %v2368_v36 = vld [vmem:[%s4615_s1 + $0x1a0] sm:$0xff]  ;;  %v44_v37 = vld [vmem:[%s4615_s1 + $0x48] sm:$0xff]  ;;  %v2351_v43 = vld [vmem:[%s4615_s1 + $0x118] sm:$0xff] }
   0xe   :  { %159 = vmatpush.msra.mxu2 %v2357_v14  ;;  %77 = vmatpush.msra.mxu0 %v46_v27  ;;  %v60_v38 = vld [vmem:[%s4615_s1 + $0xc8] sm:$0xff]  ;;  %v43_v41 = vld [vmem:[%s4615_s1 + $0x40] sm:$0xff]  ;;  %v2367_v44 = vld [vmem:[%s4615_s1 + $0x198] sm:$0xff] }
   0xf   :  { %179 = vmatpush.msra.mxu3 %v2373_v15  ;;  %97 = vmatpush.msra.mxu1 %v62_v28  ;;  %v59_v42 = vld [vmem:[%s4615_s1 + $0xc0] sm:$0xff] }
  0x10   :  { %160 = vmatpush.msra.mxu2 %v2356_v17  ;;  %v3057_v39 = vld.sshfl [vmem:[#allocation1] sm:$0xff pattern:$0x75316420]  ;;  %v3059_v40 = vld.sshfl [vmem:[#allocation1 + $0x8] sm:$0xff pattern:$0x75316420]  ;;  %78 = vmatpush.msra.mxu0 %v45_v31 }
  0x11   :  { %180 = vmatpush.msra.mxu3 %v2372_v18  ;;  %98 = vmatpush.msra.mxu1 %v61_v32  ;;  %148 = vst [vmem:[#allocation1] ss:$2 sm:$0xff] %v3006_v22 }
  0x12   :  { %161 = vmatpush.msra.mxu2 %v2355_v25  ;;  %79 = vmatpush.msra.mxu0 %v44_v37 }
  0x13   :  { %181 = vmatpush.msra.mxu3 %v2371_v26  ;;  %99 = vmatpush.msra.mxu1 %v60_v38 }
  0x14   :  { %162 = vmatpush.msra.mxu2 %v2354_v29 }
  0x15   :  { %182 = vmatpush.msra.mxu3 %v2370_v30 }
  0x16   :  { %163 = vmatpush.msra.mxu2 %v2353_v33 }
  0x17   :  { %183 = vmatpush.msra.mxu3 %v2369_v34 }
  0x18   :  { %13 = vsyncpa [#allocation3], 0  ;;  %164 = vmatpush.msra.mxu2 %v2352_v35  ;;  %v42_v45 = vld [vmem:[%s4615_s1 + $0x38] sm:$0xff]  ;;  %v2350_v47 = vld [vmem:[%s4615_s1 + $0x110] sm:$0xff]  ;;  %80 = vmatpush.msra.mxu0 %v43_v41  ;;  %vm203_vm0 = vcmask 1042432   ;;  %vm196_vm1 = vcmask 23552  }
  0x19   :  { %184 = vmatpush.msra.mxu3 %v2368_v36  ;;  %v58_v46 = vld [vmem:[%s4615_s1 + $0xb8] sm:$0xff]  ;;  %v2366_v48 = vld [vmem:[%s4615_s1 + $0x190] sm:$0xff]  ;;  %100 = vmatpush.msra.mxu1 %v59_v42  ;;  %v2349_v51 = vld [vmem:[%s4615_s1 + $0x108] sm:$0xff]  ;;  %vm1067_vm2 = vcmask 400384   ;;  %vm1164_vm10 = vcmask 1040384   ;;  %vm1234_vm11 = vcmask 130048  }
  0x1a   :  { %165 = vmatpush.msra.mxu2 %v2351_v43  ;;  %v41_v49 = vld [vmem:[%s4615_s1 + $0x30] sm:$0xff]  ;;  %v2365_v52 = vld [vmem:[%s4615_s1 + $0x188] sm:$0xff]  ;;  %v2348_v53 = vld [vmem:[%s4615_s1 + $0x100] sm:$0xff]  ;;  %81 = vmatpush.msra.mxu0 %v42_v45  ;;  %vm1905_vm12 = vcmask 72704   ;;  %s2891_s9 = smov [#allocation2]   ;;  %s2339_s13 = sshll.u32 %s4622_s8, 4  ;;  %s2340_s13 = int_to_ptr.hbm [resolvable:$true] %s2339_s13 }
  0x1b   :  { %185 = vmatpush.msra.mxu3 %v2367_v44  ;;  %v57_v50 = vld [vmem:[%s4615_s1 + $0xb0] sm:$0xff]  ;;  %101 = vmatpush.msra.mxu1 %v58_v46  ;;  %v2364_v54 = vld [vmem:[%s4615_s1 + $0x180] sm:$0xff]  ;;  %v40_v55 = vld [vmem:[%s4615_s1 + $0x28] sm:$0xff]  ;;  %s2337_s10 = sshll.u32 %s2891_s9, 4  ;;  %s2338_s10 = int_to_ptr.vmem [resolvable:$true] %s2337_s10 }
  0x1c   :  { %166 = vmatpush.msra.mxu2 %v2350_v47  ;;  %v56_v56 = vld [vmem:[%s4615_s1 + $0xa8] sm:$0xff]  ;;  %v149_v57 = vld.sshfl [vmem:[#allocation1] sm:$0xff pattern:$0x75316420]  ;;  %82 = vmatpush.msra.mxu0 %v41_v49  ;;  %v38_v61 = vld [vmem:[%s4615_s1 + $0x18] sm:$0xff] }
  0x1d   :  { %186 = vmatpush.msra.mxu3 %v2366_v48  ;;  %v150_v58 = vld.sshfl [vmem:[#allocation1 + $0x8] sm:$0xff pattern:$0x75316420]  ;;  %102 = vmatpush.msra.mxu1 %v57_v50  ;;  %v39_v59 = vld [vmem:[%s4615_s1 + $0x20] sm:$0xff]  ;;  %v54_v62 = vld [vmem:[%s4615_s1 + $0x98] sm:$0xff] }
  0x1e   :  { %167 = vmatpush.msra.mxu2 %v2349_v51  ;;  %295 = vst [vmem:[#allocation1] ss:$2 sm:$0xff] %v3006_v22  ;;  %83 = vmatpush.msra.mxu0 %v40_v55  ;;  %v55_v60 = vld [vmem:[%s4615_s1 + $0xa0] sm:$0xff]  ;;  %v37_v63 = vld [vmem:[%s4615_s1 + $0x10] sm:$0xff]  ;;  %v36_v1 = vld [vmem:[%s4615_s1 + $0x8] sm:$0xff] }
  0x1f   :  { %187 = vmatpush.msra.mxu3 %v2365_v52  ;;  %103 = vmatpush.msra.mxu1 %v56_v56  ;;  %v53_v0 = vld [vmem:[%s4615_s1 + $0x90] sm:$0xff]  ;;  %v52_v2 = vld [vmem:[%s4615_s1 + $0x88] sm:$0xff]  ;;  %v35_v3 = vld [vmem:[%s4615_s1] sm:$0xff] }
  0x20   :  { %168 = vmatpush.msra.mxu2 %v2348_v53  ;;  %84 = vmatpush.msra.mxu0 %v39_v59  ;;  %v51_v4 = vld [vmem:[%s4615_s1 + $0x80] sm:$0xff]  ;;  %v2403_v5 = vld [vmem:[%s4615_s1 + $0x278] sm:$0xff]  ;;  %v2402_v6 = vld [vmem:[%s4615_s1 + $0x270] sm:$0xff] }
  0x21   :  { %188 = vmatpush.msra.mxu3 %v2364_v54  ;;  %169 = vmatmul.f32.vlgmr.msra.gmra.mxu2 %v149_v57  ;;  %v2401_v7 = vld [vmem:[%s4615_s1 + $0x268] sm:$0xff]  ;;  %v2400_v8 = vld [vmem:[%s4615_s1 + $0x260] sm:$0xff]  ;;  %v2399_v9 = vld [vmem:[%s4615_s1 + $0x258] sm:$0xff] }
  0x22   :  { %189 = vmatmul.f32.vlgmr.msra.gmra.mxu3 %v150_v58  ;;  %104 = vmatpush.msra.mxu1 %v55_v60  ;;  %v2398_v10 = vld [vmem:[%s4615_s1 + $0x250] sm:$0xff]  ;;  %v2397_v11 = vld [vmem:[%s4615_s1 + $0x248] sm:$0xff]  ;;  %v2396_v12 = vld [vmem:[%s4615_s1 + $0x240] sm:$0xff] }
  0x23   :  { %85 = vmatpush.msra.mxu0 %v38_v61  ;;  %300 = vmatpush.msrb.mxu2 %v2403_v5  ;;  %v2395_v13 = vld [vmem:[%s4615_s1 + $0x238] sm:$0xff]  ;;  %v2394_v14 = vld [vmem:[%s4615_s1 + $0x230] sm:$0xff]  ;;  %v2393_v15 = vld [vmem:[%s4615_s1 + $0x228] sm:$0xff] }
  0x24   :  { %105 = vmatpush.msra.mxu1 %v54_v62  ;;  %v2392_v16 = vld [vmem:[%s4615_s1 + $0x220] sm:$0xff]  ;;  %v2391_v17 = vld [vmem:[%s4615_s1 + $0x218] sm:$0xff]  ;;  %v2390_v18 = vld [vmem:[%s4615_s1 + $0x210] sm:$0xff] }
  0x25   :  { %86 = vmatpush.msra.mxu0 %v37_v63  ;;  %301 = vmatpush.msrb.mxu2 %v2402_v6  ;;  %v2389_v19 = vld [vmem:[%s4615_s1 + $0x208] sm:$0xff]  ;;  %v2388_v23 = vld [vmem:[%s4615_s1 + $0x200] sm:$0xff]  ;;  %v2419_v25 = vld [vmem:[%s4615_s1 + $0x2f8] sm:$0xff] }
  0x26   :  { %106 = vmatpush.msra.mxu1 %v53_v0  ;;  %v2380_v26 = vld [vmem:[%s4616_s2 + $0x10] sm:$0xff]  ;;  %v296_v27 = vld.sshfl [vmem:[#allocation1] sm:$0xff pattern:$0x75316420]  ;;  %v2417_v32 = vld [vmem:[%s4615_s1 + $0x2e8] sm:$0xff] }
  0x27   :  { %87 = vmatpush.msra.mxu0 %v36_v1  ;;  %302 = vmatpush.msrb.mxu2 %v2401_v7  ;;  %v297_v28 = vld.sshfl [vmem:[#allocation1 + $0x8] sm:$0xff pattern:$0x75316420]  ;;  %v2418_v29 = vld [vmem:[%s4615_s1 + $0x2f0] sm:$0xff]  ;;  %v113_v34 = vld [vmem:[%s4616_s2] sm:$0xff] }
  0x28   :  { %107 = vmatpush.msra.mxu1 %v52_v2  ;;  %410 = vst [vmem:[#allocation1] ss:$2 sm:$0xff] %v3006_v22  ;;  %v2440_v35 = vld [vmem:[%s4615_s1 + $0x378] sm:$0xff]  ;;  %v2416_v36 = vld [vmem:[%s4615_s1 + $0x2e0] sm:$0xff]  ;;  %v2439_v37 = vld [vmem:[%s4615_s1 + $0x370] sm:$0xff] }
  0x29   :  { %88 = vmatpush.msra.mxu0 %v35_v3  ;;  %303 = vmatpush.msrb.mxu2 %v2400_v8  ;;  %v2415_v38 = vld [vmem:[%s4615_s1 + $0x2d8] sm:$0xff]  ;;  %v2414_v41 = vld [vmem:[%s4615_s1 + $0x2d0] sm:$0xff]  ;;  %v2437_v42 = vld [vmem:[%s4615_s1 + $0x360] sm:$0xff] }
  0x2a   :  { %108 = vmatpush.msra.mxu1 %v51_v4  ;;  %89 = vmatmul.f32.vlgmr.msra.gmra.mxu0 %v3057_v39  ;;  %v2381_v39 = vld [vmem:[%s4616_s2 + $0x18] sm:$0xff]  ;;  %v2413_v43 = vld [vmem:[%s4615_s1 + $0x2c8] sm:$0xff]  ;;  %v2412_v46 = vld [vmem:[%s4615_s1 + $0x2c0] sm:$0xff] }
  0x2b   :  { %109 = vmatmul.f32.vlgmr.msra.gmra.mxu1 %v3059_v40  ;;  %304 = vmatpush.msrb.mxu2 %v2399_v9  ;;  %v2438_v40 = vld [vmem:[%s4615_s1 + $0x368] sm:$0xff]  ;;  %v2436_v45 = vld [vmem:[%s4615_s1 + $0x358] sm:$0xff]  ;;  %v2410_v48 = vld [vmem:[%s4615_s1 + $0x2b0] sm:$0xff] }
  0x2c   :  { %v114_v44 = vld [vmem:[%s4616_s2 + $0x8] sm:$0xff]  ;;  %v2411_v47 = vld [vmem:[%s4615_s1 + $0x2b8] sm:$0xff]  ;;  %v2408_v50 = vld [vmem:[%s4615_s1 + $0x2a0] sm:$0xff] }
  0x2d   :  { %305 = vmatpush.msrb.mxu2 %v2398_v10  ;;  %v2409_v49 = vld [vmem:[%s4615_s1 + $0x2a8] sm:$0xff]  ;;  %v2407_v51 = vld [vmem:[%s4615_s1 + $0x298] sm:$0xff]  ;;  %v2406_v52 = vld [vmem:[%s4615_s1 + $0x290] sm:$0xff] }
  0x2e   :  { %v2405_v53 = vld [vmem:[%s4615_s1 + $0x288] sm:$0xff]  ;;  %v2404_v54 = vld [vmem:[%s4615_s1 + $0x280] sm:$0xff]  ;;  %v2435_v55 = vld [vmem:[%s4615_s1 + $0x350] sm:$0xff] }
  0x2f   :  { %306 = vmatpush.msrb.mxu2 %v2397_v11  ;;  %v2434_v56 = vld [vmem:[%s4615_s1 + $0x348] sm:$0xff]  ;;  %v2433_v57 = vld [vmem:[%s4615_s1 + $0x340] sm:$0xff]  ;;  %v2432_v58 = vld [vmem:[%s4615_s1 + $0x338] sm:$0xff] }
  0x30   :  { %v2431_v59 = vld [vmem:[%s4615_s1 + $0x330] sm:$0xff]  ;;  %v2430_v60 = vld [vmem:[%s4615_s1 + $0x328] sm:$0xff]  ;;  %v2477_v61 = vld [vmem:[%s4615_s1 + $0x478] sm:$0xff] }
  0x31   :  { %307 = vmatpush.msrb.mxu2 %v2396_v12  ;;  %v2429_v62 = vld [vmem:[%s4615_s1 + $0x320] sm:$0xff]  ;;  %v2428_v63 = vld [vmem:[%s4615_s1 + $0x318] sm:$0xff]  ;;  %v2427_v0 = vld [vmem:[%s4615_s1 + $0x310] sm:$0xff] }
  0x32   :  { %v2476_v2 = vld [vmem:[%s4615_s1 + $0x470] sm:$0xff]  ;;  %v2426_v3 = vld [vmem:[%s4615_s1 + $0x308] sm:$0xff]  ;;  %v2425_v7 = vld [vmem:[%s4615_s1 + $0x300] sm:$0xff] }
  0x33   :  { %308 = vmatpush.msrb.mxu2 %v2395_v13  ;;  %v2475_v5 = vld [vmem:[%s4615_s1 + $0x468] sm:$0xff]  ;;  %v2474_v8 = vld [vmem:[%s4615_s1 + $0x460] sm:$0xff]  ;;  %v2493_v9 = vld [vmem:[%s4615_s1 + $0x4f8] sm:$0xff] }
  0x34   :  { %v2473_v10 = vld [vmem:[%s4615_s1 + $0x458] sm:$0xff]  ;;  %v2492_v11 = vld [vmem:[%s4615_s1 + $0x4f0] sm:$0xff]  ;;  %v2491_v13 = vld [vmem:[%s4615_s1 + $0x4e8] sm:$0xff] }
  0x35   :  { %309 = vmatpush.msrb.mxu2 %v2394_v14  ;;  %v2472_v12 = vld [vmem:[%s4615_s1 + $0x450] sm:$0xff]  ;;  %v2471_v14 = vld [vmem:[%s4615_s1 + $0x448] sm:$0xff] }
  0x37   :  { %310 = vmatpush.msrb.mxu2 %v2393_v15  ;;  %v2490_v15 = vld [vmem:[%s4615_s1 + $0x4e0] sm:$0xff] }
  0x39   :  { %311 = vmatpush.msrb.mxu2 %v2392_v16  ;;  %v2470_v16 = vld [vmem:[%s4615_s1 + $0x440] sm:$0xff] }
  0x3b   :  { %312 = vmatpush.msrb.mxu2 %v2391_v17  ;;  %v2489_v17 = vld [vmem:[%s4615_s1 + $0x4d8] sm:$0xff] }
  0x3d   :  { %313 = vmatpush.msrb.mxu2 %v2390_v18  ;;  %v2469_v18 = vld [vmem:[%s4615_s1 + $0x438] sm:$0xff] }
  0x3f   :  { %314 = vmatpush.msrb.mxu2 %v2389_v19  ;;  %v2488_v19 = vld [vmem:[%s4615_s1 + $0x4d0] sm:$0xff] }
  0x41   :  { %315 = vmatpush.msrb.mxu2 %v2388_v23  ;;  %v2467_v23 = vld [vmem:[%s4615_s1 + $0x428] sm:$0xff] }
  0x42   :  { %316 = vmatmul.f32.vlgmr.msrb.gmra.mxu2 %v296_v27 }
  0xa4   :  { %v170_v20 = vpop.f32.mrf.mxu2 }
  0xa5   :  { %v190_v21 = vpop.f32.mrf.mxu3 }
  0xa6   :  { %v191_v24 = vadd.f32 %v190_v21, %v170_v20  ;;  %v2468_v20 = vld [vmem:[%s4615_s1 + $0x430] sm:$0xff]  ;;  %v2487_v21 = vld [vmem:[%s4615_s1 + $0x4c8] sm:$0xff] }
  0xa7   :  { %v90_v30 = vpop.f32.mrf.mxu0 }
  0xa8   :  { %2382 = vmatpush.msk.msrb.mxu3 %vm203_vm0, %v191_v24  ;;  %v110_v31 = vpop.f32.mrf.mxu1  ;;  %v2486_v24 = vld [vmem:[%s4615_s1 + $0x4c0] sm:$0xff] }
  0xa9   :  { %2383 = vmatmul.msk.f32.vlgmr.msrb.gmra.mxu3 %vm196_vm1, %v2380_v26  ;;  %v111_v33 = vadd.f32 %v110_v31, %v90_v30  ;;  %v2485_v26 = vld [vmem:[%s4615_s1 + $0x4b8] sm:$0xff]  ;;  %v2484_v31 = vld [vmem:[%s4615_s1 + $0x4b0] sm:$0xff] }
  0xaa   :  { %320 = vmatpush.msra.mxu3 %v2419_v25  ;;  %v2466_v25 = vld [vmem:[%s4615_s1 + $0x420] sm:$0xff]  ;;  %v2465_v30 = vld [vmem:[%s4615_s1 + $0x418] sm:$0xff] }
  0xab   :  { %2385 = vmatpush.msk.msrb.mxu1 %vm203_vm0, %v111_v33  ;;  %v2483_v33 = vld [vmem:[%s4615_s1 + $0x4a8] sm:$0xff] }
  0xac   :  { %321 = vmatpush.msra.mxu3 %v2418_v29  ;;  %2386 = vmatmul.msk.f32.vlgmr.msrb.gmra.mxu1 %vm196_vm1, %v113_v34  ;;  %v3373_v29 = vld.sshfl [vmem:[#allocation1 + $0x8] sm:$0xff pattern:$0x75316420] }
  0xad   :  { %415 = vmatpush.msra.mxu1 %v2440_v35  ;;  %v2463_v34 = vld [vmem:[%s4615_s1 + $0x408] sm:$0xff]  ;;  %v2482_v35 = vld [vmem:[%s4615_s1 + $0x4a0] sm:$0xff] }
  0xae   :  { %322 = vmatpush.msra.mxu3 %v2417_v32  ;;  %v2464_v32 = vld [vmem:[%s4615_s1 + $0x410] sm:$0xff] }
  0xaf   :  { %416 = vmatpush.msra.mxu1 %v2439_v37  ;;  %v2481_v37 = vld [vmem:[%s4615_s1 + $0x498] sm:$0xff] }
  0xb0   :  { %323 = vmatpush.msra.mxu3 %v2416_v36  ;;  %v2462_v36 = vld [vmem:[%s4615_s1 + $0x400] sm:$0xff] }
  0xb1   :  { %2384 = vmatmul.msk.f32.gmra.mxu3 %vm196_vm1, %v2381_v39  ;;  %417 = vmatpush.msra.mxu1 %v2438_v40  ;;  %v2480_v40 = vld [vmem:[%s4615_s1 + $0x490] sm:$0xff] }
  0xb2   :  { %324 = vmatpush.msra.mxu3 %v2415_v38 }
  0xb3   :  { %418 = vmatpush.msra.mxu1 %v2437_v42 }
  0xb4   :  { %325 = vmatpush.msra.mxu3 %v2414_v41  ;;  %2387 = vmatmul.msk.f32.gmra.mxu1 %vm196_vm1, %v114_v44  ;;  %v2479_v44 = vld [vmem:[%s4615_s1 + $0x488] sm:$0xff] }
  0xb5   :  { %419 = vmatpush.msra.mxu1 %v2436_v45  ;;  %v2456_v45 = vld [vmem:[%s4615_s1 + $0x3f8] sm:$0xff] }
  0xb6   :  { %326 = vmatpush.msra.mxu3 %v2413_v43  ;;  %v2420_v43 = vld [vmem:[%s4616_s2 + $0x20] sm:$0xff] }
  0xb7   :  { %420 = vmatpush.msra.mxu1 %v2435_v55  ;;  %v2449_v55 = vld [vmem:[%s4615_s1 + $0x3c0] sm:$0xff] }
  0xb8   :  { %327 = vmatpush.msra.mxu3 %v2412_v46  ;;  %v2478_v46 = vld [vmem:[%s4615_s1 + $0x480] sm:$0xff] }
  0xb9   :  { %421 = vmatpush.msra.mxu1 %v2434_v56  ;;  %v2448_v56 = vld [vmem:[%s4615_s1 + $0x3b8] sm:$0xff] }
  0xba   :  { %328 = vmatpush.msra.mxu3 %v2411_v47  ;;  %v2455_v47 = vld [vmem:[%s4615_s1 + $0x3f0] sm:$0xff] }
  0xbb   :  { %422 = vmatpush.msra.mxu1 %v2433_v57  ;;  %v2447_v57 = vld [vmem:[%s4615_s1 + $0x3b0] sm:$0xff] }
  0xbc   :  { %329 = vmatpush.msra.mxu3 %v2410_v48 }
  0xbd   :  { %423 = vmatpush.msra.mxu1 %v2432_v58  ;;  %v2446_v58 = vld [vmem:[%s4615_s1 + $0x3a8] sm:$0xff] }
  0xbe   :  { %330 = vmatpush.msra.mxu3 %v2409_v49  ;;  %v2454_v49 = vld [vmem:[%s4615_s1 + $0x3e8] sm:$0xff] }
  0xbf   :  { %424 = vmatpush.msra.mxu1 %v2431_v59  ;;  %v2445_v59 = vld [vmem:[%s4615_s1 + $0x3a0] sm:$0xff] }
  0xc0   :  { %331 = vmatpush.msra.mxu3 %v2408_v50  ;;  %v2453_v50 = vld [vmem:[%s4615_s1 + $0x3e0] sm:$0xff] }
  0xc1   :  { %425 = vmatpush.msra.mxu1 %v2430_v60  ;;  %v2444_v60 = vld [vmem:[%s4615_s1 + $0x398] sm:$0xff] }
  0xc2   :  { %332 = vmatpush.msra.mxu3 %v2407_v51  ;;  %v2421_v51 = vld [vmem:[%s4616_s2 + $0x28] sm:$0xff] }
  0xc3   :  { %426 = vmatpush.msra.mxu1 %v2429_v62  ;;  %v2442_v62 = vld [vmem:[%s4615_s1 + $0x388] sm:$0xff] }
  0xc4   :  { %333 = vmatpush.msra.mxu3 %v2406_v52  ;;  %v2452_v52 = vld [vmem:[%s4615_s1 + $0x3d8] sm:$0xff] }
  0xc5   :  { %427 = vmatpush.msra.mxu1 %v2428_v63  ;;  %v317_v38 = vpop.f32.mrf.mxu2  ;;  %v2441_v63 = vld [vmem:[%s4615_s1 + $0x380] sm:$0xff] }
  0xc6   :  { %334 = vmatpush.msra.mxu3 %v2405_v53  ;;  %v2451_v53 = vld [vmem:[%s4615_s1 + $0x3d0] sm:$0xff] }
  0xc7   :  { %428 = vmatpush.msra.mxu1 %v2427_v0 }
  0xc8   :  { %335 = vmatpush.msra.mxu3 %v2404_v54  ;;  %v2450_v54 = vld [vmem:[%s4615_s1 + $0x3c8] sm:$0xff] }
  0xc9   :  { %336 = vmatmul.f32.vlgmr.msra.gmra.mxu3 %v297_v28  ;;  %429 = vmatpush.msra.mxu1 %v2426_v3  ;;  %v411_v28 = vld.sshfl [vmem:[#allocation1] sm:$0xff pattern:$0x75316420] }
  0xca   :  { %530 = vmatpush.msrb.mxu3 %v2477_v61  ;;  %525 = vst [vmem:[#allocation1] ss:$2 sm:$0xff] %v3006_v22  ;;  %v2443_v61 = vld [vmem:[%s4615_s1 + $0x390] sm:$0xff] }
  0xcb   :  { %430 = vmatpush.msra.mxu1 %v2425_v7  ;;  %v2514_v7 = vld [vmem:[%s4615_s1 + $0x578] sm:$0xff] }
  0xcc   :  { %531 = vmatpush.msrb.mxu3 %v2476_v2  ;;  %431 = vmatmul.f32.vlgmr.msra.gmra.mxu1 %v411_v28  ;;  %v2529_v28 = vld [vmem:[%s4615_s1 + $0x5f0] sm:$0xff] }
  0xcd   :  { %550 = vmatpush.msrb.mxu1 %v2493_v9  ;;  %v2511_v9 = vld [vmem:[%s4615_s1 + $0x560] sm:$0xff] }
  0xce   :  { %532 = vmatpush.msrb.mxu3 %v2475_v5 }
  0xcf   :  { %551 = vmatpush.msrb.mxu1 %v2492_v11 }
  0xd0   :  { %533 = vmatpush.msrb.mxu3 %v2474_v8  ;;  %v2513_v8 = vld [vmem:[%s4615_s1 + $0x570] sm:$0xff] }
  0xd1   :  { %552 = vmatpush.msrb.mxu1 %v2491_v13  ;;  %v526_v39 = vld.sshfl [vmem:[#allocation1] sm:$0xff pattern:$0x75316420]  ;;  %v527_v48 = vld.sshfl [vmem:[#allocation1 + $0x8] sm:$0xff pattern:$0x75316420] }
  0xd2   :  { %534 = vmatpush.msrb.mxu3 %v2473_v10  ;;  %640 = vst [vmem:[#allocation1] ss:$2 sm:$0xff] %v3006_v22  ;;  %v2510_v10 = vld [vmem:[%s4615_s1 + $0x558] sm:$0xff]  ;;  %v2508_v13 = vld [vmem:[%s4615_s1 + $0x548] sm:$0xff] }
  0xd3   :  { %553 = vmatpush.msrb.mxu1 %v2490_v15  ;;  %v2506_v15 = vld [vmem:[%s4615_s1 + $0x538] sm:$0xff] }
  0xd4   :  { %535 = vmatpush.msrb.mxu3 %v2472_v12  ;;  %v2509_v12 = vld [vmem:[%s4615_s1 + $0x550] sm:$0xff] }
  0xd5   :  { %554 = vmatpush.msrb.mxu1 %v2489_v17 }
  0xd6   :  { %536 = vmatpush.msrb.mxu3 %v2471_v14  ;;  %v2507_v14 = vld [vmem:[%s4615_s1 + $0x540] sm:$0xff] }
  0xd7   :  { %555 = vmatpush.msrb.mxu1 %v2488_v19  ;;  %v2504_v19 = vld [vmem:[%s4615_s1 + $0x528] sm:$0xff] }
  0xd8   :  { %537 = vmatpush.msrb.mxu3 %v2470_v16  ;;  %v2505_v16 = vld [vmem:[%s4615_s1 + $0x530] sm:$0xff] }
  0xd9   :  { %556 = vmatpush.msrb.mxu1 %v2487_v21  ;;  %v2503_v21 = vld [vmem:[%s4615_s1 + $0x520] sm:$0xff] }
  0xda   :  { %538 = vmatpush.msrb.mxu3 %v2469_v18 }
  0xdb   :  { %557 = vmatpush.msrb.mxu1 %v2486_v24 }
  0xdc   :  { %539 = vmatpush.msrb.mxu3 %v2468_v20 }
  0xdd   :  { %558 = vmatpush.msrb.mxu1 %v2485_v26  ;;  %v2502_v26 = vld [vmem:[%s4615_s1 + $0x518] sm:$0xff] }
  0xde   :  { %540 = vmatpush.msrb.mxu3 %v2467_v23 }
  0xdf   :  { %559 = vmatpush.msrb.mxu1 %v2484_v31  ;;  %v642_v31 = vld.sshfl [vmem:[#allocation1 + $0x8] sm:$0xff pattern:$0x75316420] }
  0xe0   :  { %541 = vmatpush.msrb.mxu3 %v2466_v25  ;;  %v2457_v25 = vld [vmem:[%s4616_s2 + $0x30] sm:$0xff] }
  0xe1   :  { %560 = vmatpush.msrb.mxu1 %v2483_v33  ;;  %v2528_v33 = vld [vmem:[%s4615_s1 + $0x5e8] sm:$0xff] }
  0xe2   :  { %542 = vmatpush.msrb.mxu3 %v2465_v30  ;;  %v2500_v30 = vld [vmem:[%s4615_s1 + $0x508] sm:$0xff] }
  0xe3   :  { %561 = vmatpush.msrb.mxu1 %v2482_v35  ;;  %v2527_v35 = vld [vmem:[%s4615_s1 + $0x5e0] sm:$0xff] }
  0xe4   :  { %543 = vmatpush.msrb.mxu3 %v2464_v32  ;;  %v641_v32 = vld.sshfl [vmem:[#allocation1] sm:$0xff pattern:$0x75316420] }
  0xe5   :  { %562 = vmatpush.msrb.mxu1 %v2481_v37  ;;  %755 = vst [vmem:[#allocation1] ss:$2 sm:$0xff] %v3006_v22  ;;  %v2526_v37 = vld [vmem:[%s4615_s1 + $0x5d8] sm:$0xff] }
  0xe6   :  { %544 = vmatpush.msrb.mxu3 %v2463_v34  ;;  %v2499_v34 = vld [vmem:[%s4615_s1 + $0x500] sm:$0xff] }
  0xe7   :  { %563 = vmatpush.msrb.mxu1 %v2480_v40  ;;  %v2523_v40 = vld [vmem:[%s4615_s1 + $0x5c0] sm:$0xff] }
  0xe8   :  { %545 = vmatpush.msrb.mxu3 %v2462_v36  ;;  %v2458_v36 = vld [vmem:[%s4616_s2 + $0x38] sm:$0xff] }
  0xe9   :  { %546 = vmatmul.f32.vlgmr.msrb.gmra.mxu3 %v526_v39  ;;  %564 = vmatpush.msrb.mxu1 %v2479_v44  ;;  %v2524_v39 = vld [vmem:[%s4615_s1 + $0x5c8] sm:$0xff] }
  0xea   :  { %v2520_v44 = vld [vmem:[%s4615_s1 + $0x5a8] sm:$0xff] }
  0xeb   :  { %565 = vmatpush.msrb.mxu1 %v2478_v46  ;;  %v2495_v46 = vld [vmem:[%s4616_s2 + $0x48] sm:$0xff] }
  0xec   :  { %566 = vmatmul.f32.vlgmr.msrb.gmra.mxu1 %v527_v48  ;;  %v2517_v48 = vld [vmem:[%s4615_s1 + $0x590] sm:$0xff] }
 0x129   :  { %v256_v1 = vpop.f32.mrf.mxu1 }
 0x12c   :  { %v224_v4 = vpop.f32.mrf.mxu3 }
 0x12d   :  { %v3312_v6 = vadd.f32 %v256_v1, %v224_v4 }
 0x131   :  { %v259_v2 = vpop.f32.mrf.mxu1 }
 0x134   :  { %v3371_v27 = vpop.f32.mrf.mxu3 }
 0x135   :  { %v260_v3 = vadd.f32 %v259_v2, %v3371_v27  ;;  %v2530_v27 = vld [vmem:[%s4615_s1 + $0x5f8] sm:$0xff] }
 0x149   :  { %v432_v11 = vpop.f32.mrf.mxu1 }
 0x14c   :  { %v337_v41 = vpop.f32.mrf.mxu3 }
 0x14d   :  { %v338_v42 = vadd.f32 %v337_v41, %v317_v38  ;;  %v2525_v38 = vld [vmem:[%s4615_s1 + $0x5d0] sm:$0xff]  ;;  %v2494_v41 = vld [vmem:[%s4616_s2 + $0x40] sm:$0xff] }
 0x14f   :  { %2422 = vmatpush.msk.msrb.mxu0 %vm203_vm0, %v338_v42  ;;  %v2522_v42 = vld [vmem:[%s4615_s1 + $0x5b8] sm:$0xff] }
 0x150   :  { %2423 = vmatmul.msk.f32.vlgmr.msrb.gmra.mxu0 %vm196_vm1, %v2420_v43  ;;  %v2521_v43 = vld [vmem:[%s4615_s1 + $0x5b0] sm:$0xff] }
 0x151   :  { %435 = vmatpush.msra.mxu0 %v2456_v45  ;;  %v2519_v45 = vld [vmem:[%s4615_s1 + $0x5a0] sm:$0xff] }
 0x153   :  { %436 = vmatpush.msra.mxu0 %v2455_v47  ;;  %v2518_v47 = vld [vmem:[%s4615_s1 + $0x598] sm:$0xff] }
 0x155   :  { %437 = vmatpush.msra.mxu0 %v2454_v49  ;;  %v2516_v49 = vld [vmem:[%s4615_s1 + $0x588] sm:$0xff] }
 0x157   :  { %438 = vmatpush.msra.mxu0 %v2453_v50  ;;  %v2515_v50 = vld [vmem:[%s4615_s1 + $0x580] sm:$0xff] }
 0x158   :  { %2424 = vmatmul.msk.f32.gmra.mxu0 %vm196_vm1, %v2421_v51 }
 0x159   :  { %439 = vmatpush.msra.mxu0 %v2452_v52 }
 0x15b   :  { %440 = vmatpush.msra.mxu0 %v2451_v53 }
 0x15d   :  { %441 = vmatpush.msra.mxu0 %v2450_v54 }
 0x15f   :  { %442 = vmatpush.msra.mxu0 %v2449_v55  ;;  %v2551_v55 = vld [vmem:[%s4615_s1 + $0x678] sm:$0xff] }
 0x160   :  { %760 = vmatpush.msra.mxu1 %v2551_v55 }
 0x161   :  { %443 = vmatpush.msra.mxu0 %v2448_v56  ;;  %v2550_v56 = vld [vmem:[%s4615_s1 + $0x670] sm:$0xff] }
 0x162   :  { %761 = vmatpush.msra.mxu1 %v2550_v56 }
 0x163   :  { %444 = vmatpush.msra.mxu0 %v2447_v57  ;;  %v2549_v57 = vld [vmem:[%s4615_s1 + $0x668] sm:$0xff] }
 0x164   :  { %762 = vmatpush.msra.mxu1 %v2549_v57 }
 0x165   :  { %445 = vmatpush.msra.mxu0 %v2446_v58  ;;  %v2548_v58 = vld [vmem:[%s4615_s1 + $0x660] sm:$0xff] }
 0x166   :  { %763 = vmatpush.msra.mxu1 %v2548_v58 }
 0x167   :  { %446 = vmatpush.msra.mxu0 %v2445_v59 }
 0x169   :  { %447 = vmatpush.msra.mxu0 %v2444_v60  ;;  %v567_v18 = vpop.f32.mrf.mxu1 }
 0x16b   :  { %448 = vmatpush.msra.mxu0 %v2443_v61  ;;  %v2547_v61 = vld [vmem:[%s4615_s1 + $0x658] sm:$0xff] }
 0x16c   :  { %v547_v17 = vpop.f32.mrf.mxu3  ;;  %764 = vmatpush.msra.mxu1 %v2547_v61 }
 0x16d   :  { %449 = vmatpush.msra.mxu0 %v2442_v62  ;;  %v568_v24 = vadd.f32 %v567_v18, %v547_v17  ;;  %v2546_v62 = vld [vmem:[%s4615_s1 + $0x650] sm:$0xff]  ;;  %v756_v17 = vld.sshfl [vmem:[#allocation1] sm:$0xff pattern:$0x75316420]  ;;  %v2565_v18 = vld [vmem:[%s4615_s1 + $0x6e8] sm:$0xff] }
 0x16e   :  { %765 = vmatpush.msra.mxu1 %v2546_v62  ;;  %v2603_v62 = vld [vmem:[%s4615_s1 + $0x7f0] sm:$0xff] }
 0x16f   :  { %450 = vmatpush.msra.mxu0 %v2441_v63  ;;  %v2545_v63 = vld [vmem:[%s4615_s1 + $0x648] sm:$0xff] }
 0x170   :  { %451 = vmatmul.f32.vlgmr.msra.gmra.mxu0 %v3373_v29  ;;  %v2501_v29 = vld [vmem:[%s4615_s1 + $0x510] sm:$0xff]  ;;  %766 = vmatpush.msra.mxu1 %v2545_v63  ;;  %v2602_v63 = vld [vmem:[%s4615_s1 + $0x7e8] sm:$0xff] }
 0x171   :  { %645 = vmatpush.msrb.mxu0 %v2514_v7 }
 0x173   :  { %646 = vmatpush.msrb.mxu0 %v2513_v8  ;;  %v2540_v8 = vld [vmem:[%s4615_s1 + $0x620] sm:$0xff] }
 0x1cd   :  { %v369_v0 = vpop.f32.mrf.mxu0 }
 0x1ce   :  { %v3469_v1 = vadd.f32 %v369_v0, %v3312_v6  ;;  %v2512_v6 = vld [vmem:[%s4615_s1 + $0x568] sm:$0xff]  ;;  %v2544_v0 = vld [vmem:[%s4615_s1 + $0x640] sm:$0xff] }
 0x1cf   :  { %647 = vmatpush.msrb.mxu0 %v2512_v6  ;;  %767 = vmatpush.msra.mxu1 %v2544_v0  ;;  %v2601_v0 = vld [vmem:[%s4615_s1 + $0x7e0] sm:$0xff] }
 0x1d1   :  { %648 = vmatpush.msrb.mxu0 %v2511_v9 }
 0x1d3   :  { %649 = vmatpush.msrb.mxu0 %v2510_v10  ;;  %v2531_v10 = vld [vmem:[%s4616_s2 + $0x50] sm:$0xff] }
 0x1d5   :  { %v372_v4 = vpop.f32.mrf.mxu0  ;;  %650 = vmatpush.msrb.mxu0 %v2509_v12  ;;  %v2567_v12 = vld [vmem:[%s4615_s1 + $0x6f8] sm:$0xff] }
 0x1d6   :  { %v3472_v5 = vadd.f32 %v372_v4, %v260_v3  ;;  %v2543_v3 = vld [vmem:[%s4615_s1 + $0x638] sm:$0xff]  ;;  %v2542_v4 = vld [vmem:[%s4615_s1 + $0x630] sm:$0xff] }
 0x1d7   :  { %651 = vmatpush.msrb.mxu0 %v2508_v13  ;;  %768 = vmatpush.msra.mxu1 %v2543_v3  ;;  %v2566_v13 = vld [vmem:[%s4615_s1 + $0x6f0] sm:$0xff]  ;;  %v2598_v3 = vld [vmem:[%s4615_s1 + $0x7c8] sm:$0xff] }
 0x1d9   :  { %652 = vmatpush.msrb.mxu0 %v2507_v14  ;;  %769 = vmatpush.msra.mxu1 %v2542_v4  ;;  %v2538_v14 = vld [vmem:[%s4615_s1 + $0x610] sm:$0xff]  ;;  %v2597_v4 = vld [vmem:[%s4615_s1 + $0x7c0] sm:$0xff] }
 0x1db   :  { %653 = vmatpush.msrb.mxu0 %v2506_v15  ;;  %v2537_v15 = vld [vmem:[%s4615_s1 + $0x608] sm:$0xff] }
 0x1dd   :  { %654 = vmatpush.msrb.mxu0 %v2505_v16  ;;  %v757_v16 = vld.sshfl [vmem:[#allocation1 + $0x8] sm:$0xff pattern:$0x75316420] }
 0x1de   :  { %870 = vst [vmem:[#allocation1] ss:$2 sm:$0xff] %v3006_v22 }
 0x1df   :  { %655 = vmatpush.msrb.mxu0 %v2504_v19  ;;  %v2536_v19 = vld [vmem:[%s4615_s1 + $0x600] sm:$0xff] }
 0x1e1   :  { %656 = vmatpush.msrb.mxu0 %v2503_v21  ;;  %v2532_v21 = vld [vmem:[%s4616_s2 + $0x58] sm:$0xff] }
 0x1e3   :  { %657 = vmatpush.msrb.mxu0 %v2502_v26  ;;  %v2560_v26 = vld [vmem:[%s4615_s1 + $0x6c0] sm:$0xff] }
 0x1e5   :  { %658 = vmatpush.msrb.mxu0 %v2501_v29  ;;  %v2557_v29 = vld [vmem:[%s4615_s1 + $0x6a8] sm:$0xff]  ;;  %v871_v55 = vld.sshfl [vmem:[#allocation1] sm:$0xff pattern:$0x75316420] }
 0x1e6   :  { %v872_v61 = vld.sshfl [vmem:[#allocation1 + $0x8] sm:$0xff pattern:$0x75316420] }
 0x1e7   :  { %659 = vmatpush.msrb.mxu0 %v2500_v30  ;;  %v2556_v30 = vld [vmem:[%s4615_s1 + $0x6a0] sm:$0xff]  ;;  %985 = vst [vmem:[#allocation1] ss:$2 sm:$0xff] %v3006_v22  ;;  %v2599_v22 = vld [vmem:[%s4615_s1 + $0x7d0] sm:$0xff] }
 0x1e9   :  { %660 = vmatpush.msrb.mxu0 %v2499_v34  ;;  %v2552_v34 = vld [vmem:[%s4615_s1 + $0x680] sm:$0xff] }
 0x1ea   :  { %661 = vmatmul.f32.vlgmr.msrb.gmra.mxu0 %v641_v32  ;;  %v2554_v32 = vld [vmem:[%s4615_s1 + $0x690] sm:$0xff] }
 0x1ed   :  { %v452_v20 = vpop.f32.mrf.mxu0 }
 0x1ee   :  { %v453_v23 = vadd.f32 %v452_v20, %v432_v11  ;;  %v2539_v11 = vld [vmem:[%s4615_s1 + $0x618] sm:$0xff]  ;;  %v2564_v20 = vld [vmem:[%s4615_s1 + $0x6e0] sm:$0xff] }
 0x1f0   :  { %2459 = vmatpush.msk.msra.mxu2 %vm203_vm0, %v453_v23  ;;  %v2563_v23 = vld [vmem:[%s4615_s1 + $0x6d8] sm:$0xff] }
 0x1f1   :  { %2460 = vmatmul.msk.f32.vlgmr.msra.gmra.mxu2 %vm196_vm1, %v2457_v25  ;;  %v2561_v25 = vld [vmem:[%s4615_s1 + $0x6c8] sm:$0xff] }
 0x1f2   :  { %2496 = vmatpush.msk.msrb.mxu2 %vm203_vm0, %v568_v24  ;;  %v2562_v24 = vld [vmem:[%s4615_s1 + $0x6d0] sm:$0xff] }
 0x1f4   :  { %665 = vmatpush.msra.mxu2 %v2530_v27  ;;  %v2559_v27 = vld [vmem:[%s4615_s1 + $0x6b8] sm:$0xff] }
 0x1f6   :  { %666 = vmatpush.msra.mxu2 %v2529_v28  ;;  %v2558_v28 = vld [vmem:[%s4615_s1 + $0x6b0] sm:$0xff] }
 0x1f8   :  { %667 = vmatpush.msra.mxu2 %v2528_v33  ;;  %v2553_v33 = vld [vmem:[%s4615_s1 + $0x688] sm:$0xff] }
 0x1f9   :  { %2461 = vmatmul.msk.f32.gmra.mxu2 %vm196_vm1, %v2458_v36  ;;  %v2587_v36 = vld [vmem:[%s4615_s1 + $0x770] sm:$0xff] }
 0x1fa   :  { %668 = vmatpush.msra.mxu2 %v2527_v35  ;;  %v2588_v35 = vld [vmem:[%s4615_s1 + $0x778] sm:$0xff] }
 0x1fc   :  { %669 = vmatpush.msra.mxu2 %v2526_v37 }
 0x1fe   :  { %670 = vmatpush.msra.mxu2 %v2525_v38 }
 0x200   :  { %671 = vmatpush.msra.mxu2 %v2524_v39  ;;  %v2586_v39 = vld [vmem:[%s4615_s1 + $0x768] sm:$0xff] }
 0x201   :  { %2497 = vmatmul.msk.f32.vlgmr.msrb.gmra.mxu2 %vm196_vm1, %v2494_v41  ;;  %v2584_v41 = vld [vmem:[%s4615_s1 + $0x758] sm:$0xff] }
 0x202   :  { %672 = vmatpush.msra.mxu2 %v2523_v40  ;;  %v2585_v40 = vld [vmem:[%s4615_s1 + $0x760] sm:$0xff] }
 0x204   :  { %673 = vmatpush.msra.mxu2 %v2522_v42  ;;  %v2583_v42 = vld [vmem:[%s4615_s1 + $0x750] sm:$0xff] }
 0x206   :  { %674 = vmatpush.msra.mxu2 %v2521_v43 }
 0x208   :  { %675 = vmatpush.msra.mxu2 %v2520_v44 }
 0x209   :  { %2498 = vmatmul.msk.f32.gmra.mxu2 %vm196_vm1, %v2495_v46  ;;  %v2581_v46 = vld [vmem:[%s4615_s1 + $0x740] sm:$0xff] }
 0x20a   :  { %676 = vmatpush.msra.mxu2 %v2519_v45  ;;  %v2582_v45 = vld [vmem:[%s4615_s1 + $0x748] sm:$0xff] }
 0x20c   :  { %677 = vmatpush.msra.mxu2 %v2518_v47  ;;  %v2580_v47 = vld [vmem:[%s4615_s1 + $0x738] sm:$0xff] }
 0x20e   :  { %678 = vmatpush.msra.mxu2 %v2517_v48  ;;  %v2579_v48 = vld [vmem:[%s4615_s1 + $0x730] sm:$0xff] }
 0x210   :  { %679 = vmatpush.msra.mxu2 %v2516_v49  ;;  %v2578_v49 = vld [vmem:[%s4615_s1 + $0x728] sm:$0xff] }
 0x212   :  { %680 = vmatpush.msra.mxu2 %v2515_v50  ;;  %v2577_v50 = vld [vmem:[%s4615_s1 + $0x720] sm:$0xff] }
 0x213   :  { %681 = vmatmul.f32.vlgmr.msra.gmra.mxu2 %v642_v31  ;;  %v2555_v31 = vld [vmem:[%s4615_s1 + $0x698] sm:$0xff] }
 0x214   :  { %875 = vmatpush.msrb.mxu2 %v2588_v35 }
 0x216   :  { %876 = vmatpush.msrb.mxu2 %v2587_v36 }
 0x218   :  { %877 = vmatpush.msrb.mxu2 %v2586_v39  ;;  %v2641_v39 = vld [vmem:[%s4615_s1 + $0x8f8] sm:$0xff] }
 0x21a   :  { %878 = vmatpush.msrb.mxu2 %v2585_v40  ;;  %v2640_v40 = vld [vmem:[%s4615_s1 + $0x8f0] sm:$0xff] }
 0x21c   :  { %879 = vmatpush.msrb.mxu2 %v2584_v41  ;;  %v2639_v41 = vld [vmem:[%s4615_s1 + $0x8e8] sm:$0xff] }
 0x21e   :  { %880 = vmatpush.msrb.mxu2 %v2583_v42  ;;  %v2638_v42 = vld [vmem:[%s4615_s1 + $0x8e0] sm:$0xff] }
 0x220   :  { %881 = vmatpush.msrb.mxu2 %v2582_v45  ;;  %v2636_v45 = vld [vmem:[%s4615_s1 + $0x8d0] sm:$0xff] }
 0x222   :  { %882 = vmatpush.msrb.mxu2 %v2581_v46  ;;  %v2635_v46 = vld [vmem:[%s4615_s1 + $0x8c8] sm:$0xff] }
 0x224   :  { %883 = vmatpush.msrb.mxu2 %v2580_v47  ;;  %v2634_v47 = vld [vmem:[%s4615_s1 + $0x8c0] sm:$0xff] }
 0x226   :  { %884 = vmatpush.msrb.mxu2 %v2579_v48  ;;  %v2633_v48 = vld [vmem:[%s4615_s1 + $0x8b8] sm:$0xff] }
 0x228   :  { %885 = vmatpush.msrb.mxu2 %v2578_v49  ;;  %v2632_v49 = vld [vmem:[%s4615_s1 + $0x8b0] sm:$0xff] }
 0x22a   :  { %886 = vmatpush.msrb.mxu2 %v2577_v50  ;;  %v2631_v50 = vld [vmem:[%s4615_s1 + $0x8a8] sm:$0xff] }
 0x267   :  { %v662_v7 = vpop.f32.mrf.mxu0 }
 0x274   :  { %v484_v51 = vpop.f32.mrf.mxu2 }
 0x275   :  { %v490_v52 = vadd.f32 %v484_v51, %v3469_v1  ;;  %v2576_v51 = vld [vmem:[%s4615_s1 + $0x718] sm:$0xff] }
 0x276   :  { %887 = vmatpush.msrb.mxu2 %v2576_v51  ;;  %v2630_v51 = vld [vmem:[%s4615_s1 + $0x8a0] sm:$0xff] }
 0x27c   :  { %v487_v53 = vpop.f32.mrf.mxu2 }
 0x27d   :  { %v491_v54 = vadd.f32 %v487_v53, %v3472_v5  ;;  %v2541_v5 = vld [vmem:[%s4615_s1 + $0x628] sm:$0xff] }
 0x27e   :  { %770 = vmatpush.msra.mxu1 %v2541_v5  ;;  %v2574_v53 = vld [vmem:[%s4615_s1 + $0x708] sm:$0xff]  ;;  %v2596_v5 = vld [vmem:[%s4615_s1 + $0x7b8] sm:$0xff] }
 0x280   :  { %771 = vmatpush.msra.mxu1 %v2540_v8  ;;  %v2594_v8 = vld [vmem:[%s4615_s1 + $0x7a8] sm:$0xff] }
 0x282   :  { %772 = vmatpush.msra.mxu1 %v2539_v11  ;;  %v2590_v11 = vld [vmem:[%s4615_s1 + $0x788] sm:$0xff] }
 0x284   :  { %v599_v59 = vpop.f32.mrf.mxu2  ;;  %773 = vmatpush.msra.mxu1 %v2538_v14  ;;  %v2624_v14 = vld [vmem:[%s4615_s1 + $0x870] sm:$0xff] }
 0x285   :  { %v3603_v60 = vadd.f32 %v599_v59, %v490_v52  ;;  %v2575_v52 = vld [vmem:[%s4615_s1 + $0x710] sm:$0xff]  ;;  %v2568_v59 = vld [vmem:[%s4616_s2 + $0x60] sm:$0xff] }
 0x286   :  { %774 = vmatpush.msra.mxu1 %v2537_v15  ;;  %888 = vmatpush.msrb.mxu2 %v2575_v52  ;;  %v2629_v52 = vld [vmem:[%s4615_s1 + $0x898] sm:$0xff] }
 0x288   :  { %775 = vmatpush.msra.mxu1 %v2536_v19  ;;  %889 = vmatpush.msrb.mxu2 %v2574_v53  ;;  %v2621_v19 = vld [vmem:[%s4615_s1 + $0x858] sm:$0xff]  ;;  %v2628_v53 = vld [vmem:[%s4615_s1 + $0x890] sm:$0xff] }
 0x289   :  { %776 = vmatmul.f32.vlgmr.msra.gmra.mxu1 %v756_v17  ;;  %v2623_v17 = vld [vmem:[%s4615_s1 + $0x868] sm:$0xff] }
 0x28c   :  { %v602_v1 = vpop.f32.mrf.mxu2 }
 0x28d   :  { %v3617_v2 = vadd.f32 %v602_v1, %v491_v54  ;;  %v2573_v54 = vld [vmem:[%s4615_s1 + $0x700] sm:$0xff]  ;;  %v2569_v1 = vld [vmem:[%s4616_s2 + $0x68] sm:$0xff] }
 0x28e   :  { %890 = vmatpush.msrb.mxu2 %v2573_v54  ;;  %v2627_v54 = vld [vmem:[%s4615_s1 + $0x888] sm:$0xff] }
 0x28f   :  { %891 = vmatmul.f32.vlgmr.msrb.gmra.mxu2 %v871_v55  ;;  %v2626_v55 = vld [vmem:[%s4615_s1 + $0x880] sm:$0xff] }
 0x296   :  { %v682_v6 = vpop.f32.mrf.mxu2 }
 0x297   :  { %v683_v9 = vadd.f32 %v682_v6, %v662_v7  ;;  %v2595_v7 = vld [vmem:[%s4615_s1 + $0x7b0] sm:$0xff]  ;;  %v2593_v6 = vld [vmem:[%s4615_s1 + $0x7a0] sm:$0xff] }
 0x299   :  { %2533 = vmatpush.msk.msra.mxu3 %vm203_vm0, %v683_v9  ;;  %v2592_v9 = vld [vmem:[%s4615_s1 + $0x798] sm:$0xff] }
 0x29a   :  { %2534 = vmatmul.msk.f32.vlgmr.msra.gmra.mxu3 %vm196_vm1, %v2531_v10  ;;  %v2591_v10 = vld [vmem:[%s4615_s1 + $0x790] sm:$0xff] }
 0x29b   :  { %780 = vmatpush.msrb.mxu3 %v2567_v12  ;;  %v2589_v12 = vld [vmem:[%s4615_s1 + $0x780] sm:$0xff] }
 0x29d   :  { %781 = vmatpush.msrb.mxu3 %v2566_v13  ;;  %v2625_v13 = vld [vmem:[%s4615_s1 + $0x878] sm:$0xff] }
 0x29f   :  { %782 = vmatpush.msrb.mxu3 %v2565_v18  ;;  %v2622_v18 = vld [vmem:[%s4615_s1 + $0x860] sm:$0xff] }
 0x2a1   :  { %783 = vmatpush.msrb.mxu3 %v2564_v20  ;;  %v2620_v20 = vld [vmem:[%s4615_s1 + $0x850] sm:$0xff] }
 0x2a2   :  { %2535 = vmatmul.msk.f32.gmra.mxu3 %vm196_vm1, %v2532_v21 }
 0x2a3   :  { %784 = vmatpush.msrb.mxu3 %v2563_v23 }
 0x2a5   :  { %785 = vmatpush.msrb.mxu3 %v2562_v24  ;;  %v2619_v24 = vld [vmem:[%s4615_s1 + $0x848] sm:$0xff] }
 0x2a7   :  { %786 = vmatpush.msrb.mxu3 %v2561_v25  ;;  %v2618_v25 = vld [vmem:[%s4615_s1 + $0x840] sm:$0xff] }
 0x2a9   :  { %787 = vmatpush.msrb.mxu3 %v2560_v26  ;;  %v2617_v26 = vld [vmem:[%s4615_s1 + $0x838] sm:$0xff] }
 0x2ab   :  { %788 = vmatpush.msrb.mxu3 %v2559_v27  ;;  %v2616_v27 = vld [vmem:[%s4615_s1 + $0x830] sm:$0xff] }
 0x2ad   :  { %789 = vmatpush.msrb.mxu3 %v2558_v28  ;;  %v2615_v28 = vld [vmem:[%s4615_s1 + $0x828] sm:$0xff] }
 0x2af   :  { %790 = vmatpush.msrb.mxu3 %v2557_v29  ;;  %v2614_v29 = vld [vmem:[%s4615_s1 + $0x820] sm:$0xff] }
 0x2b1   :  { %791 = vmatpush.msrb.mxu3 %v2556_v30  ;;  %v2613_v30 = vld [vmem:[%s4615_s1 + $0x818] sm:$0xff] }
 0x2b3   :  { %792 = vmatpush.msrb.mxu3 %v2555_v31  ;;  %v2612_v31 = vld [vmem:[%s4615_s1 + $0x810] sm:$0xff] }
 0x2b5   :  { %793 = vmatpush.msrb.mxu3 %v2554_v32  ;;  %v2611_v32 = vld [vmem:[%s4615_s1 + $0x808] sm:$0xff] }
 0x2b7   :  { %794 = vmatpush.msrb.mxu3 %v2553_v33  ;;  %v2610_v33 = vld [vmem:[%s4615_s1 + $0x800] sm:$0xff] }
 0x2b9   :  { %795 = vmatpush.msrb.mxu3 %v2552_v34  ;;  %v986_v34 = vld.sshfl [vmem:[#allocation1] sm:$0xff pattern:$0x75316420] }
 0x2ba   :  { %796 = vmatmul.f32.vlgmr.msrb.gmra.mxu3 %v757_v16 }
 0x2bb   :  { %990 = vmatpush.msra.mxu3 %v2625_v13 }
 0x2bd   :  { %991 = vmatpush.msra.mxu3 %v2624_v14 }
 0x2bf   :  { %992 = vmatpush.msra.mxu3 %v2623_v17 }
 0x2c1   :  { %993 = vmatpush.msra.mxu3 %v2622_v18 }
 0x2c3   :  { %994 = vmatpush.msra.mxu3 %v2621_v19  ;;  %v2886_v19 = vmov 0  }
 0x2c4   :  { %2833 = vset.pattern.permute.xlu2 %v2886_v19  ;;  %2835 = vset.pattern.permute.xlu0 %v2886_v19  ;;  %v2695_v19 = vld [vmem:[%s4617_s3 + $0xd0] sm:$0xff] }
 0x2c5   :  { %995 = vmatpush.msra.mxu3 %v2620_v20 }
 0x2c7   :  { %996 = vmatpush.msra.mxu3 %v2619_v24 }
 0x2c9   :  { %997 = vmatpush.msra.mxu3 %v2618_v25 }
 0x2cb   :  { %998 = vmatpush.msra.mxu3 %v2617_v26 }
 0x2cd   :  { %999 = vmatpush.msra.mxu3 %v2616_v27 }
 0x2cf   :  { %1000 = vmatpush.msra.mxu3 %v2615_v28 }
 0x2d1   :  { %1001 = vmatpush.msra.mxu3 %v2614_v29  ;;  %v3958_v29 = vld [vmem:[%s4619_s5 + $0x8] sm:$0xff] }
 0x2d3   :  { %1002 = vmatpush.msra.mxu3 %v2613_v30  ;;  %v2887_v30 = vmov 1  }
 0x2d4   :  { %2836 = vset.pattern.permute.xlu1 %v2887_v30 }
 0x2d5   :  { %1003 = vmatpush.msra.mxu3 %v2612_v31 }
 0x2d7   :  { %1004 = vmatpush.msra.mxu3 %v2611_v32 }
 0x2d9   :  { %1005 = vmatpush.msra.mxu3 %v2610_v33 }
 0x2da   :  { %1006 = vmatmul.f32.vlgmr.msra.gmra.mxu3 %v986_v34 }
 0x306   :  { %v777_v56 = vpop.f32.mrf.mxu1 }
 0x312   :  { %v892_v35 = vpop.f32.mrf.mxu2 }
 0x31d   :  { %v714_v37 = vpop.f32.mrf.mxu3 }
 0x31e   :  { %v3708_v38 = vadd.f32 %v714_v37, %v3603_v60  ;;  %v2604_v60 = vld [vmem:[%s4615_s1 + $0x7f8] sm:$0xff] }
 0x325   :  { %v717_v43 = vpop.f32.mrf.mxu3 }
 0x326   :  { %v3723_v44 = vadd.f32 %v717_v43, %v3617_v2  ;;  %v2600_v2 = vld [vmem:[%s4615_s1 + $0x7d8] sm:$0xff] }
 0x327   :  { %v2606_v43 = vld [vmem:[%s4616_s2 + $0x78] sm:$0xff] }
 0x33d   :  { %v797_v57 = vpop.f32.mrf.mxu3 }
 0x33e   :  { %v798_v58 = vadd.f32 %v797_v57, %v777_v56  ;;  %v987_v56 = vld.sshfl [vmem:[#allocation1 + $0x8] sm:$0xff pattern:$0x75316420] }
 0x340   :  { %2570 = vmatpush.msk.msra.mxu0 %vm203_vm0, %v798_v58 }
 0x341   :  { %2571 = vmatmul.msk.f32.vlgmr.msra.gmra.mxu0 %vm196_vm1, %v2568_v59 }
 0x342   :  { %895 = vmatpush.msrb.mxu0 %v2604_v60 }
 0x344   :  { %896 = vmatpush.msrb.mxu0 %v2603_v62 }
 0x346   :  { %897 = vmatpush.msrb.mxu0 %v2602_v63 }
 0x348   :  { %898 = vmatpush.msrb.mxu0 %v2601_v0  ;;  %v2642_v0 = vld [vmem:[%s4616_s2 + $0x80] sm:$0xff] }
 0x349   :  { %2572 = vmatmul.msk.f32.gmra.mxu0 %vm196_vm1, %v2569_v1  ;;  %v2643_v1 = vld [vmem:[%s4616_s2 + $0x88] sm:$0xff] }
 0x34a   :  { %899 = vmatpush.msrb.mxu0 %v2600_v2 }
 0x34c   :  { %900 = vmatpush.msrb.mxu0 %v2599_v22 }
 0x34e   :  { %901 = vmatpush.msrb.mxu0 %v2598_v3 }
 0x350   :  { %902 = vmatpush.msrb.mxu0 %v2597_v4 }
 0x352   :  { %903 = vmatpush.msrb.mxu0 %v2596_v5 }
 0x354   :  { %904 = vmatpush.msrb.mxu0 %v2595_v7 }
 0x356   :  { %905 = vmatpush.msrb.mxu0 %v2594_v8 }
 0x358   :  { %906 = vmatpush.msrb.mxu0 %v2593_v6 }
 0x35a   :  { %907 = vmatpush.msrb.mxu0 %v2592_v9 }
 0x35c   :  { %908 = vmatpush.msrb.mxu0 %v2591_v10 }
 0x35e   :  { %909 = vmatpush.msrb.mxu0 %v2590_v11  ;;  %v2885_v11 = vmov 49.0  }
 0x35f   :  { %2843 = vrcp.f32 %v2885_v11  ;;  %v2675_v11 = vld [vmem:[%s4617_s3 + $0x88] sm:$0xff] }
 0x360   :  { %910 = vmatpush.msrb.mxu0 %v2589_v12 }
 0x361   :  { %911 = vmatmul.f32.vlgmr.msrb.gmra.mxu0 %v872_v61  ;;  %v1007_v61 = vpop.f32.mrf.mxu3 }
 0x365   :  { %v2844_v12 = vpop.eup %2843 }
 0x366   :  { %v1075_v13 = vmul.f32 49.0, %v2844_v12  ;;  %vm1079_vm3 = vweird.f32 %v2844_v12 }
 0x368   :  { %v1076_v14 = vsub.f32 1.0, %v1075_v13 }
 0x3be   :  { %v829_v15 = vpop.f32.mrf.mxu0 }
 0x3bf   :  { %v3820_v16 = vadd.f32 %v829_v15, %v3708_v38  ;;  %v2605_v38 = vld [vmem:[%s4616_s2 + $0x70] sm:$0xff]  ;;  %v1077_v15 = vmul.f32 %v2844_v12, %v1076_v14 }
 0x3c6   :  { %v832_v21 = vpop.f32.mrf.mxu0 }
 0x3c7   :  { %v3835_v23 = vadd.f32 %v832_v21, %v3723_v44  ;;  %v2637_v44 = vld [vmem:[%s4615_s1 + $0x8d8] sm:$0xff] }
 0x3de   :  { %v912_v36 = vpop.f32.mrf.mxu0 }
 0x3df   :  { %v913_v37 = vadd.f32 %v912_v36, %v892_v35 }
 0x3e1   :  { %2607 = vmatpush.msk.msrb.mxu1 %vm203_vm0, %v913_v37 }
 0x3e2   :  { %2608 = vmatmul.msk.f32.vlgmr.msrb.gmra.mxu1 %vm196_vm1, %v2605_v38 }
 0x3e3   :  { %1010 = vmatpush.msra.mxu1 %v2641_v39 }
 0x3e5   :  { %1011 = vmatpush.msra.mxu1 %v2640_v40 }
 0x3e7   :  { %1012 = vmatpush.msra.mxu1 %v2639_v41 }
 0x3e9   :  { %1013 = vmatpush.msra.mxu1 %v2638_v42 }
 0x3ea   :  { %2609 = vmatmul.msk.f32.gmra.mxu1 %vm196_vm1, %v2606_v43 }
 0x3eb   :  { %1014 = vmatpush.msra.mxu1 %v2637_v44 }
 0x3ed   :  { %1015 = vmatpush.msra.mxu1 %v2636_v45  ;;  %v3966_v45 = vld [vmem:[%s4619_s5] sm:$0xff] }
 0x3ef   :  { %1016 = vmatpush.msra.mxu1 %v2635_v46 }
 0x3f1   :  { %1017 = vmatpush.msra.mxu1 %v2634_v47 }
 0x3f3   :  { %1018 = vmatpush.msra.mxu1 %v2633_v48 }
 0x3f5   :  { %1019 = vmatpush.msra.mxu1 %v2632_v49 }
 0x3f7   :  { %1020 = vmatpush.msra.mxu1 %v2631_v50 }
 0x3f9   :  { %1021 = vmatpush.msra.mxu1 %v2630_v51 }
 0x3fb   :  { %1022 = vmatpush.msra.mxu1 %v2629_v52 }
 0x3fd   :  { %1023 = vmatpush.msra.mxu1 %v2628_v53 }
 0x3ff   :  { %1024 = vmatpush.msra.mxu1 %v2627_v54 }
 0x401   :  { %1025 = vmatpush.msra.mxu1 %v2626_v55  ;;  %v1157_v55 = vld [vmem:[%s4617_s3 + $0x30] sm:$0x1] }
 0x402   :  { %1026 = vmatmul.f32.vlgmr.msra.gmra.mxu1 %v987_v56  ;;  %v2656_v56 = vld [vmem:[%s4617_s3 + $0x68] sm:$0x1]  ;;  %2647 = vmatpush.msk.msra.mxu0 %vm1164_vm10, %v1157_v55  ;;  %v2662_v55 = vld [vmem:[%s4618_s4 + $0x30] sm:$0xff] }
 0x45f   :  { %v944_v57 = vpop.f32.mrf.mxu1 }
 0x460   :  { %v950_v58 = vadd.f32 %v944_v57, %v3820_v16  ;;  %v1078_v16 = vadd.f32 %v2844_v12, %v1077_v15  ;;  %v1156_v57 = vld [vmem:[%s4617_s3 + $0x28] sm:$0xff]  ;;  %v2673_v15 = vld [vmem:[%s4617_s3 + $0x78] sm:$0xff] }
 0x461   :  { %1178 = vmatpush.msra.mxu0 %v1156_v57  ;;  %v2729_v57 = vld [vmem:[%s4617_s3 + $0x130] sm:$0xff] }
 0x462   :  { %v1080_v18 = vsel %vm1079_vm3, %v2844_v12, %v1078_v16  ;;  %v2674_v12 = vld [vmem:[%s4617_s3 + $0x80] sm:$0xff] }
 0x467   :  { %v947_v59 = vpop.f32.mrf.mxu1 }
 0x468   :  { %v951_v60 = vadd.f32 %v947_v59, %v3835_v23  ;;  %v1155_v59 = vld [vmem:[%s4617_s3 + $0x20] sm:$0xff] }
 0x469   :  { %1179 = vmatpush.msra.mxu0 %v1155_v59  ;;  %v2683_v59 = vld [vmem:[%s4618_s4 + $0x48] sm:$0xff] }
 0x47f   :  { %v1027_v62 = vpop.f32.mrf.mxu1 }
 0x480   :  { %v1028_v63 = vadd.f32 %v1027_v62, %v1007_v61  ;;  %v1154_v61 = vld [vmem:[%s4617_s3 + $0x18] sm:$0xff]  ;;  %v2653_v62 = vld [vmem:[%s4617_s3 + $0x50] sm:$0xff] }
 0x481   :  { %1180 = vmatpush.msra.mxu0 %v1154_v61  ;;  %v2727_v61 = vld [vmem:[%s4617_s3 + $0x120] sm:$0xff] }
 0x482   :  { %2644 = vmatpush.msk.msra.mxu2 %vm203_vm0, %v1028_v63  ;;  %v1153_v63 = vld [vmem:[%s4617_s3 + $0x10] sm:$0xff] }
 0x483   :  { %2645 = vmatmul.msk.f32.vlgmr.msra.gmra.mxu2 %vm196_vm1, %v2642_v0  ;;  %v2652_v0 = vld [vmem:[%s4617_s3 + $0x48] sm:$0xff]  ;;  %1181 = vmatpush.msra.mxu0 %v1153_v63  ;;  %v2663_v63 = vld [vmem:[%s4618_s4 + $0x38] sm:$0xff] }
 0x484   :  { %2657 = vmatpush.msk.msrb.mxu2 %vm1164_vm10, %v2656_v56 }
 0x48b   :  { %2646 = vmatmul.msk.f32.gmra.mxu2 %vm196_vm1, %v2643_v1  ;;  %v1152_v1 = vld [vmem:[%s4617_s3 + $0x8] sm:$0xff] }
 0x48c   :  { %1182 = vmatpush.msra.mxu0 %v1152_v1 }
 0x506   :  { %v1059_v2 = vpop.f32.mrf.mxu2 }
 0x507   :  { %v3935_v22 = vadd.f32 %v1059_v2, %v950_v58  ;;  %v2655_v58 = vld [vmem:[%s4617_s3 + $0x60] sm:$0xff] }
 0x508   :  { %1216 = vmatpush.msrb.mxu2 %v2655_v58  ;;  %v2651_v2 = vld [vmem:[%s4617_s3 + $0x40] sm:$0xff]  ;;  %v1194_v58 = vld [vmem:[%s4618_s4 + $0x18] sm:$0xff] }
 0x509   :  { %v1068_v3 = vsel %vm1067_vm2, %v3935_v22, 0.0  ;;  %v1083_v4 = vmul.f32 %v3935_v22, %v3935_v22 }
 0x50a   :  { %1069 = vadd.xlane.f32.xlu0 %v1068_v3  ;;  %v1151_v3 = vld [vmem:[%s4617_s3] sm:$0xff] }
 0x50b   :  { %v1085_v6 = vsel %vm1067_vm2, %v1083_v4, 0.0  ;;  %v2650_v4 = vld [vmem:[%s4617_s3 + $0x38] sm:$0xff]  ;;  %1183 = vmatpush.msra.mxu0 %v1151_v3 }
 0x50c   :  { %v2749_v3 = vld [vmem:[%s4617_s3 + $0x178] sm:$0xff] }
 0x50e   :  { %v1062_v5 = vpop.f32.mrf.mxu2 }
 0x50f   :  { %v3941_v7 = vadd.f32 %v1062_v5, %v951_v60  ;;  %v2654_v60 = vld [vmem:[%s4617_s3 + $0x58] sm:$0xff] }
 0x510   :  { %1217 = vmatpush.msrb.mxu2 %v2654_v60  ;;  %v2728_v60 = vld [vmem:[%s4617_s3 + $0x128] sm:$0xff] }
 0x511   :  { %v1071_v8 = vsel %vm1067_vm2, %v3941_v7, 0.0  ;;  %v1084_v9 = vmul.f32 %v3941_v7, %v3941_v7 }
 0x512   :  { %1072 = vadd.xlane.f32.xlu1 %v1071_v8  ;;  %1086 = vadd.xlane.f32.xlu0 %v1085_v6  ;;  %v2678_v8 = vld [vmem:[%s4617_s3 + $0xa0] sm:$0x1]  ;;  %v2677_v6 = vld [vmem:[%s4617_s3 + $0x98] sm:$0xff] }
 0x513   :  { %v1088_v10 = vsel %vm1067_vm2, %v1084_v9, 0.0  ;;  %1218 = vmatpush.msrb.mxu2 %v2653_v62  ;;  %2679 = vmatpush.msk.msrb.mxu0 %vm1164_vm10, %v2678_v8  ;;  %v2676_v9 = vld [vmem:[%s4617_s3 + $0x90] sm:$0xff]  ;;  %v2726_v62 = vld [vmem:[%s4617_s3 + $0x118] sm:$0xff]  ;;  %v2700_v8 = vld [vmem:[%s4618_s4 + $0x60] sm:$0xff] }
 0x515   :  { %1219 = vmatpush.msrb.mxu2 %v2652_v0  ;;  %1338 = vmatpush.msrb.mxu0 %v2677_v6  ;;  %v2750_v0 = vld [vmem:[%s4617_s3 + $0x180] sm:$0x1] }
 0x516   :  { %v2746_v6 = vld [vmem:[%s4617_s3 + $0x160] sm:$0xff] }
 0x517   :  { %1220 = vmatpush.msrb.mxu2 %v2651_v2  ;;  %1339 = vmatpush.msrb.mxu0 %v2676_v9  ;;  %v2684_v2 = vld [vmem:[%s4618_s4 + $0x50] sm:$0xff]  ;;  %v2685_v9 = vld [vmem:[%s4618_s4 + $0x58] sm:$0xff] }
 0x519   :  { %1221 = vmatpush.msrb.mxu2 %v2650_v4  ;;  %1340 = vmatpush.msrb.mxu0 %v2675_v11  ;;  %v2748_v4 = vld [vmem:[%s4617_s3 + $0x170] sm:$0xff] }
 0x51a   :  { %1089 = vadd.xlane.f32.xlu1 %v1088_v10  ;;  %v2744_v11 = vld [vmem:[%s4617_s3 + $0x150] sm:$0xff] }
 0x51b   :  { %1341 = vmatpush.msrb.mxu0 %v2674_v12  ;;  %v2701_v12 = vld [vmem:[%s4618_s4 + $0x68] sm:$0xff] }
 0x51d   :  { %1342 = vmatpush.msrb.mxu0 %v2673_v15 }
 0x533   :  { %1144 = vperm.xlu1 %2836, %v3958_v29  }
 0x57d   :  { %v1070_v17 = vpop.xlane.xlu0 %1069 }
 0x57e   :  { %v3949_v20 = vmul.f32 %v1080_v18, %v1070_v17 }
 0x580   :  { %v1093_v24 = vmul.f32 %v3949_v20, %v3949_v20  ;;  %v1123_v10 = vsub.f32 %v3935_v22, %v3949_v20  ;;  %v2672_v22 = vld [vmem:[%s4617_s3 + $0x70] sm:$0xff]  ;;  %v2694_v20 = vld [vmem:[%s4617_s3 + $0xc8] sm:$0xff] }
 0x581   :  { %1343 = vmatpush.msrb.mxu0 %v2672_v22 }
 0x585   :  { %v1073_v21 = vpop.xlane.xlu1 %1072  ;;  %v1087_v23 = vpop.xlane.xlu0 %1086 }
 0x586   :  { %v1091_v25 = vmul.f32 %v1087_v23, %v1080_v18  ;;  %v3953_v27 = vmul.f32 %v1080_v18, %v1073_v21  ;;  %v2693_v21 = vld [vmem:[%s4617_s3 + $0xc0] sm:$0xff]  ;;  %v2692_v23 = vld [vmem:[%s4617_s3 + $0xb8] sm:$0xff] }
 0x588   :  { %v1095_v26 = vsub.f32 %v1091_v25, %v1093_v24  ;;  %v1094_v33 = vmul.f32 %v3953_v27, %v3953_v27  ;;  %v2691_v24 = vld [vmem:[%s4617_s3 + $0xb0] sm:$0xff]  ;;  %v2690_v25 = vld [vmem:[%s4617_s3 + $0xa8] sm:$0xff] }
 0x58a   :  { %v1097_v28 = vmax.f32 %v1095_v26, 0.0  ;;  %v1124_v26 = vsub.f32 %v3941_v7, %v3953_v27 }
 0x58c   :  { %v1099_v31 = vadd.f32 1e-05, %v1097_v28 }
 0x58d   :  { %v1090_v32 = vpop.xlane.xlu1 %1089 }
 0x58e   :  { %2845 = vrsqrt.f32 %v1099_v31  ;;  %v1092_v34 = vmul.f32 %v1090_v32, %v1080_v18  ;;  %vm1107_vm5 = vweird.f32 %v1099_v31  ;;  %v2696_v18 = vld [vmem:[%s4617_s3 + $0xd8] sm:$0x1] }
 0x590   :  { %v1096_v35 = vsub.f32 %v1092_v34, %v1094_v33 }
 0x592   :  { %v1098_v36 = vmax.f32 %v1096_v35, 0.0  ;;  %v1191_v35 = vld [vmem:[%s4618_s4] sm:$0xff] }
 0x594   :  { %v2846_v37 = vpop.eup %2845  ;;  %v1100_v38 = vadd.f32 1e-05, %v1098_v36  ;;  %v2714_v36 = vld [vmem:[%s4617_s3 + $0x110] sm:$0x1] }
 0x595   :  { %v1102_v39 = vmul.f32 %v2846_v37, %v1099_v31  ;;  %vm1108_vm4 = vweird.f32 %v2846_v37 }
 0x596   :  { %2847 = vrsqrt.f32 %v1100_v38  ;;  %vm1109_vm6 = vmor %vm1107_vm5, %vm1108_vm4  ;;  %vm1117_vm8 = vweird.f32 %v1100_v38 }
 0x597   :  { %v1103_v40 = vmul.f32 %v2846_v37, %v1102_v39  ;;  %v2712_v39 = vld [vmem:[%s4617_s3 + $0x100] sm:$0xff] }
 0x599   :  { %v1104_v41 = vmul.f32 0.5, %v1103_v40  ;;  %v2660_v40 = vld [vmem:[%s4618_s4 + $0x20] sm:$0xff] }
 0x59b   :  { %v1105_v42 = vsub.f32 1.5, %v1104_v41 }
 0x59c   :  { %v2848_v43 = vpop.eup %2847 }
 0x59d   :  { %v1112_v44 = vmul.f32 %v2848_v43, %v1100_v38  ;;  %v1106_v46 = vmul.f32 %v2846_v37, %v1105_v42  ;;  %vm1118_vm7 = vweird.f32 %v2848_v43  ;;  %v2711_v42 = vld [vmem:[%s4617_s3 + $0xf8] sm:$0xff] }
 0x59e   :  { %vm1119_vm9 = vmor %vm1117_vm8, %vm1118_vm7 }
 0x59f   :  { %v1113_v47 = vmul.f32 %v2848_v43, %v1112_v44  ;;  %v1110_v48 = vsel %vm1109_vm6, %v2846_v37, %v1106_v46  ;;  %v2713_v37 = vld [vmem:[%s4617_s3 + $0x108] sm:$0xff]  ;;  %v2710_v44 = vld [vmem:[%s4617_s3 + $0xf0] sm:$0xff] }
 0x5a0   :  { %v1121_v49 = vmul.f32 %v1110_v48, %v3966_v45  ;;  %v2709_v46 = vld [vmem:[%s4617_s3 + $0xe8] sm:$0xff] }
 0x5a1   :  { %v1114_v50 = vmul.f32 0.5, %v1113_v47  ;;  %v2708_v47 = vld [vmem:[%s4617_s3 + $0xe0] sm:$0xff]  ;;  %v2661_v48 = vld [vmem:[%s4618_s4 + $0x28] sm:$0xff] }
 0x5a2   :  { %1127 = vperm.xlu2 %2833, %v1121_v49  }
 0x5a3   :  { %v1115_v51 = vsub.f32 1.5, %v1114_v50  ;;  %v1193_v50 = vld [vmem:[%s4618_s4 + $0x10] sm:$0xff] }
 0x5a5   :  { %v1116_v52 = vmul.f32 %v2848_v43, %v1115_v51  ;;  %v2682_v51 = vld [vmem:[%s4618_s4 + $0x40] sm:$0xff] }
 0x5a7   :  { %v1120_v53 = vsel %vm1119_vm9, %v2848_v43, %v1116_v52  ;;  %v1192_v43 = vld [vmem:[%s4618_s4 + $0x8] sm:$0xff] }
 0x5a8   :  { %v1122_v54 = vmul.f32 %v1120_v53, %v3958_v29  ;;  %v2732_v52 = vld [vmem:[%s4617_s3 + $0x148] sm:$0x1]  ;;  %v2731_v53 = vld [vmem:[%s4617_s3 + $0x140] sm:$0xff] }
 0x5aa   :  { %1132 = vperm.xlu0 %2835, %v1122_v54   ;;  %2834 = vset.pattern.permute.xlu2 %v2887_v30  ;;  %v1145_v30 = vpop.permute.xlu1 %1144  ;;  %v2730_v54 = vld [vmem:[%s4617_s3 + $0x138] sm:$0xff] }
 0x5ab   :  { %1139 = vperm.xlu2 %2834, %v3966_v45  }
 0x5fc   :  { %v1128_v5 = vpop.permute.xlu2 %1127 }
 0x5fd   :  { %v1135_v13 = vmul.f32 %v1128_v5, %v1123_v10  ;;  %v2747_v5 = vld [vmem:[%s4617_s3 + $0x168] sm:$0xff]  ;;  %v2745_v10 = vld [vmem:[%s4617_s3 + $0x158] sm:$0xff] }
 0x605   :  { %v1140_v14 = vpop.permute.xlu2 %1139 }
 0x606   :  { %v1147_v16 = vadd.f32 %v1140_v14, %v1135_v13  ;;  %v2702_v13 = vld [vmem:[%s4618_s4 + $0x70] sm:$0xff]  ;;  %v2703_v14 = vld [vmem:[%s4618_s4 + $0x78] sm:$0xff] }
 0x608   :  { %v4036_v17 = vmax.f32 %v1147_v16, 0.0 }
 0x60a   :  { %2648 = vmatmul.msk.f32.vlgmr.msra.gmra.mxu0 %vm1067_vm2, %v4036_v17  ;;  %2658 = vmatmul.msk.f32.vlgmr.msrb.gmra.mxu2 %vm1067_vm2, %v4036_v17 }
 0x60b   :  { %2697 = vmatpush.msk.msra.mxu0 %vm1164_vm10, %v2696_v18 }
 0x60d   :  { %1422 = vmatpush.msra.mxu0 %v2695_v19 }
 0x60f   :  { %1423 = vmatpush.msra.mxu0 %v2694_v20 }
 0x611   :  { %1424 = vmatpush.msra.mxu0 %v2693_v21 }
 0x613   :  { %1425 = vmatpush.msra.mxu0 %v2692_v23 }
 0x615   :  { %1426 = vmatpush.msra.mxu0 %v2691_v24 }
 0x617   :  { %1427 = vmatpush.msra.mxu0 %v2690_v25 }
 0x61c   :  { %v1133_v28 = vpop.permute.xlu0 %1132 }
 0x61d   :  { %v1136_v31 = vmul.f32 %v1133_v28, %v1124_v26 }
 0x61f   :  { %v1148_v32 = vadd.f32 %v1145_v30, %v1136_v31 }
 0x621   :  { %v4069_v33 = vmax.f32 %v1148_v32, 0.0 }
 0x623   :  { %2649 = vmatmul.msk.f32.gmra.mxu0 %vm1067_vm2, %v4069_v33  ;;  %2659 = vmatmul.msk.f32.gmra.mxu2 %vm1067_vm2, %v4069_v33 }
 0x62b   :  { %2680 = vmatmul.msk.f32.vlgmr.msrb.gmra.mxu0 %vm1067_vm2, %v4036_v17 }
 0x633   :  { %2681 = vmatmul.msk.f32.gmra.mxu0 %vm1067_vm2, %v4069_v33 }
 0x63b   :  { %2698 = vmatmul.msk.f32.vlgmr.msra.gmra.mxu0 %vm1067_vm2, %v4036_v17 }
 0x643   :  { %2699 = vmatmul.msk.f32.gmra.mxu0 %vm1067_vm2, %v4069_v33 }
 0x687   :  { %v1185_v7 = vpop.f32.mrf.mxu0 }
 0x68d   :  { %v1223_v27 = vpop.f32.mrf.mxu2 }
 0x6a0   :  { %v1188_v34 = vpop.f32.mrf.mxu0 }
 0x6a1   :  { %1302 = vmatpush.msrb.mxu1 %v1188_v34 }
 0x6a3   :  { %1303 = vmatpush.msrb.mxu1 %v1185_v7 }
 0x6a4   :  { %2668 = vmatmul.msk.f32.vlgmr.msrb.gmra.mxu1 %vm1234_vm11, %v1191_v35  ;;  %v2718_v35 = vld [vmem:[%s4618_s4 + $0x80] sm:$0xff] }
 0x6a5   :  { %2715 = vmatpush.msk.msra.mxu1 %vm1164_vm10, %v2714_v36  ;;  %v2768_v36 = vld [vmem:[%s4617_s3 + $0x1b8] sm:$0x1] }
 0x6a6   :  { %v1226_v38 = vpop.f32.mrf.mxu2 }
 0x6a7   :  { %1261 = vmatpush.msrb.mxu3 %v1226_v38  ;;  %1506 = vmatpush.msra.mxu1 %v2713_v37  ;;  %v2767_v38 = vld [vmem:[%s4617_s3 + $0x1b0] sm:$0xff] }
 0x6a8   :  { %v1345_v41 = vpop.f32.mrf.mxu0 }
 0x6a9   :  { %1262 = vmatpush.msrb.mxu3 %v1223_v27  ;;  %1507 = vmatpush.msra.mxu1 %v2712_v39 }
 0x6aa   :  { %2664 = vmatmul.msk.f32.vlgmr.msrb.gmra.mxu3 %vm1234_vm11, %v2660_v40 }
 0x6ab   :  { %1508 = vmatpush.msra.mxu1 %v2711_v42 }
 0x6ac   :  { %2669 = vmatmul.msk.f32.gmra.mxu1 %vm1234_vm11, %v1192_v43  ;;  %v2765_v43 = vld [vmem:[%s4617_s3 + $0x1a0] sm:$0xff] }
 0x6ad   :  { %1509 = vmatpush.msra.mxu1 %v2710_v44  ;;  %v2719_v44 = vld [vmem:[%s4618_s4 + $0x88] sm:$0xff] }
 0x6af   :  { %1510 = vmatpush.msra.mxu1 %v2709_v46  ;;  %v2764_v46 = vld [vmem:[%s4617_s3 + $0x198] sm:$0xff] }
 0x6b0   :  { %v1348_v49 = vpop.f32.mrf.mxu0 }
 0x6b1   :  { %1382 = vmatpush.msra.mxu2 %v1348_v49  ;;  %1511 = vmatpush.msra.mxu1 %v2708_v47  ;;  %v2763_v47 = vld [vmem:[%s4617_s3 + $0x190] sm:$0xff]  ;;  %v2762_v49 = vld [vmem:[%s4617_s3 + $0x188] sm:$0xff] }
 0x6b2   :  { %2665 = vmatmul.msk.f32.gmra.mxu3 %vm1234_vm11, %v2661_v48 }
 0x6b3   :  { %1383 = vmatpush.msra.mxu2 %v1345_v41  ;;  %v2766_v41 = vld [vmem:[%s4617_s3 + $0x1a8] sm:$0xff] }
 0x6b4   :  { %2670 = vmatmul.msk.f32.gmra.mxu1 %vm1234_vm11, %v1193_v50  ;;  %2686 = vmatmul.msk.f32.vlgmr.msra.gmra.mxu2 %vm1234_vm11, %v2682_v51  ;;  %v2720_v50 = vld [vmem:[%s4618_s4 + $0x90] sm:$0xff] }
 0x6b5   :  { %2733 = vmatpush.msk.msrb.mxu2 %vm1164_vm10, %v2732_v52  ;;  %v2736_v52 = vld [vmem:[%s4618_s4 + $0xa0] sm:$0xff] }
 0x6b7   :  { %1590 = vmatpush.msrb.mxu2 %v2731_v53  ;;  %v2786_v53 = vld [vmem:[%s4617_s3 + $0x1f0] sm:$0x1] }
 0x6b8   :  { %v1429_v56 = vpop.f32.mrf.mxu0 }
 0x6b9   :  { %1591 = vmatpush.msrb.mxu2 %v2730_v54  ;;  %v2721_v54 = vld [vmem:[%s4618_s4 + $0x98] sm:$0xff] }
 0x6ba   :  { %2666 = vmatmul.msk.f32.gmra.mxu3 %vm1234_vm11, %v2662_v55  ;;  %v2785_v55 = vld [vmem:[%s4617_s3 + $0x1e8] sm:$0xff] }
 0x6bb   :  { %1592 = vmatpush.msrb.mxu2 %v2729_v57 }
 0x6bc   :  { %2671 = vmatmul.msk.f32.gmra.mxu1 %vm1234_vm11, %v1194_v58  ;;  %2687 = vmatmul.msk.f32.gmra.mxu2 %vm1234_vm11, %v2683_v59  ;;  %v2783_v58 = vld [vmem:[%s4617_s3 + $0x1d8] sm:$0xff]  ;;  %v2737_v59 = vld [vmem:[%s4618_s4 + $0xa8] sm:$0xff] }
 0x6bd   :  { %1593 = vmatpush.msrb.mxu2 %v2728_v60  ;;  %v2782_v60 = vld [vmem:[%s4617_s3 + $0x1d0] sm:$0xff] }
 0x6bf   :  { %1594 = vmatpush.msrb.mxu2 %v2727_v61  ;;  %v2781_v61 = vld [vmem:[%s4617_s3 + $0x1c8] sm:$0xff] }
 0x6c0   :  { %v1432_v1 = vpop.f32.mrf.mxu0 }
 0x6c1   :  { %1466 = vmatpush.msra.mxu3 %v1432_v1  ;;  %1595 = vmatpush.msrb.mxu2 %v2726_v62  ;;  %v2780_v62 = vld [vmem:[%s4617_s3 + $0x1c0] sm:$0xff] }
 0x6c2   :  { %2667 = vmatmul.msk.f32.gmra.mxu3 %vm1234_vm11, %v2663_v63  ;;  %v2754_v1 = vld [vmem:[%s4618_s4 + $0xc0] sm:$0xff] }
 0x6c3   :  { %2751 = vmatpush.msk.msra.mxu2 %vm1164_vm10, %v2750_v0  ;;  %1467 = vmatpush.msra.mxu3 %v1429_v56  ;;  %v2784_v56 = vld [vmem:[%s4617_s3 + $0x1e0] sm:$0xff]  ;;  %v2738_v0 = vld [vmem:[%s4618_s4 + $0xb0] sm:$0xff] }
 0x6c4   :  { %2688 = vmatmul.msk.f32.gmra.mxu2 %vm1234_vm11, %v2684_v2  ;;  %2716 = vmatmul.msk.f32.vlgmr.msra.gmra.mxu1 %vm1067_vm2, %v4036_v17  ;;  %v2739_v2 = vld [vmem:[%s4618_s4 + $0xb8] sm:$0xff] }
 0x6c5   :  { %1674 = vmatpush.msra.mxu2 %v2749_v3  ;;  %v2755_v3 = vld [vmem:[%s4618_s4 + $0xc8] sm:$0xff] }
 0x6c7   :  { %1675 = vmatpush.msra.mxu2 %v2748_v4  ;;  %v2756_v4 = vld [vmem:[%s4618_s4 + $0xd0] sm:$0xff] }
 0x6c9   :  { %1676 = vmatpush.msra.mxu2 %v2747_v5  ;;  %v2757_v5 = vld [vmem:[%s4618_s4 + $0xd8] sm:$0xff] }
 0x6ca   :  { %2704 = vmatmul.msk.f32.vlgmr.msra.gmra.mxu3 %vm1234_vm11, %v2700_v8 }
 0x6cb   :  { %1677 = vmatpush.msra.mxu2 %v2746_v6 }
 0x6cc   :  { %2689 = vmatmul.msk.f32.gmra.mxu2 %vm1234_vm11, %v2685_v9  ;;  %2717 = vmatmul.msk.f32.gmra.mxu1 %vm1067_vm2, %v4069_v33 }
 0x6cd   :  { %1678 = vmatpush.msra.mxu2 %v2745_v10 }
 0x6cf   :  { %1679 = vmatpush.msra.mxu2 %v2744_v11 }
 0x6d2   :  { %2705 = vmatmul.msk.f32.gmra.mxu3 %vm1234_vm11, %v2701_v12 }
 0x6d4   :  { %2734 = vmatmul.msk.f32.vlgmr.msrb.gmra.mxu2 %vm1067_vm2, %v4036_v17 }
 0x6da   :  { %2706 = vmatmul.msk.f32.gmra.mxu3 %vm1234_vm11, %v2702_v13 }
 0x6dc   :  { %2735 = vmatmul.msk.f32.gmra.mxu2 %vm1067_vm2, %v4069_v33 }
 0x6e2   :  { %2707 = vmatmul.msk.f32.gmra.mxu3 %vm1234_vm11, %v2703_v14 }
 0x6e4   :  { %2752 = vmatmul.msk.f32.vlgmr.msra.gmra.mxu2 %vm1067_vm2, %v4036_v17 }
 0x6ec   :  { %2753 = vmatmul.msk.f32.gmra.mxu2 %vm1067_vm2, %v4069_v33 }
 0x721   :  { %v1305_v15 = vpop.f32.mrf.mxu1 }
 0x729   :  { %v1308_v16 = vpop.f32.mrf.mxu1 }
 0x72d   :  { %v1264_v22 = vpop.f32.mrf.mxu3 }
 0x72e   :  { %v1306_v19 = vadd.f32 %v1305_v15, %v1264_v22 }
 0x731   :  { %v1311_v18 = vpop.f32.mrf.mxu1 }
 0x735   :  { %v1267_v23 = vpop.f32.mrf.mxu3 }
 0x736   :  { %v1309_v25 = vadd.f32 %v1308_v16, %v1267_v23 }
 0x737   :  { %v1385_v20 = vpop.f32.mrf.mxu2 }
 0x738   :  { %v4225_v21 = vadd.f32 %v1385_v20, %v1306_v19 }
 0x739   :  { %v1314_v24 = vpop.f32.mrf.mxu1 }
 0x73d   :  { %v1270_v31 = vpop.f32.mrf.mxu3 }
 0x73e   :  { %v1312_v32 = vadd.f32 %v1311_v18, %v1270_v31 }
 0x73f   :  { %v1388_v26 = vpop.f32.mrf.mxu2 }
 0x740   :  { %v4227_v28 = vadd.f32 %v1388_v26, %v1309_v25 }
 0x741   :  { %v1513_v30 = vpop.f32.mrf.mxu1 }
 0x745   :  { %v1273_v37 = vpop.f32.mrf.mxu3 }
 0x746   :  { %v1315_v39 = vadd.f32 %v1314_v24, %v1273_v37  ;;  %v2888_v37 = vmov 3  }
 0x747   :  { %v1391_v7 = vpop.f32.mrf.mxu2  ;;  %2838 = vset.pattern.permute.xlu2 %v2888_v37  ;;  %2837 = vset.pattern.permute.xlu1 %v2888_v37 }
 0x748   :  { %v4229_v27 = vadd.f32 %v1391_v7, %v1312_v32  ;;  %v2772_v32 = vld [vmem:[%s4618_s4 + $0xe0] sm:$0xff]  ;;  %2042 = vperm.xlu2 %2838, %v3958_v29   ;;  %2038 = vperm.xlu1 %2837, %v3966_v45  }
 0x749   :  { %v1516_v34 = vpop.f32.mrf.mxu1 }
 0x74a   :  { %1550 = vmatpush.msrb.mxu0 %v1516_v34  ;;  %v2773_v34 = vld [vmem:[%s4618_s4 + $0xe8] sm:$0xff] }
 0x74c   :  { %1551 = vmatpush.msrb.mxu0 %v1513_v30 }
 0x74d   :  { %2722 = vmatmul.msk.f32.vlgmr.msrb.gmra.mxu0 %vm1234_vm11, %v2718_v35  ;;  %v1469_v8 = vpop.f32.mrf.mxu3 }
 0x74e   :  { %2769 = vmatpush.msk.msra.mxu0 %vm1164_vm10, %v2768_v36  ;;  %v1481_v6 = vadd.f32 %v1469_v8, %v4225_v21  ;;  %v2774_v36 = vld [vmem:[%s4618_s4 + $0xf0] sm:$0xff] }
 0x74f   :  { %v1394_v40 = vpop.f32.mrf.mxu2 }
 0x750   :  { %v4245_v42 = vadd.f32 %v1394_v40, %v1315_v39  ;;  %1758 = vmatpush.msra.mxu0 %v2767_v38  ;;  %v2790_v39 = vld [vmem:[%s4618_s4 + $0x100] sm:$0xff]  ;;  %v2775_v40 = vld [vmem:[%s4618_s4 + $0xf8] sm:$0xff] }
 0x752   :  { %1759 = vmatpush.msra.mxu0 %v2766_v41  ;;  %v4362_v41 = vld [vmem:[%s4619_s5 + $0x18] sm:$0xff] }
 0x753   :  { %2052 = vperm.xlu2 %2838, %v4362_v41  }
 0x754   :  { %1760 = vmatpush.msra.mxu0 %v2765_v43  ;;  %v2791_v43 = vld [vmem:[%s4618_s4 + $0x108] sm:$0xff] }
 0x755   :  { %2723 = vmatmul.msk.f32.gmra.mxu0 %vm1234_vm11, %v2719_v44  ;;  %v1472_v9 = vpop.f32.mrf.mxu3  ;;  %v2792_v44 = vld [vmem:[%s4618_s4 + $0x110] sm:$0xff] }
 0x756   :  { %1761 = vmatpush.msra.mxu0 %v2764_v46  ;;  %v1482_v12 = vadd.f32 %v1472_v9, %v4227_v28  ;;  %v2793_v46 = vld [vmem:[%s4618_s4 + $0x118] sm:$0xff] }
 0x757   :  { %v1597_v48 = vpop.f32.mrf.mxu2 }
 0x758   :  { %1762 = vmatpush.msra.mxu0 %v2763_v47 }
 0x75a   :  { %1763 = vmatpush.msra.mxu0 %v2762_v49 }
 0x75d   :  { %2724 = vmatmul.msk.f32.gmra.mxu0 %vm1234_vm11, %v2720_v50 }
 0x75f   :  { %v1600_v51 = vpop.f32.mrf.mxu2 }
 0x760   :  { %1634 = vmatpush.msrb.mxu1 %v1600_v51 }
 0x762   :  { %1635 = vmatpush.msrb.mxu1 %v1597_v48 }
 0x763   :  { %2740 = vmatmul.msk.f32.vlgmr.msrb.gmra.mxu1 %vm1234_vm11, %v2736_v52 }
 0x764   :  { %2787 = vmatpush.msk.msra.mxu1 %vm1164_vm10, %v2786_v53 }
 0x765   :  { %2725 = vmatmul.msk.f32.gmra.mxu0 %vm1234_vm11, %v2721_v54 }
 0x766   :  { %1842 = vmatpush.msra.mxu1 %v2785_v55 }
 0x767   :  { %v1681_v57 = vpop.f32.mrf.mxu2 }
 0x768   :  { %1843 = vmatpush.msra.mxu1 %v2784_v56 }
 0x76a   :  { %1844 = vmatpush.msra.mxu1 %v2783_v58 }
 0x76b   :  { %2741 = vmatmul.msk.f32.gmra.mxu1 %vm1234_vm11, %v2737_v59 }
 0x76c   :  { %1845 = vmatpush.msra.mxu1 %v2782_v60 }
 0x76d   :  { %2770 = vmatmul.msk.f32.vlgmr.msra.gmra.mxu0 %vm1067_vm2, %v4036_v17 }
 0x76e   :  { %1846 = vmatpush.msra.mxu1 %v2781_v61 }
 0x76f   :  { %v1684_v63 = vpop.f32.mrf.mxu2 }
 0x770   :  { %1718 = vmatpush.msrb.mxu3 %v1684_v63  ;;  %1847 = vmatpush.msra.mxu1 %v2780_v62 }
 0x772   :  { %1719 = vmatpush.msrb.mxu3 %v1681_v57 }
 0x773   :  { %2742 = vmatmul.msk.f32.gmra.mxu1 %vm1234_vm11, %v2738_v0  ;;  %2758 = vmatmul.msk.f32.vlgmr.msrb.gmra.mxu3 %vm1234_vm11, %v2754_v1 }
 0x775   :  { %2771 = vmatmul.msk.f32.gmra.mxu0 %vm1067_vm2, %v4069_v33 }
 0x77b   :  { %2743 = vmatmul.msk.f32.gmra.mxu1 %vm1234_vm11, %v2739_v2  ;;  %2759 = vmatmul.msk.f32.gmra.mxu3 %vm1234_vm11, %v2755_v3 }
 0x783   :  { %2760 = vmatmul.msk.f32.gmra.mxu3 %vm1234_vm11, %v2756_v4  ;;  %2788 = vmatmul.msk.f32.vlgmr.msra.gmra.mxu1 %vm1067_vm2, %v4036_v17  ;;  %v1475_v17 = vpop.f32.mrf.mxu3 }
 0x784   :  { %v1483_v15 = vadd.f32 %v1475_v17, %v4229_v27 }
 0x78b   :  { %2761 = vmatmul.msk.f32.gmra.mxu3 %vm1234_vm11, %v2757_v5  ;;  %2789 = vmatmul.msk.f32.gmra.mxu1 %vm1067_vm2, %v4069_v33  ;;  %v1478_v18 = vpop.f32.mrf.mxu3 }
 0x78c   :  { %v1484_v20 = vadd.f32 %v1478_v18, %v4245_v42  ;;  %v4368_v42 = vld [vmem:[%s4619_s5 + $0x10] sm:$0xff] }
 0x78d   :  { %2047 = vperm.xlu1 %2837, %v4368_v42  }
 0x7ca   :  { %v1553_v10 = vpop.f32.mrf.mxu0 }
 0x7cb   :  { %v1565_v11 = vadd.f32 %v1553_v10, %v1481_v6 }
 0x7d2   :  { %v1556_v13 = vpop.f32.mrf.mxu0 }
 0x7d3   :  { %v1566_v14 = vadd.f32 %v1556_v13, %v1482_v12 }
 0x7da   :  { %v1559_v16 = vpop.f32.mrf.mxu0 }
 0x7db   :  { %v1567_v22 = vadd.f32 %v1559_v16, %v1483_v15 }
 0x7e0   :  { %v1637_v19 = vpop.f32.mrf.mxu1 }
 0x7e1   :  { %v1649_v33 = vadd.f32 %v1637_v19, %v1565_v11  ;;  %v2889_v19 = vmov 9.0  }
 0x7e2   :  { %v1562_v23 = vpop.f32.mrf.mxu0  ;;  %2849 = vrcp.f32 %v2889_v19 }
 0x7e3   :  { %v1568_v24 = vadd.f32 %v1562_v23, %v1484_v20  ;;  %v4413_v20 = vpop.permute.xlu2 %2042 }
 0x7e8   :  { %v1640_v21 = vpop.f32.mrf.mxu1 }
 0x7e9   :  { %v1650_v25 = vadd.f32 %v1640_v21, %v1566_v14 }
 0x7ea   :  { %v1765_v26 = vpop.f32.mrf.mxu0 }
 0x7eb   :  { %v4415_v21 = vpop.permute.xlu2 %2052 }
 0x7f0   :  { %v1643_v30 = vpop.f32.mrf.mxu1 }
 0x7f1   :  { %v1651_v31 = vadd.f32 %v1643_v30, %v1567_v22 }
 0x7f2   :  { %v1768_v28 = vpop.f32.mrf.mxu0 }
 0x7f3   :  { %1802 = vmatpush.msrb.mxu2 %v1768_v28 }
 0x7f5   :  { %1803 = vmatpush.msrb.mxu2 %v1765_v26 }
 0x7f6   :  { %2776 = vmatmul.msk.f32.vlgmr.msrb.gmra.mxu2 %vm1234_vm11, %v2772_v32  ;;  %v1721_v47 = vpop.f32.mrf.mxu3 }
 0x7f7   :  { %v1733_v49 = vadd.f32 %v1721_v47, %v1649_v33  ;;  %v2850_v33 = vpop.eup %2849 }
 0x7f8   :  { %v1646_v7 = vpop.f32.mrf.mxu1  ;;  %v1919_v23 = vmul.f32 9.0, %v2850_v33  ;;  %vm1923_vm13 = vweird.f32 %v2850_v33 }
 0x7f9   :  { %v1652_v27 = vadd.f32 %v1646_v7, %v1568_v24  ;;  %v2890_v7 = vmov 2  }
 0x7fa   :  { %v1920_v24 = vsub.f32 1.0, %v1919_v23  ;;  %2839 = vset.pattern.permute.xlu2 %v2890_v7  ;;  %2840 = vset.pattern.permute.xlu1 %v2890_v7 }
 0x7fb   :  { %2841 = vset.pattern.permute.xlu0 %v2890_v7 }
 0x7fc   :  { %v1921_v26 = vmul.f32 %v2850_v33, %v1920_v24 }
 0x7fe   :  { %2777 = vmatmul.msk.f32.gmra.mxu2 %vm1234_vm11, %v2773_v34  ;;  %v1724_v50 = vpop.f32.mrf.mxu3  ;;  %v1922_v30 = vadd.f32 %v2850_v33, %v1921_v26 }
 0x7ff   :  { %v1734_v56 = vadd.f32 %v1724_v50, %v1650_v25  ;;  %v4417_v25 = vpop.permute.xlu1 %2038 }
 0x800   :  { %v1849_v35 = vpop.f32.mrf.mxu1  ;;  %v1924_v32 = vsel %vm1923_vm13, %v2850_v33, %v1922_v30 }
 0x806   :  { %2778 = vmatmul.msk.f32.gmra.mxu2 %vm1234_vm11, %v2774_v36  ;;  %v1727_v59 = vpop.f32.mrf.mxu3 }
 0x807   :  { %v1735_v1 = vadd.f32 %v1727_v59, %v1651_v31  ;;  %v4419_v28 = vpop.permute.xlu1 %2047 }
 0x808   :  { %v1852_v38 = vpop.f32.mrf.mxu1 }
 0x809   :  { %1886 = vmatpush.msrb.mxu0 %v1852_v38 }
 0x80b   :  { %1887 = vmatpush.msrb.mxu0 %v1849_v35 }
 0x80c   :  { %2794 = vmatmul.msk.f32.vlgmr.msrb.gmra.mxu0 %vm1234_vm11, %v2790_v39 }
 0x80e   :  { %2779 = vmatmul.msk.f32.gmra.mxu2 %vm1234_vm11, %v2775_v40  ;;  %v1730_v8 = vpop.f32.mrf.mxu3 }
 0x80f   :  { %v1736_v11 = vadd.f32 %v1730_v8, %v1652_v27 }
 0x814   :  { %2795 = vmatmul.msk.f32.gmra.mxu0 %vm1234_vm11, %v2791_v43 }
 0x81c   :  { %2796 = vmatmul.msk.f32.gmra.mxu0 %vm1234_vm11, %v2792_v44 }
 0x824   :  { %2797 = vmatmul.msk.f32.gmra.mxu0 %vm1234_vm11, %v2793_v46 }
 0x879   :  { %v1805_v48 = vpop.f32.mrf.mxu2 }
 0x87a   :  { %v1817_v51 = vadd.f32 %v1805_v48, %v1733_v49 }
 0x881   :  { %v1808_v52 = vpop.f32.mrf.mxu2 }
 0x882   :  { %v1818_v57 = vadd.f32 %v1808_v52, %v1734_v56 }
 0x889   :  { %v1889_v53 = vpop.f32.mrf.mxu0  ;;  %v1811_v62 = vpop.f32.mrf.mxu2 }
 0x88a   :  { %v4385_v54 = vadd.f32 %v1889_v53, %v1817_v51  ;;  %v1819_v2 = vadd.f32 %v1811_v62, %v1735_v1 }
 0x88c   :  { %v1906_v55 = vsel %vm1905_vm12, %v4385_v54, 0.0  ;;  %v1929_v58 = vmul.f32 %v4385_v54, %v4385_v54 }
 0x88d   :  { %1907 = vadd.xlane.f32.xlu2 %v1906_v55 }
 0x88e   :  { %v1933_v0 = vsel %vm1905_vm12, %v1929_v58, 0.0 }
 0x891   :  { %v1892_v60 = vpop.f32.mrf.mxu0  ;;  %v1814_v10 = vpop.f32.mrf.mxu2 }
 0x892   :  { %v4391_v61 = vadd.f32 %v1892_v60, %v1818_v57  ;;  %v1820_v12 = vadd.f32 %v1814_v10, %v1736_v11 }
 0x894   :  { %v1909_v63 = vsel %vm1905_vm12, %v4391_v61, 0.0  ;;  %v1930_v3 = vmul.f32 %v4391_v61, %v4391_v61 }
 0x895   :  { %1910 = vadd.xlane.f32.xlu1 %v1909_v63  ;;  %1934 = vadd.xlane.f32.xlu2 %v1933_v0 }
 0x896   :  { %v1936_v9 = vsel %vm1905_vm12, %v1930_v3, 0.0 }
 0x899   :  { %v1895_v4 = vpop.f32.mrf.mxu0 }
 0x89a   :  { %v4398_v5 = vadd.f32 %v1895_v4, %v1819_v2 }
 0x89c   :  { %v1912_v6 = vsel %vm1905_vm12, %v4398_v5, 0.0  ;;  %v1931_v13 = vmul.f32 %v4398_v5, %v4398_v5 }
 0x89d   :  { %1913 = vadd.xlane.f32.xlu0 %v1912_v6  ;;  %1937 = vadd.xlane.f32.xlu2 %v1936_v9 }
 0x89e   :  { %v1939_v15 = vsel %vm1905_vm12, %v1931_v13, 0.0 }
 0x8a1   :  { %v1898_v14 = vpop.f32.mrf.mxu0 }
 0x8a2   :  { %v4405_v17 = vadd.f32 %v1898_v14, %v1820_v12 }
 0x8a4   :  { %v1932_v16 = vmul.f32 %v4405_v17, %v4405_v17  ;;  %v1915_v18 = vsel %vm1905_vm12, %v4405_v17, 0.0 }
 0x8a5   :  { %1940 = vadd.xlane.f32.xlu2 %v1939_v15 }
 0x8a6   :  { %v1942_v22 = vsel %vm1905_vm12, %v1932_v16, 0.0 }
 0x8a7   :  { %1943 = vadd.xlane.f32.xlu1 %v1942_v22 }
 0x8ad   :  { %1916 = vadd.xlane.f32.xlu2 %v1915_v18 }
 0x900   :  { %v1908_v31 = vpop.xlane.xlu2 %1907 }
 0x901   :  { %v4421_v27 = vmul.f32 %v1924_v32, %v1908_v31 }
 0x903   :  { %v1949_v35 = vmul.f32 %v4421_v27, %v4421_v27 }
 0x908   :  { %v1935_v34 = vpop.xlane.xlu2 %1934  ;;  %v1911_v38 = vpop.xlane.xlu1 %1910 }
 0x909   :  { %v1945_v36 = vmul.f32 %v1935_v34, %v1924_v32  ;;  %v4425_v40 = vmul.f32 %v1924_v32, %v1911_v38 }
 0x90b   :  { %v1953_v39 = vsub.f32 %v1945_v36, %v1949_v35  ;;  %v1950_v47 = vmul.f32 %v4425_v40, %v4425_v40 }
 0x90d   :  { %v1957_v43 = vmax.f32 %v1953_v39, 0.0 }
 0x90f   :  { %v1961_v44 = vadd.f32 1e-05, %v1957_v43 }
 0x910   :  { %v1938_v46 = vpop.xlane.xlu2 %1937  ;;  %v1914_v49 = vpop.xlane.xlu0 %1913 }
 0x911   :  { %2851 = vrsqrt.f32 %v1961_v44  ;;  %v1946_v48 = vmul.f32 %v1938_v46, %v1924_v32  ;;  %v4429_v51 = vmul.f32 %v1924_v32, %v1914_v49  ;;  %vm1971_vm15 = vweird.f32 %v1961_v44 }
 0x912   :  { %v2009_v49 = vsub.f32 %v4385_v54, %v4421_v27 }
 0x913   :  { %v1954_v50 = vsub.f32 %v1946_v48, %v1950_v47  ;;  %v1951_v58 = vmul.f32 %v4429_v51, %v4429_v51 }
 0x915   :  { %v1958_v52 = vmax.f32 %v1954_v50, 0.0 }
 0x917   :  { %v2852_v53 = vpop.eup %2851  ;;  %v1962_v55 = vadd.f32 1e-05, %v1958_v52 }
 0x918   :  { %v1966_v56 = vmul.f32 %v2852_v53, %v1961_v44  ;;  %v1941_v57 = vpop.xlane.xlu2 %1940  ;;  %vm1972_vm14 = vweird.f32 %v2852_v53 }
 0x919   :  { %2853 = vrsqrt.f32 %v1962_v55  ;;  %v1947_v59 = vmul.f32 %v1941_v57, %v1924_v32  ;;  %vm1973_vm0 = vmor %vm1971_vm15, %vm1972_vm14  ;;  %vm1981_vm2 = vweird.f32 %v1962_v55 }
 0x91a   :  { %v1967_v60 = vmul.f32 %v2852_v53, %v1966_v56  ;;  %v1944_v8 = vpop.xlane.xlu1 %1943 }
 0x91b   :  { %v1955_v62 = vsub.f32 %v1947_v59, %v1951_v58  ;;  %v1948_v13 = vmul.f32 %v1944_v8, %v1924_v32  ;;  %v2806_v59 = vld [vmem:[%s4620_s6 + $0x60] sm:$0xff] }
 0x91c   :  { %v1968_v63 = vmul.f32 0.5, %v1967_v60  ;;  %v2814_v60 = vld [vmem:[%s4620_s6 + $0xa0] sm:$0xff] }
 0x91d   :  { %v1959_v0 = vmax.f32 %v1955_v62, 0.0  ;;  %v2810_v62 = vld [vmem:[%s4620_s6 + $0x80] sm:$0xff] }
 0x91e   :  { %v1969_v1 = vsub.f32 1.5, %v1968_v63  ;;  %v2818_v8 = vld [vmem:[%s4620_s6 + $0xc0] sm:$0xff] }
 0x91f   :  { %v2854_v2 = vpop.eup %2853  ;;  %v1963_v3 = vadd.f32 1e-05, %v1959_v0 }
 0x920   :  { %v1976_v4 = vmul.f32 %v2854_v2, %v1962_v55  ;;  %v1917_v6 = vpop.xlane.xlu2 %1916  ;;  %v1970_v9 = vmul.f32 %v2852_v53, %v1969_v1  ;;  %vm1982_vm1 = vweird.f32 %v2854_v2  ;;  %v2798_v55 = vld [vmem:[%s4620_s6 + $0x20] sm:$0xff] }
 0x921   :  { %2855 = vrsqrt.f32 %v1963_v3  ;;  %v4433_v10 = vmul.f32 %v1924_v32, %v1917_v6  ;;  %vm1983_vm3 = vmor %vm1981_vm2, %vm1982_vm1  ;;  %vm1991_vm5 = vweird.f32 %v1963_v3  ;;  %v2822_v6 = vld [vmem:[%s4620_s6 + $0xe0] sm:$0xff]  ;;  %vm2330_vm2 = vcmask 57344  }
 0x922   :  { %v1977_v11 = vmul.f32 %v2854_v2, %v1976_v4  ;;  %v1974_v12 = vsel %vm1973_vm0, %v2852_v53, %v1970_v9  ;;  %v2802_v53 = vld [vmem:[%s4620_s6 + $0x40] sm:$0xff] }
 0x923   :  { %v1952_v14 = vmul.f32 %v4433_v10, %v4433_v10  ;;  %v2005_v15 = vmul.f32 %v1974_v12, %v3966_v45 }
 0x924   :  { %v1978_v16 = vmul.f32 0.5, %v1977_v11 }
 0x925   :  { %v1956_v22 = vsub.f32 %v1948_v13, %v1952_v14  ;;  %2015 = vperm.xlu2 %2839, %v2005_v15   ;;  %v2010_v14 = vsub.f32 %v4391_v61, %v4425_v40  ;;  %v2011_v61 = vsub.f32 %v4398_v5, %v4429_v51  ;;  %v2811_v5 = vld [vmem:[%s4620_s6 + $0x88] sm:$0xff] }
 0x926   :  { %v1979_v18 = vsub.f32 1.5, %v1978_v16  ;;  %v2807_v51 = vld [vmem:[%s4620_s6 + $0x68] sm:$0xff] }
 0x927   :  { %v2856_v19 = vpop.eup %2855  ;;  %v1960_v33 = vmax.f32 %v1956_v22, 0.0 }
 0x928   :  { %v1986_v23 = vmul.f32 %v2856_v19, %v1963_v3  ;;  %v1980_v24 = vmul.f32 %v2854_v2, %v1979_v18  ;;  %vm1992_vm4 = vweird.f32 %v2856_v19  ;;  %v2799_v18 = vld [vmem:[%s4620_s6 + $0x28] sm:$0xff] }
 0x929   :  { %v1964_v26 = vadd.f32 1e-05, %v1960_v33  ;;  %vm1993_vm6 = vmor %vm1991_vm5, %vm1992_vm4  ;;  %v2803_v33 = vld [vmem:[%s4620_s6 + $0x48] sm:$0xff] }
 0x92a   :  { %v1987_v30 = vmul.f32 %v2856_v19, %v1986_v23  ;;  %v1984_v31 = vsel %vm1983_vm3, %v2854_v2, %v1980_v24 }
 0x92b   :  { %2857 = vrsqrt.f32 %v1964_v26  ;;  %v2006_v32 = vmul.f32 %v1984_v31, %v3958_v29  ;;  %vm2001_vm8 = vweird.f32 %v1964_v26 }
 0x92c   :  { %v1988_v7 = vmul.f32 0.5, %v1987_v30 }
 0x92d   :  { %2020 = vperm.xlu1 %2840, %v2006_v32  }
 0x92e   :  { %v1989_v45 = vsub.f32 1.5, %v1988_v7 }
 0x930   :  { %v1990_v34 = vmul.f32 %v2856_v19, %v1989_v45  ;;  %v2815_v45 = vld [vmem:[%s4620_s6 + $0xa8] sm:$0xff] }
 0x931   :  { %v2858_v35 = vpop.eup %2857 }
 0x932   :  { %v1996_v36 = vmul.f32 %v2858_v35, %v1964_v26  ;;  %v1994_v38 = vsel %vm1993_vm6, %v2856_v19, %v1990_v34  ;;  %vm2002_vm7 = vweird.f32 %v2858_v35  ;;  %v2066_v19 = vld [vmem:[%s4620_s6 + $0x8] sm:$0xff] }
 0x933   :  { %v2007_v39 = vmul.f32 %v1994_v38, %v4368_v42  ;;  %vm2003_vm9 = vmor %vm2001_vm8, %vm2002_vm7 }
 0x934   :  { %v1997_v43 = vmul.f32 %v2858_v35, %v1996_v36 }
 0x935   :  { %2025 = vperm.xlu0 %2841, %v2007_v39  }
 0x936   :  { %v1998_v44 = vmul.f32 0.5, %v1997_v43 }
 0x938   :  { %v1999_v46 = vsub.f32 1.5, %v1998_v44 }
 0x93a   :  { %v2000_v47 = vmul.f32 %v2858_v35, %v1999_v46 }
 0x93c   :  { %v2004_v29 = vsel %vm2003_vm9, %v2858_v35, %v2000_v47  ;;  %v2067_v47 = vld [vmem:[%s4620_s6 + $0x10] sm:$0xff] }
 0x93d   :  { %v2008_v48 = vmul.f32 %v2004_v29, %v4362_v41  ;;  %2842 = vset.pattern.permute.xlu0 %v2888_v37  ;;  %v2065_v37 = vld [vmem:[%s4620_s6] sm:$0xff]  ;;  %v2819_v29 = vld [vmem:[%s4620_s6 + $0xc8] sm:$0xff] }
 0x93f   :  { %2030 = vperm.xlu2 %2839, %v2008_v48  }
 0x97f   :  { %v2016_v50 = vpop.permute.xlu2 %2015 }
 0x980   :  { %v2033_v52 = vmul.f32 %v2016_v50, %v2009_v49 }
 0x982   :  { %v2055_v42 = vadd.f32 %v4417_v25, %v2033_v52 }
 0x984   :  { %v2059_v41 = vmax.f32 %v2055_v42, 0.0 }
 0x986   :  { %v2135_v56 = vmul.f32 %v2802_v53, %v2059_v41  ;;  %v2102_v57 = vmul.f32 %v2798_v55, %v2059_v41  ;;  %v2069_v54 = vmul.f32 %v2065_v37, %v2059_v41  ;;  %v2168_v63 = vmul.f32 %v2806_v59, %v2059_v41  ;;  %v2808_v55 = vld [vmem:[%s4620_s6 + $0x70] sm:$0xff] }
 0x987   :  { %v2234_v0 = vmul.f32 %v2814_v60, %v2059_v41  ;;  %v2201_v1 = vmul.f32 %v2810_v62, %v2059_v41  ;;  %v2267_v9 = vmul.f32 %v2818_v8, %v2059_v41  ;;  %v2300_v11 = vmul.f32 %v2822_v6, %v2059_v41  ;;  %v2804_v37 = vld [vmem:[%s4620_s6 + $0x50] sm:$0xff] }
 0x988   :  { %v2139_v27 = vsel %vm1905_vm12, %v2135_v56, 0.0  ;;  %v2106_v25 = vsel %vm1905_vm12, %v2102_v57, 0.0  ;;  %v2073_v58 = vsel %vm1905_vm12, %v2069_v54, 0.0  ;;  %v2172_v2 = vsel %vm1905_vm12, %v2168_v63, 0.0  ;;  %v2800_v41 = vld [vmem:[%s4620_s6 + $0x30] sm:$0xff] }
 0x989   :  { %2140 = vadd.xlane.f32.xlu0 %v2139_v27  ;;  %2107 = vadd.xlane.f32.xlu2 %v2106_v25  ;;  %v2238_v3 = vsel %vm1905_vm12, %v2234_v0, 0.0  ;;  %v2205_v4 = vsel %vm1905_vm12, %v2201_v1, 0.0  ;;  %v2271_v12 = vsel %vm1905_vm12, %v2267_v9, 0.0  ;;  %v2304_v13 = vsel %vm1905_vm12, %v2300_v11, 0.0  ;;  %v2820_v63 = vld [vmem:[%s4620_s6 + $0xd0] sm:$0xff]  ;;  %v2809_v11 = vld [vmem:[%s4620_s6 + $0x78] sm:$0xff] }
 0x98a   :  { %2074 = vadd.xlane.f32.xlu1 %v2073_v58  ;;  %v2012_v25 = vsub.f32 %v4405_v17, %v4433_v10  ;;  %v2816_v0 = vld [vmem:[%s4620_s6 + $0xb0] sm:$0xff] }
 0x98b   :  { %v2812_v17 = vld [vmem:[%s4620_s6 + $0x90] sm:$0xff] }
 0x991   :  { %2173 = vadd.xlane.f32.xlu0 %v2172_v2  ;;  %2239 = vadd.xlane.f32.xlu2 %v2238_v3 }
 0x992   :  { %2206 = vadd.xlane.f32.xlu1 %v2205_v4 }
 0x999   :  { %2272 = vadd.xlane.f32.xlu0 %v2271_v12  ;;  %v2031_v54 = vpop.permute.xlu2 %2030  ;;  %v2068_v12 = vld [vmem:[%s4620_s6 + $0x18] sm:$0xff] }
 0x99a   :  { %2305 = vadd.xlane.f32.xlu1 %v2304_v13  ;;  %v2036_v58 = vmul.f32 %v2031_v54, %v2012_v25 }
 0x99c   :  { %v2058_v10 = vadd.f32 %v4415_v21, %v2036_v58  ;;  %v2801_v21 = vld [vmem:[%s4620_s6 + $0x38] sm:$0xff] }
 0x99e   :  { %v2062_v4 = vmax.f32 %v2058_v10, 0.0 }
 0x99f   :  { %v2021_v15 = vpop.permute.xlu1 %2020 }
 0x9a0   :  { %v2034_v16 = vmul.f32 %v2021_v15, %v2010_v14  ;;  %v2171_v13 = vmul.f32 %v2809_v11, %v2062_v4  ;;  %v2105_v14 = vmul.f32 %v2801_v21, %v2062_v4  ;;  %v2072_v15 = vmul.f32 %v2068_v12, %v2062_v4 }
 0x9a1   :  { %v2063_v11 = vlaneseq }
 0x9a2   :  { %v2056_v22 = vadd.f32 %v4413_v20, %v2034_v16  ;;  %v2181_v16 = vsel %vm1905_vm12, %v2171_v13, 0.0 }
 0x9a4   :  { %v2060_v23 = vmax.f32 %v2056_v22, 0.0  ;;  %v2115_v22 = vsel %vm1905_vm12, %v2105_v14, 0.0 }
 0x9a6   :  { %v2103_v40 = vmul.f32 %v2799_v18, %v2060_v23  ;;  %v2070_v24 = vmul.f32 %v2066_v19, %v2060_v23  ;;  %v2136_v26 = vmul.f32 %v2803_v33, %v2060_v23  ;;  %v2235_v35 = vmul.f32 %v2815_v45, %v2060_v23  ;;  %v2821_v19 = vld [vmem:[%s4620_s6 + $0xd8] sm:$0xff] }
 0x9a7   :  { %v2026_v20 = vpop.permute.xlu0 %2025  ;;  %v2202_v36 = vmul.f32 %v2811_v5, %v2060_v23  ;;  %v2169_v38 = vmul.f32 %v2807_v51, %v2060_v23  ;;  %v2268_v50 = vmul.f32 %v2819_v29, %v2060_v23  ;;  %v2082_v18 = vsel %vm1905_vm12, %v2072_v15, 0.0  ;;  %v2805_v33 = vld [vmem:[%s4620_s6 + $0x58] sm:$0xff] }
 0x9a8   :  { %v2035_v30 = vmul.f32 %v2026_v20, %v2011_v61  ;;  %v2109_v31 = vsel %vm1905_vm12, %v2103_v40, 0.0  ;;  %v2076_v32 = vsel %vm1905_vm12, %v2070_v24, 0.0  ;;  %v2142_v7 = vsel %vm1905_vm12, %v2136_v26, 0.0 }
 0x9a9   :  { %2110 = vadd.xlane.f32.xlu0 %v2109_v31  ;;  %2077 = vadd.xlane.f32.xlu2 %v2076_v32  ;;  %v2241_v43 = vsel %vm1905_vm12, %v2235_v35, 0.0  ;;  %v2208_v44 = vsel %vm1905_vm12, %v2202_v36, 0.0  ;;  %v2175_v46 = vsel %vm1905_vm12, %v2169_v38, 0.0  ;;  %v2274_v53 = vsel %vm1905_vm12, %v2268_v50, 0.0  ;;  %v2817_v31 = vld [vmem:[%s4620_s6 + $0xb8] sm:$0xff]  ;;  %v2824_v32 = vld [vmem:[%s4620_s6 + $0xf0] sm:$0xff] }
 0x9aa   :  { %2143 = vadd.xlane.f32.xlu1 %v2142_v7  ;;  %v2057_v34 = vadd.f32 %v4419_v28, %v2035_v30  ;;  %v2823_v28 = vld [vmem:[%s4620_s6 + $0xe8] sm:$0xff]  ;;  %v2270_v61 = vmul.f32 %v2821_v19, %v2062_v4  ;;  %v2138_v40 = vmul.f32 %v2805_v33, %v2062_v4  ;;  %v2237_v7 = vmul.f32 %v2817_v31, %v2062_v4 }
 0x9ab   :  { %v2301_v49 = vmul.f32 %v2823_v28, %v2060_v23  ;;  %v2813_v23 = vld [vmem:[%s4620_s6 + $0x98] sm:$0xff] }
 0x9ac   :  { %v4504_v39 = vmax.f32 %v2057_v34, 0.0  ;;  %v2204_v24 = vmul.f32 %v2813_v23, %v2062_v4  ;;  %v2280_v26 = vsel %vm1905_vm12, %v2270_v61, 0.0  ;;  %v2148_v20 = vsel %vm1905_vm12, %v2138_v40, 0.0  ;;  %v2825_v34 = vld [vmem:[%s4620_s6 + $0xf8] sm:$0xff] }
 0x9ad   :  { %v2307_v42 = vsel %vm1905_vm12, %v2301_v49, 0.0  ;;  %v2247_v5 = vsel %vm1905_vm12, %v2237_v7, 0.0  ;;  %v2303_v35 = vmul.f32 %v2825_v34, %v2062_v4  ;;  %v4596_v61 = vand.u32 127, %v2063_v11 }
 0x9ae   :  { %v2071_v48 = vmul.f32 %v2067_v47, %v4504_v39  ;;  %v2170_v56 = vmul.f32 %v2808_v55, %v4504_v39  ;;  %v2137_v57 = vmul.f32 %v2804_v37, %v4504_v39  ;;  %v2104_v27 = vmul.f32 %v2800_v41, %v4504_v39 }
 0x9af   :  { %v2269_v1 = vmul.f32 %v2820_v63, %v4504_v39  ;;  %v2236_v2 = vmul.f32 %v2816_v0, %v4504_v39  ;;  %v2203_v3 = vmul.f32 %v2812_v17, %v4504_v39  ;;  %v2214_v30 = vsel %vm1905_vm12, %v2204_v24, 0.0 }
 0x9b0   :  { %v2079_v52 = vsel %vm1905_vm12, %v2071_v48, 0.0  ;;  %v2178_v59 = vsel %vm1905_vm12, %v2170_v56, 0.0  ;;  %v2145_v60 = vsel %vm1905_vm12, %v2137_v57, 0.0  ;;  %v2112_v62 = vsel %vm1905_vm12, %v2104_v27, 0.0 }
 0x9b1   :  { %2242 = vadd.xlane.f32.xlu0 %v2241_v43  ;;  %2209 = vadd.xlane.f32.xlu2 %v2208_v44  ;;  %v2277_v8 = vsel %vm1905_vm12, %v2269_v1, 0.0  ;;  %v2244_v6 = vsel %vm1905_vm12, %v2236_v2, 0.0  ;;  %v2211_v9 = vsel %vm1905_vm12, %v2203_v3, 0.0  ;;  %v2302_v45 = vmul.f32 %v2824_v32, %v4504_v39 }
 0x9b2   :  { %2176 = vadd.xlane.f32.xlu1 %v2175_v46  ;;  %v2313_v36 = vsel %vm1905_vm12, %v2303_v35, 0.0  ;;  %vm2127_vm10 = vcmp.eq.s32.totalorder %v4596_v61, 1  ;;  %vm2094_vm11 = vcmp.eq.s32.totalorder %v4596_v61, 0  ;;  %vm2193_vm13 = vcmp.eq.s32.totalorder %v4596_v61, 3 }
 0x9b3   :  { %v2310_v51 = vsel %vm1905_vm12, %v2302_v45, 0.0  ;;  %vm2160_vm12 = vcmp.eq.s32.totalorder %v4596_v61, 2  ;;  %vm2226_vm14 = vcmp.eq.s32.totalorder %v4596_v61, 4  ;;  %vm2259_vm15 = vcmp.eq.s32.totalorder %v4596_v61, 5 }
 0x9b4   :  { %vm2292_vm0 = vcmp.eq.s32.totalorder %v4596_v61, 6  ;;  %vm2325_vm1 = vcmp.eq.s32.totalorder %v4596_v61, 7 }
 0x9b9   :  { %2080 = vadd.xlane.f32.xlu0 %v2079_v52  ;;  %2308 = vadd.xlane.f32.xlu2 %v2307_v42 }
 0x9ba   :  { %2275 = vadd.xlane.f32.xlu1 %v2274_v53 }
 0x9c1   :  { %2179 = vadd.xlane.f32.xlu0 %v2178_v59  ;;  %2146 = vadd.xlane.f32.xlu2 %v2145_v60 }
 0x9c2   :  { %2113 = vadd.xlane.f32.xlu1 %v2112_v62 }
 0x9c9   :  { %2278 = vadd.xlane.f32.xlu0 %v2277_v8  ;;  %2245 = vadd.xlane.f32.xlu2 %v2244_v6 }
 0x9ca   :  { %2212 = vadd.xlane.f32.xlu1 %v2211_v9 }
 0x9d1   :  { %2182 = vadd.xlane.f32.xlu0 %v2181_v16  ;;  %2116 = vadd.xlane.f32.xlu2 %v2115_v22 }
 0x9d2   :  { %2083 = vadd.xlane.f32.xlu1 %v2082_v18 }
 0x9d9   :  { %2281 = vadd.xlane.f32.xlu0 %v2280_v26  ;;  %2149 = vadd.xlane.f32.xlu2 %v2148_v20 }
 0x9da   :  { %2215 = vadd.xlane.f32.xlu1 %v2214_v30 }
 0x9e1   :  { %2248 = vadd.xlane.f32.xlu2 %v2247_v5 }
 0x9e2   :  { %2311 = vadd.xlane.f32.xlu1 %v2310_v51 }
 0x9e9   :  { %2314 = vadd.xlane.f32.xlu2 %v2313_v36 }
 0x9fc   :  { %v2141_v38 = vpop.xlane.xlu0 %2140  ;;  %v2108_v44 = vpop.xlane.xlu2 %2107 }
 0x9fd   :  { %v2075_v43 = vpop.xlane.xlu1 %2074 }
 0xa04   :  { %v2174_v46 = vpop.xlane.xlu0 %2173  ;;  %v2240_v39 = vpop.xlane.xlu2 %2239 }
 0xa05   :  { %v2207_v47 = vpop.xlane.xlu1 %2206 }
 0xa0c   :  { %v2273_v28 = vpop.xlane.xlu0 %2272 }
 0xa0d   :  { %v4592_v29 = vpop.xlane.xlu1 %2305 }
 0xa1c   :  { %v2111_v48 = vpop.xlane.xlu0 %2110  ;;  %v2078_v49 = vpop.xlane.xlu2 %2077 }
 0xa1d   :  { %v2144_v50 = vpop.xlane.xlu1 %2143  ;;  %v2118_v59 = vadd.f32 %v2111_v48, %v2108_v44  ;;  %v2085_v62 = vadd.f32 %v2078_v49, %v2075_v43 }
 0xa1e   :  { %v2151_v12 = vadd.f32 %v2144_v50, %v2141_v38 }
 0xa24   :  { %v2243_v52 = vpop.xlane.xlu0 %2242  ;;  %v2210_v42 = vpop.xlane.xlu2 %2209 }
 0xa25   :  { %v2177_v53 = vpop.xlane.xlu1 %2176  ;;  %v2217_v16 = vadd.f32 %v2210_v42, %v2207_v47  ;;  %v2250_v51 = vadd.f32 %v2243_v52, %v2240_v39 }
 0xa26   :  { %v2184_v60 = vadd.f32 %v2177_v53, %v2174_v46 }
 0xa2c   :  { %v2081_v55 = vpop.xlane.xlu0 %2080  ;;  %v4594_v37 = vpop.xlane.xlu2 %2308 }
 0xa2d   :  { %v2276_v41 = vpop.xlane.xlu1 %2275  ;;  %v2086_v17 = vadd.f32 %v2085_v62, %v2081_v55 }
 0xa2e   :  { %v2283_v13 = vadd.f32 %v2276_v41, %v2273_v28 }
 0xa34   :  { %v2180_v56 = vpop.xlane.xlu0 %2179  ;;  %v2147_v57 = vpop.xlane.xlu2 %2146 }
 0xa35   :  { %v2114_v54 = vpop.xlane.xlu1 %2113  ;;  %v2185_v63 = vadd.f32 %v2184_v60, %v2180_v56  ;;  %v2152_v18 = vadd.f32 %v2151_v12, %v2147_v57  ;;  %v2316_v60 = vadd.f32 %v4594_v37, %v4592_v29 }
 0xa36   :  { %v2119_v0 = vadd.f32 %v2118_v59, %v2114_v54 }
 0xa3c   :  { %v2279_v27 = vpop.xlane.xlu0 %2278  ;;  %v2246_v25 = vpop.xlane.xlu2 %2245 }
 0xa3d   :  { %v2213_v58 = vpop.xlane.xlu1 %2212  ;;  %v2284_v19 = vadd.f32 %v2283_v13, %v2279_v27  ;;  %v2251_v49 = vadd.f32 %v2250_v51, %v2246_v25 }
 0xa3e   :  { %v2218_v23 = vadd.f32 %v2217_v16, %v2213_v58 }
 0xa44   :  { %v2183_v10 = vpop.xlane.xlu0 %2182  ;;  %v2117_v1 = vpop.xlane.xlu2 %2116 }
 0xa45   :  { %v2186_v2 = vadd.f32 %v2185_v63, %v2183_v10  ;;  %v2084_v3 = vpop.xlane.xlu1 %2083  ;;  %v2120_v4 = vadd.f32 %v2119_v0, %v2117_v1 }
 0xa46   :  { %v2087_v8 = vadd.f32 %v2086_v17, %v2084_v3 }
 0xa47   :  { %v2187_v6 = vrot.slane %v2186_v2, 4  ;;  %v2121_v9 = vrot.slane %v2120_v4, 4 }
 0xa48   :  { %v2088_v21 = vrot.slane %v2087_v8, 4 }
 0xa49   :  { %v2188_v14 = vadd.f32 %v2187_v6, %v2186_v2  ;;  %v2122_v15 = vadd.f32 %v2121_v9, %v2120_v4 }
 0xa4a   :  { %v2089_v22 = vadd.f32 %v2088_v21, %v2087_v8 }
 0xa4b   :  { %v2123_v33 = vrot.slane %v2122_v15, 2  ;;  %v2189_v40 = vrot.slane %v2188_v14, 2 }
 0xa4c   :  { %v2090_v24 = vrot.slane %v2089_v22, 2  ;;  %v2282_v26 = vpop.xlane.xlu0 %2281  ;;  %v2150_v20 = vpop.xlane.xlu2 %2149 }
 0xa4d   :  { %v2124_v30 = vadd.f32 %v2123_v33, %v2122_v15  ;;  %v2285_v31 = vadd.f32 %v2284_v19, %v2282_v26  ;;  %v2216_v32 = vpop.xlane.xlu1 %2215  ;;  %v2153_v7 = vadd.f32 %v2152_v18, %v2150_v20  ;;  %v2190_v36 = vadd.f32 %v2189_v40, %v2188_v14 }
 0xa4e   :  { %v2091_v45 = vadd.f32 %v2090_v24, %v2089_v22  ;;  %v2219_v5 = vadd.f32 %v2218_v23, %v2216_v32 }
 0xa4f   :  { %v2125_v34 = vrot.slane %v2124_v30, 1  ;;  %v2154_v35 = vrot.slane %v2153_v7, 4  ;;  %v2286_v46 = vrot.slane %v2285_v31, 4  ;;  %v2191_v53 = vrot.slane %v2190_v36, 1 }
 0xa50   :  { %v2092_v38 = vrot.slane %v2091_v45, 1  ;;  %v2220_v43 = vrot.slane %v2219_v5, 4 }
 0xa51   :  { %v2126_v44 = vadd.f32 %v2125_v34, %v2124_v30  ;;  %v2155_v47 = vadd.f32 %v2154_v35, %v2153_v7  ;;  %v2287_v56 = vadd.f32 %v2286_v46, %v2285_v31  ;;  %v2192_v63 = vadd.f32 %v2191_v53, %v2190_v36  ;;  %v2328_v7 = vld [vmem:[%s4621_s7] sm:$0x1] }
 0xa52   :  { %v2093_v28 = vadd.f32 %v2092_v38, %v2091_v45  ;;  %v2221_v48 = vadd.f32 %v2220_v43, %v2219_v5 }
 0xa53   :  { %v2128_v50 = vsel %vm2127_vm10, %v2126_v44, 0.0  ;;  %v2156_v42 = vrot.slane %v2155_v47, 2  ;;  %v2288_v0 = vrot.slane %v2287_v56, 2  ;;  %v2194_v9 = vsel %vm2193_vm13, %v2192_v63, 0.0 }
 0xa54   :  { %v2095_v55 = vsel %vm2094_vm11, %v2093_v28, 0.0  ;;  %v2222_v39 = vrot.slane %v2221_v48, 2  ;;  %v2249_v52 = vpop.xlane.xlu2 %2248 }
 0xa55   :  { %v2129_v41 = vadd.f32 %v2128_v50, %v2095_v55  ;;  %v2157_v57 = vadd.f32 %v2156_v42, %v2155_v47  ;;  %v2252_v54 = vadd.f32 %v2251_v49, %v2249_v52  ;;  %v2312_v25 = vpop.xlane.xlu1 %2311  ;;  %v2289_v29 = vadd.f32 %v2288_v0, %v2287_v56 }
 0xa56   :  { %v2223_v27 = vadd.f32 %v2222_v39, %v2221_v48  ;;  %v2317_v3 = vadd.f32 %v2316_v60, %v2312_v25 }
 0xa57   :  { %v2158_v58 = vrot.slane %v2157_v57, 1  ;;  %v2253_v59 = vrot.slane %v2252_v54, 4  ;;  %v2290_v16 = vrot.slane %v2289_v29, 1 }
 0xa58   :  { %v2224_v62 = vrot.slane %v2223_v27, 1 }
 0xa59   :  { %v2159_v17 = vadd.f32 %v2158_v58, %v2157_v57  ;;  %v2254_v10 = vadd.f32 %v2253_v59, %v2252_v54  ;;  %v2291_v40 = vadd.f32 %v2290_v16, %v2289_v29 }
 0xa5a   :  { %v2225_v1 = vadd.f32 %v2224_v62, %v2223_v27 }
 0xa5b   :  { %v2161_v2 = vsel %vm2160_vm12, %v2159_v17, 0.0  ;;  %v2255_v4 = vrot.slane %v2254_v10, 2  ;;  %v2293_v20 = vsel %vm2292_vm0, %v2291_v40, 0.0 }
 0xa5c   :  { %v2162_v8 = vadd.f32 %v2161_v2, %v2129_v41  ;;  %v2315_v6 = vpop.xlane.xlu2 %2314  ;;  %v2227_v12 = vsel %vm2226_vm14, %v2225_v1, 0.0 }
 0xa5d   :  { %v2256_v37 = vadd.f32 %v2255_v4, %v2254_v10  ;;  %v2318_v11 = vadd.f32 %v2317_v3, %v2315_v6 }
 0xa5e   :  { %v2195_v21 = vadd.f32 %v2194_v9, %v2162_v8 }
 0xa5f   :  { %v2257_v13 = vrot.slane %v2256_v37, 1  ;;  %v2319_v14 = vrot.slane %v2318_v11, 4 }
 0xa60   :  { %v2228_v15 = vadd.f32 %v2227_v12, %v2195_v21 }
 0xa61   :  { %v2258_v22 = vadd.f32 %v2257_v13, %v2256_v37  ;;  %v2320_v18 = vadd.f32 %v2319_v14, %v2318_v11 }
 0xa63   :  { %v2260_v19 = vsel %vm2259_vm15, %v2258_v22, 0.0  ;;  %v2321_v33 = vrot.slane %v2320_v18, 2 }
 0xa64   :  { %v2261_v23 = vadd.f32 %v2260_v19, %v2228_v15 }
 0xa65   :  { %v2322_v24 = vadd.f32 %v2321_v33, %v2320_v18 }
 0xa66   :  { %v2294_v31 = vadd.f32 %v2293_v20, %v2261_v23 }
 0xa67   :  { %v2323_v26 = vrot.slane %v2322_v24, 1 }
 0xa69   :  { %v2324_v30 = vadd.f32 %v2323_v26, %v2322_v24 }
 0xa6b   :  { %v2326_v32 = vsel %vm2325_vm1, %v2324_v30, 0.0 }
 0xa6c   :  { %v2327_v45 = vadd.f32 %v2326_v32, %v2294_v31 }
 0xa6e   :  { %v2329_v5 = vadd.f32 %v2328_v7, %v2327_v45 }
 0xa70   :  { %2331 = vst.msk [vmem:[#allocation2] sm:$0x1] %vm2330_vm2, %v2329_v5 }
 0xa71   :  { %2342 = dma.vmem_to_hbm [thread:$0]  %s2338_s10, 16, %s2340_s13, [#allocation3]  }
 0xa72   :  { %2883 = dma.done.wait [#allocation3], 16  }
 0xa73   :  { %2884 = vsyncadd [#allocation3], 4294967280 }
 0xa74   :  { %2347 = vsyncpa [#allocation3], 1 }

</bundles_post_ra>
